<compile_context>
chip_gen: v5e
topology: v5e:2x2
jax: 0.10.0
libtpu: 0.0.40
codegen_flags: <defaults>
</compile_context>

<pallas_src>
import numpy as np
import jax
import jax.numpy as jnp
from jax.experimental import pallas as pl
from jax.experimental.pallas import tpu as pltpu

BINS = (1, 2, 3, 6)
CLASSES = 2
FEA_DIM = 32
RED_DIM = FEA_DIM // len(BINS)          # 8
SUM_BB = sum(b * b for b in BINS)       # 50


# -----------------------------------------------------------------------------
# Shared math helpers (traced both inside the Pallas kernel and in the
# pure-JAX reference; everything is VMEM-resident inside the kernel).
# -----------------------------------------------------------------------------
def _pad1_hw(x):
    """Zero-pad a (H, W, C) array by 1 on H and W."""
    H, W, C = x.shape
    zr = jnp.zeros((1, W, C), x.dtype)
    x = jnp.concatenate([zr, x, zr], axis=0)
    zc = jnp.zeros((H + 2, 1, C), x.dtype)
    return jnp.concatenate([zc, x, zc], axis=1)


def _conv3x3_bias_relu(x_hwc, w9, shift):
    """3x3 conv (pad=1) as a single im2col matmul (K = 9*Cin), bias (folded
    BN shift), ReLU.

    x_hwc: (H, W, Cin) f32; w9: (9*Cin, Cout) bf16 (BN scale pre-folded);
    shift: (1, Cout) f32.  Returns (H*W, Cout) f32.
    """
    H, W, C = x_hwc.shape
    xp = _pad1_hw(x_hwc)
    cols = [xp[dy:dy + H, dx:dx + W, :].reshape(H * W, C)
            for dy in range(3) for dx in range(3)]
    im2col = jnp.concatenate(cols, axis=-1).astype(jnp.bfloat16)   # (HW, 9*C)
    y = jnp.dot(im2col, w9, preferred_element_type=jnp.float32)    # (HW, Cout)
    return jnp.maximum(y + shift, 0.0)


def _forward_one_image(x_hwc, stem_w, stem_shift, ppm_P, ppm_U, ppm_w,
                       ppm_shift, ppm_mask, cls_w, cls_shift, head_w, head_b):
    """Full fused forward for a single (H, W, Cin) image -> (CLASSES, H*W)."""
    H, W, _ = x_hwc.shape

    # --- backbone stem (placeholder, see TODO): 3x3 conv + BN + ReLU -> 32 ch
    feats = _conv3x3_bias_relu(x_hwc, stem_w, stem_shift)            # (HW,32) f32

    # --- PPM: all four branches via 3 merged matmuls
    pooled = jnp.dot(ppm_P, feats.astype(jnp.bfloat16),
                     preferred_element_type=jnp.float32)             # (50,32)
    y = jnp.dot(pooled.astype(jnp.bfloat16), ppm_w,
                preferred_element_type=jnp.float32)                  # (50,32)
    y = jnp.maximum(y + ppm_shift, 0.0)
    y = y * ppm_mask               # block-diagonal select: branch's own rows/cols
    up = jnp.dot(ppm_U, y.astype(jnp.bfloat16),
                 preferred_element_type=jnp.float32)                 # (HW,32)

    ppm_fea = jnp.concatenate([feats, up], axis=-1)                  # (HW,64) f32

    # --- cls head: 3x3 conv + BN + ReLU, Dropout2d (eval identity), 1x1 + sigmoid
    # TODO(synk): Dropout2d(p=0.1) train-mode randomness not modeled (eval identity).
    h = _conv3x3_bias_relu(ppm_fea.reshape(H, W, 2 * FEA_DIM), cls_w, cls_shift)
    logits = jnp.dot(h.astype(jnp.bfloat16), head_w,
                     preferred_element_type=jnp.float32) + head_b    # (HW, CLASSES)
    out = jax.nn.sigmoid(logits)

    # channel-major, lane-dense layout (last dim = HW instead of CLASSES=2)
    return out.T                                                     # (CLASSES, HW)


# -----------------------------------------------------------------------------
# Fused forward kernel (one grid step per image)
# -----------------------------------------------------------------------------
def _repisd_fused_kernel(x_ref,
                         stem_w_ref, stem_shift_ref,
                         ppm_p_ref, ppm_u_ref, ppm_w_ref,
                         ppm_shift_ref, ppm_mask_ref,
                         cls_w_ref, cls_shift_ref,
                         head_w_ref, head_b_ref,
                         o_ref):
    out = _forward_one_image(
        x_ref[...],
        stem_w_ref[...], stem_shift_ref[...],
        ppm_p_ref[...], ppm_u_ref[...], ppm_w_ref[...],
        ppm_shift_ref[...], ppm_mask_ref[...],
        cls_w_ref[...], cls_shift_ref[...],
        head_w_ref[...], head_b_ref[...])
    o_ref[...] = out.astype(o_ref.dtype)                             # (CLASSES, HW)


_WEIGHT_NAMES = ['stem_w', 'stem_shift',
                 'ppm_P', 'ppm_U', 'ppm_w', 'ppm_shift', 'ppm_mask',
                 'cls_w', 'cls_shift',
                 'head_w', 'head_b']


# -----------------------------------------------------------------------------
# pallas_call wrapper
# -----------------------------------------------------------------------------
def repisd_forward(x_nchw, params):
    N, Cin, H, W = x_nchw.shape
    HW = H * W
    x = jnp.transpose(x_nchw, (0, 2, 3, 1)).astype(jnp.float32)   # NCHW -> NHWC

    weights = [params[name] for name in _WEIGHT_NAMES]

    def full_spec(arr):
        nd = arr.ndim
        return pl.BlockSpec(arr.shape, lambda n, _nd=nd: (0,) * _nd)

    out = pl.pallas_call(
        _repisd_fused_kernel,
        out_shape=jax.ShapeDtypeStruct((N, CLASSES, HW), jnp.float32),
        grid=(N,),
        in_specs=[pl.BlockSpec((None, H, W, Cin), lambda n: (n, 0, 0, 0))]
                + [full_spec(w) for w in weights],
        out_specs=pl.BlockSpec((None, CLASSES, HW), lambda n: (n, 0, 0)),
        compiler_params=pltpu.CompilerParams(
            dimension_semantics=("parallel",)),
    )(x, *weights)

    return out.reshape(N, CLASSES, H, W)                          # NCHW, free reshape


# -----------------------------------------------------------------------------
# Pure-JAX reference (same math / same matrices, no Pallas) for validation.
# -----------------------------------------------------------------------------
def repisd_reference(x_nchw, params):
    N, Cin, H, W = x_nchw.shape
    x = jnp.transpose(x_nchw, (0, 2, 3, 1)).astype(jnp.float32)
    weights = [params[name] for name in _WEIGHT_NAMES]
    out = jax.vmap(lambda img: _forward_one_image(img, *weights))(x)
    return out.reshape(N, CLASSES, H, W)


# -----------------------------------------------------------------------------
# Parameter / matrix construction (plain numpy / JAX glue, runs once)
# -----------------------------------------------------------------------------
def _pool_matrix_1d(out_size, in_size):
    """Rows: PyTorch AdaptiveAvgPool region averages."""
    P = np.zeros((out_size, in_size), np.float32)
    for j in range(out_size):
        s = (j * in_size) // out_size
        e = -((-(j + 1) * in_size) // out_size)   # ceil((j+1)*in/out)
        P[j, s:e] = 1.0 / (e - s)
    return P


def _upsample_matrix_1d(out_size, in_size):
    """Bilinear interpolation weights with align_corners=True."""
    U = np.zeros((out_size, in_size), np.float32)
    if in_size == 1:
        U[:, 0] = 1.0
        return U
    if out_size == 1:                     # guard: avoid divide-by-zero
        U[0, 0] = 1.0
        return U
    for i in range(out_size):
        src = i * (in_size - 1) / (out_size - 1)
        i0 = min(int(np.floor(src)), in_size - 2)
        f = src - i0
        U[i, i0] += 1.0 - f
        U[i, i0 + 1] += f
    return U


def _fold_bn(gamma, beta, mean, var, eps=1e-5):
    scale = gamma / jnp.sqrt(var + eps)
    shift = beta - mean * scale
    return scale, shift


def init_params(key, in_ch, H, W):
    keys = jax.random.split(key, 32)
    k = iter(keys)

    def rnd(shape, s=0.1):
        return s * jax.random.normal(next(k), shape, dtype=jnp.float32)

    def bn(c):
        gamma = 1.0 + rnd((c,), 0.05)
        beta = rnd((c,), 0.05)
        mean = jnp.zeros((c,), jnp.float32)
        var = jnp.ones((c,), jnp.float32)
        return _fold_bn(gamma, beta, mean, var)

    params = {}

    # Placeholder backbone stem (see TODO at top): 3x3 conv in_ch -> 32, BN, ReLU.
    stem_w = rnd((3, 3, in_ch, FEA_DIM))                                   # HWIO
    s, b = bn(FEA_DIM)
    params['stem_w'] = (stem_w.reshape(9 * in_ch, FEA_DIM)
                        * s[None, :]).astype(jnp.bfloat16)                 # BN scale folded
    params['stem_shift'] = b.reshape(1, FEA_DIM)

    # PPM: merged pooling / upsample matrices, hstacked 1x1 weights, block mask.
    # TODO(synk): at large H,W use the separable (Ph @ X @ Pw^T) form instead of kron.
    P_blocks, U_blocks = [], []
    for bin_ in BINS:
        Ph = _pool_matrix_1d(bin_, H)
        Pw = _pool_matrix_1d(bin_, W)
        Uh = _upsample_matrix_1d(H, bin_)
        Uw = _upsample_matrix_1d(W, bin_)
        P_blocks.append(np.kron(Ph, Pw))          # (bin^2, H*W)
        U_blocks.append(np.kron(Uh, Uw))          # (H*W, bin^2)
    params['ppm_P'] = jnp.asarray(np.concatenate(P_blocks, axis=0), jnp.bfloat16)  # (50, HW)
    params['ppm_U'] = jnp.asarray(np.concatenate(U_blocks, axis=1), jnp.bfloat16)  # (HW, 50)

    w_cat, sh_cat = [], []
    for _ in BINS:
        w = rnd((FEA_DIM, RED_DIM))               # 1x1 conv (Cin, Cout)
        s, b = bn(RED_DIM)
        w_cat.append(w * s[None, :])              # BN scale folded into weight
        sh_cat.append(b)
    params['ppm_w'] = jnp.concatenate(w_cat, axis=1).astype(jnp.bfloat16)  # (32, 32)
    params['ppm_shift'] = jnp.concatenate(sh_cat).reshape(1, FEA_DIM)

    mask = np.zeros((SUM_BB, FEA_DIM), np.float32)
    r = 0
    for i, bin_ in enumerate(BINS):
        mask[r:r + bin_ * bin_, i * RED_DIM:(i + 1) * RED_DIM] = 1.0
        r += bin_ * bin_
    params['ppm_mask'] = jnp.asarray(mask)                                 # (50, 32)

    # cls head.
    cls_w = rnd((3, 3, 2 * FEA_DIM, 32))                                   # 64 -> 32, 3x3
    s, b = bn(32)
    params['cls_w'] = (cls_w.reshape(9 * 2 * FEA_DIM, 32)
                       * s[None, :]).astype(jnp.bfloat16)
    params['cls_shift'] = b.reshape(1, 32)
    params['head_w'] = rnd((32, CLASSES)).astype(jnp.bfloat16)             # 1x1 conv
    params['head_b'] = rnd((CLASSES,), 0.05).reshape(1, CLASSES)
    return params


# -----------------------------------------------------------------------------
if __name__ == "__main__":
    N, C, H, W = 2, 3, 16, 16
    x = jax.random.normal(jax.random.PRNGKey(0), (N, C, H, W), dtype=jnp.float32)
    params = init_params(jax.random.PRNGKey(42), in_ch=C, H=H, W=W)

    fwd = jax.jit(repisd_forward)
    y = jax.block_until_ready(fwd(x, params))

    assert y.shape == (N, CLASSES, H, W), y.shape
    assert bool(jnp.all(jnp.isfinite(y)))
    assert bool(jnp.all((y >= 0.0) & (y <= 1.0)))   # sigmoid output range

    # Validate the Pallas plumbing against a pure-JAX reference (same math,
    # same bf16 operands -> differences are accumulation order only).
    y_ref = jax.block_until_ready(jax.jit(repisd_reference)(x, params))
    max_err = float(jnp.max(jnp.abs(y - y_ref)))
    assert max_err < 5e-3, f"max abs err vs reference: {max_err}"

    print("KERNEL_OK")
</pallas_src>

<mosaic_0001>
module attributes {stable_mosaic.version = 11 : i64} {
  func.func @_repisd_fused_kernel(%arg0: i32, %arg1: memref<1x16x16x3xf32, #tpu.memory_space<vmem>>, %arg2: memref<27x32xbf16, #tpu.memory_space<vmem>>, %arg3: memref<1x32xf32, #tpu.memory_space<vmem>>, %arg4: memref<50x256xbf16, #tpu.memory_space<vmem>>, %arg5: memref<256x50xbf16, #tpu.memory_space<vmem>>, %arg6: memref<32x32xbf16, #tpu.memory_space<vmem>>, %arg7: memref<1x32xf32, #tpu.memory_space<vmem>>, %arg8: memref<50x32xf32, #tpu.memory_space<vmem>>, %arg9: memref<576x32xbf16, #tpu.memory_space<vmem>>, %arg10: memref<1x32xf32, #tpu.memory_space<vmem>>, %arg11: memref<32x2xbf16, #tpu.memory_space<vmem>>, %arg12: memref<1x2xf32, #tpu.memory_space<vmem>>, %arg13: memref<1x2x256xf32, #tpu.memory_space<vmem>>) attributes {dimension_semantics = [#tpu.dimension_semantics<parallel>], iteration_bounds = array<i64: 2>, scalar_prefetch = 0 : i64, scratch_operands = 0 : i64, tpu.core_type = #tpu.core_type<tc>, window_params = [{transform_indices = @transform_0, window_bounds = array<i64: 1, 16, 16, 3>}, {pipeline_mode = #tpu.pipeline_mode<synchronous>, transform_indices = @transform_1, window_bounds = array<i64: 27, 32>}, {pipeline_mode = #tpu.pipeline_mode<synchronous>, transform_indices = @transform_2, window_bounds = array<i64: 1, 32>}, {pipeline_mode = #tpu.pipeline_mode<synchronous>, transform_indices = @transform_3, window_bounds = array<i64: 50, 256>}, {pipeline_mode = #tpu.pipeline_mode<synchronous>, transform_indices = @transform_4, window_bounds = array<i64: 256, 50>}, {pipeline_mode = #tpu.pipeline_mode<synchronous>, transform_indices = @transform_5, window_bounds = array<i64: 32, 32>}, {pipeline_mode = #tpu.pipeline_mode<synchronous>, transform_indices = @transform_6, window_bounds = array<i64: 1, 32>}, {pipeline_mode = #tpu.pipeline_mode<synchronous>, transform_indices = @transform_7, window_bounds = array<i64: 50, 32>}, {pipeline_mode = #tpu.pipeline_mode<synchronous>, transform_indices = @transform_8, window_bounds = array<i64: 576, 32>}, {pipeline_mode = #tpu.pipeline_mode<synchronous>, transform_indices = @transform_9, window_bounds = array<i64: 1, 32>}, {pipeline_mode = #tpu.pipeline_mode<synchronous>, transform_indices = @transform_10, window_bounds = array<i64: 32, 2>}, {pipeline_mode = #tpu.pipeline_mode<synchronous>, transform_indices = @transform_11, window_bounds = array<i64: 1, 2>}, {transform_indices = @transform_12, window_bounds = array<i64: 1, 2, 256>}]} {
    %c0 = arith.constant 0 : index
    %c0_0 = arith.constant 0 : index
    %c0_1 = arith.constant 0 : index
    %c0_2 = arith.constant 0 : index
    %0 = vector.load %arg1[%c0, %c0_0, %c0_1, %c0_2] : memref<1x16x16x3xf32, #tpu.memory_space<vmem>>, vector<1x16x16x3xf32>
    %1 = vector.shape_cast %0 : vector<1x16x16x3xf32> to vector<16x16x3xf32>
    %c0_3 = arith.constant 0 : index
    %c0_4 = arith.constant 0 : index
    %2 = vector.load %arg2[%c0_3, %c0_4] : memref<27x32xbf16, #tpu.memory_space<vmem>>, vector<27x32xbf16>
    %c0_5 = arith.constant 0 : index
    %c0_6 = arith.constant 0 : index
    %3 = vector.load %arg3[%c0_5, %c0_6] : memref<1x32xf32, #tpu.memory_space<vmem>>, vector<1x32xf32>
    %c0_7 = arith.constant 0 : index
    %c0_8 = arith.constant 0 : index
    %4 = vector.load %arg4[%c0_7, %c0_8] : memref<50x256xbf16, #tpu.memory_space<vmem>>, vector<50x256xbf16>
    %c0_9 = arith.constant 0 : index
    %c0_10 = arith.constant 0 : index
    %5 = vector.load %arg5[%c0_9, %c0_10] : memref<256x50xbf16, #tpu.memory_space<vmem>>, vector<256x50xbf16>
    %c0_11 = arith.constant 0 : index
    %c0_12 = arith.constant 0 : index
    %6 = vector.load %arg6[%c0_11, %c0_12] : memref<32x32xbf16, #tpu.memory_space<vmem>>, vector<32x32xbf16>
    %c0_13 = arith.constant 0 : index
    %c0_14 = arith.constant 0 : index
    %7 = vector.load %arg7[%c0_13, %c0_14] : memref<1x32xf32, #tpu.memory_space<vmem>>, vector<1x32xf32>
    %c0_15 = arith.constant 0 : index
    %c0_16 = arith.constant 0 : index
    %8 = vector.load %arg8[%c0_15, %c0_16] : memref<50x32xf32, #tpu.memory_space<vmem>>, vector<50x32xf32>
    %c0_17 = arith.constant 0 : index
    %c0_18 = arith.constant 0 : index
    %9 = vector.load %arg9[%c0_17, %c0_18] : memref<576x32xbf16, #tpu.memory_space<vmem>>, vector<576x32xbf16>
    %c0_19 = arith.constant 0 : index
    %c0_20 = arith.constant 0 : index
    %10 = vector.load %arg10[%c0_19, %c0_20] : memref<1x32xf32, #tpu.memory_space<vmem>>, vector<1x32xf32>
    %c0_21 = arith.constant 0 : index
    %c0_22 = arith.constant 0 : index
    %11 = vector.load %arg11[%c0_21, %c0_22] : memref<32x2xbf16, #tpu.memory_space<vmem>>, vector<32x2xbf16>
    %c0_23 = arith.constant 0 : index
    %c0_24 = arith.constant 0 : index
    %12 = vector.load %arg12[%c0_23, %c0_24] : memref<1x2xf32, #tpu.memory_space<vmem>>, vector<1x2xf32>
    %cst = arith.constant 0.000000e+00 : f32
    %13 = vector.broadcast %cst : f32 to vector<1x16x3xf32>
    %14 = tpu.concatenate %13, %1, %13 in 0 : vector<1x16x3xf32>, vector<16x16x3xf32>, vector<1x16x3xf32> -> vector<18x16x3xf32>
    %cst_25 = arith.constant 0.000000e+00 : f32
    %15 = vector.broadcast %cst_25 : f32 to vector<18x1x3xf32>
    %16 = tpu.concatenate %15, %14, %15 in 1 : vector<18x1x3xf32>, vector<18x16x3xf32>, vector<18x1x3xf32> -> vector<18x18x3xf32>
    %17 = vector.extract_strided_slice %16 {offsets = [0, 0, 0], sizes = [16, 16, 3], strides = [1, 1, 1]} : vector<18x18x3xf32> to vector<16x16x3xf32>
    %18 = vector.shape_cast %17 : vector<16x16x3xf32> to vector<256x3xf32>
    %19 = vector.extract_strided_slice %16 {offsets = [0, 1, 0], sizes = [16, 16, 3], strides = [1, 1, 1]} : vector<18x18x3xf32> to vector<16x16x3xf32>
    %20 = vector.shape_cast %19 : vector<16x16x3xf32> to vector<256x3xf32>
    %21 = vector.extract_strided_slice %16 {offsets = [0, 2, 0], sizes = [16, 16, 3], strides = [1, 1, 1]} : vector<18x18x3xf32> to vector<16x16x3xf32>
    %22 = vector.shape_cast %21 : vector<16x16x3xf32> to vector<256x3xf32>
    %23 = vector.extract_strided_slice %16 {offsets = [1, 0, 0], sizes = [16, 16, 3], strides = [1, 1, 1]} : vector<18x18x3xf32> to vector<16x16x3xf32>
    %24 = vector.shape_cast %23 : vector<16x16x3xf32> to vector<256x3xf32>
    %25 = vector.extract_strided_slice %16 {offsets = [1, 1, 0], sizes = [16, 16, 3], strides = [1, 1, 1]} : vector<18x18x3xf32> to vector<16x16x3xf32>
    %26 = vector.shape_cast %25 : vector<16x16x3xf32> to vector<256x3xf32>
    %27 = vector.extract_strided_slice %16 {offsets = [1, 2, 0], sizes = [16, 16, 3], strides = [1, 1, 1]} : vector<18x18x3xf32> to vector<16x16x3xf32>
    %28 = vector.shape_cast %27 : vector<16x16x3xf32> to vector<256x3xf32>
    %29 = vector.extract_strided_slice %16 {offsets = [2, 0, 0], sizes = [16, 16, 3], strides = [1, 1, 1]} : vector<18x18x3xf32> to vector<16x16x3xf32>
    %30 = vector.shape_cast %29 : vector<16x16x3xf32> to vector<256x3xf32>
    %31 = vector.extract_strided_slice %16 {offsets = [2, 1, 0], sizes = [16, 16, 3], strides = [1, 1, 1]} : vector<18x18x3xf32> to vector<16x16x3xf32>
    %32 = vector.shape_cast %31 : vector<16x16x3xf32> to vector<256x3xf32>
    %33 = vector.extract_strided_slice %16 {offsets = [2, 2, 0], sizes = [16, 16, 3], strides = [1, 1, 1]} : vector<18x18x3xf32> to vector<16x16x3xf32>
    %34 = vector.shape_cast %33 : vector<16x16x3xf32> to vector<256x3xf32>
    %35 = tpu.concatenate %18, %20, %22, %24, %26, %28, %30, %32, %34 in 1 : vector<256x3xf32>, vector<256x3xf32>, vector<256x3xf32>, vector<256x3xf32>, vector<256x3xf32>, vector<256x3xf32>, vector<256x3xf32>, vector<256x3xf32>, vector<256x3xf32> -> vector<256x27xf32>
    %36 = arith.truncf %35 : vector<256x27xf32> to vector<256x27xbf16>
    %cst_26 = arith.constant dense<0.000000e+00> : vector<256x32xf32>
    %37 = tpu.matmul %36, %2, %cst_26 {dimension_numbers = #tpu.dot_dimension_numbers<[1], [0], [0], [1], [0, 0, 1, 1], [], []>} : vector<256x27xbf16>, vector<27x32xbf16>, vector<256x32xf32> -> vector<256x32xf32>
    %38 = vector.broadcast %3 : vector<1x32xf32> to vector<256x32xf32>
    %39 = arith.addf %37, %38 : vector<256x32xf32>
    %cst_27 = arith.constant 0.000000e+00 : f32
    %40 = vector.broadcast %cst_27 : f32 to vector<256x32xf32>
    %41 = arith.maximumf %39, %40 : vector<256x32xf32>
    %42 = arith.truncf %41 : vector<256x32xf32> to vector<256x32xbf16>
    %cst_28 = arith.constant dense<0.000000e+00> : vector<50x32xf32>
    %43 = tpu.matmul %4, %42, %cst_28 {dimension_numbers = #tpu.dot_dimension_numbers<[1], [0], [0], [1], [0, 0, 1, 1], [], []>} : vector<50x256xbf16>, vector<256x32xbf16>, vector<50x32xf32> -> vector<50x32xf32>
    %44 = arith.truncf %43 : vector<50x32xf32> to vector<50x32xbf16>
    %cst_29 = arith.constant dense<0.000000e+00> : vector<50x32xf32>
    %45 = tpu.matmul %44, %6, %cst_29 {dimension_numbers = #tpu.dot_dimension_numbers<[1], [0], [0], [1], [0, 0, 1, 1], [], []>} : vector<50x32xbf16>, vector<32x32xbf16>, vector<50x32xf32> -> vector<50x32xf32>
    %46 = vector.broadcast %7 : vector<1x32xf32> to vector<50x32xf32>
    %47 = arith.addf %45, %46 : vector<50x32xf32>
    %cst_30 = arith.constant 0.000000e+00 : f32
    %48 = vector.broadcast %cst_30 : f32 to vector<50x32xf32>
    %49 = arith.maximumf %47, %48 : vector<50x32xf32>
    %50 = arith.mulf %49, %8 : vector<50x32xf32>
    %51 = arith.truncf %50 : vector<50x32xf32> to vector<50x32xbf16>
    %cst_31 = arith.constant dense<0.000000e+00> : vector<256x32xf32>
    %52 = tpu.matmul %5, %51, %cst_31 {dimension_numbers = #tpu.dot_dimension_numbers<[1], [0], [0], [1], [0, 0, 1, 1], [], []>} : vector<256x50xbf16>, vector<50x32xbf16>, vector<256x32xf32> -> vector<256x32xf32>
    %53 = tpu.concatenate %41, %52 in 1 : vector<256x32xf32>, vector<256x32xf32> -> vector<256x64xf32>
    %54 = vector.shape_cast %53 : vector<256x64xf32> to vector<16x16x64xf32>
    %cst_32 = arith.constant 0.000000e+00 : f32
    %55 = vector.broadcast %cst_32 : f32 to vector<1x16x64xf32>
    %56 = tpu.concatenate %55, %54, %55 in 0 : vector<1x16x64xf32>, vector<16x16x64xf32>, vector<1x16x64xf32> -> vector<18x16x64xf32>
    %cst_33 = arith.constant 0.000000e+00 : f32
    %57 = vector.broadcast %cst_33 : f32 to vector<18x1x64xf32>
    %58 = tpu.concatenate %57, %56, %57 in 1 : vector<18x1x64xf32>, vector<18x16x64xf32>, vector<18x1x64xf32> -> vector<18x18x64xf32>
    %59 = vector.extract_strided_slice %58 {offsets = [0, 0, 0], sizes = [16, 16, 64], strides = [1, 1, 1]} : vector<18x18x64xf32> to vector<16x16x64xf32>
    %60 = vector.shape_cast %59 : vector<16x16x64xf32> to vector<256x64xf32>
    %61 = vector.extract_strided_slice %58 {offsets = [0, 1, 0], sizes = [16, 16, 64], strides = [1, 1, 1]} : vector<18x18x64xf32> to vector<16x16x64xf32>
    %62 = vector.shape_cast %61 : vector<16x16x64xf32> to vector<256x64xf32>
    %63 = vector.extract_strided_slice %58 {offsets = [0, 2, 0], sizes = [16, 16, 64], strides = [1, 1, 1]} : vector<18x18x64xf32> to vector<16x16x64xf32>
    %64 = vector.shape_cast %63 : vector<16x16x64xf32> to vector<256x64xf32>
    %65 = vector.extract_strided_slice %58 {offsets = [1, 0, 0], sizes = [16, 16, 64], strides = [1, 1, 1]} : vector<18x18x64xf32> to vector<16x16x64xf32>
    %66 = vector.shape_cast %65 : vector<16x16x64xf32> to vector<256x64xf32>
    %67 = vector.extract_strided_slice %58 {offsets = [1, 1, 0], sizes = [16, 16, 64], strides = [1, 1, 1]} : vector<18x18x64xf32> to vector<16x16x64xf32>
    %68 = vector.shape_cast %67 : vector<16x16x64xf32> to vector<256x64xf32>
    %69 = vector.extract_strided_slice %58 {offsets = [1, 2, 0], sizes = [16, 16, 64], strides = [1, 1, 1]} : vector<18x18x64xf32> to vector<16x16x64xf32>
    %70 = vector.shape_cast %69 : vector<16x16x64xf32> to vector<256x64xf32>
    %71 = vector.extract_strided_slice %58 {offsets = [2, 0, 0], sizes = [16, 16, 64], strides = [1, 1, 1]} : vector<18x18x64xf32> to vector<16x16x64xf32>
    %72 = vector.shape_cast %71 : vector<16x16x64xf32> to vector<256x64xf32>
    %73 = vector.extract_strided_slice %58 {offsets = [2, 1, 0], sizes = [16, 16, 64], strides = [1, 1, 1]} : vector<18x18x64xf32> to vector<16x16x64xf32>
    %74 = vector.shape_cast %73 : vector<16x16x64xf32> to vector<256x64xf32>
    %75 = vector.extract_strided_slice %58 {offsets = [2, 2, 0], sizes = [16, 16, 64], strides = [1, 1, 1]} : vector<18x18x64xf32> to vector<16x16x64xf32>
    %76 = vector.shape_cast %75 : vector<16x16x64xf32> to vector<256x64xf32>
    %77 = tpu.concatenate %60, %62, %64, %66, %68, %70, %72, %74, %76 in 1 : vector<256x64xf32>, vector<256x64xf32>, vector<256x64xf32>, vector<256x64xf32>, vector<256x64xf32>, vector<256x64xf32>, vector<256x64xf32>, vector<256x64xf32>, vector<256x64xf32> -> vector<256x576xf32>
    %78 = arith.truncf %77 : vector<256x576xf32> to vector<256x576xbf16>
    %cst_34 = arith.constant dense<0.000000e+00> : vector<256x32xf32>
    %79 = tpu.matmul %78, %9, %cst_34 {dimension_numbers = #tpu.dot_dimension_numbers<[1], [0], [0], [1], [0, 0, 1, 1], [], []>} : vector<256x576xbf16>, vector<576x32xbf16>, vector<256x32xf32> -> vector<256x32xf32>
    %80 = vector.broadcast %10 : vector<1x32xf32> to vector<256x32xf32>
    %81 = arith.addf %79, %80 : vector<256x32xf32>
    %cst_35 = arith.constant 0.000000e+00 : f32
    %82 = vector.broadcast %cst_35 : f32 to vector<256x32xf32>
    %83 = arith.maximumf %81, %82 : vector<256x32xf32>
    %84 = arith.truncf %83 : vector<256x32xf32> to vector<256x32xbf16>
    %cst_36 = arith.constant dense<0.000000e+00> : vector<256x2xf32>
    %85 = tpu.matmul %84, %11, %cst_36 {dimension_numbers = #tpu.dot_dimension_numbers<[1], [0], [0], [1], [0, 0, 1, 1], [], []>} : vector<256x32xbf16>, vector<32x2xbf16>, vector<256x2xf32> -> vector<256x2xf32>
    %86 = vector.broadcast %12 : vector<1x2xf32> to vector<256x2xf32>
    %87 = arith.addf %85, %86 : vector<256x2xf32>
    %88 = arith.negf %87 : vector<256x2xf32>
    %89 = math.exp %88 : vector<256x2xf32>
    %cst_37 = arith.constant 1.000000e+00 : f32
    %90 = vector.broadcast %cst_37 : f32 to vector<256x2xf32>
    %91 = arith.addf %90, %89 : vector<256x2xf32>
    %92 = arith.divf %90, %91 : vector<256x2xf32>
    %93 = tpu.transpose %92, [1, 0] : vector<256x2xf32> -> vector<2x256xf32>
    %c0_38 = arith.constant 0 : index
    %c0_39 = arith.constant 0 : index
    %c0_40 = arith.constant 0 : index
    %94 = vector.load %arg13[%c0_38, %c0_39, %c0_40] : memref<1x2x256xf32, #tpu.memory_space<vmem>>, vector<1x2x256xf32>
    %95 = vector.shape_cast %94 : vector<1x2x256xf32> to vector<2x256xf32>
    %96 = vector.shape_cast %93 : vector<2x256xf32> to vector<1x2x256xf32>
    tpu.vector_store %arg13[%c0_38, %c0_39, %c0_40], %96 {strides = array<i32>} : memref<1x2x256xf32, #tpu.memory_space<vmem>>, vector<1x2x256xf32>,
    return
  }
  func.func @transform_0(%arg0: i32) -> (i32, i32, i32, i32) {
    %c0_i32 = arith.constant 0 : i32
    %c0_i32_0 = arith.constant 0 : i32
    %c0_i32_1 = arith.constant 0 : i32
    %c0_i32_2 = arith.constant 0 : i32
    return %arg0, %c0_i32, %c0_i32_0, %c0_i32_1 : i32, i32, i32, i32
  }
  func.func @transform_1(%arg0: i32) -> (i32, i32) {
    %c0_i32 = arith.constant 0 : i32
    %c0_i32_0 = arith.constant 0 : i32
    %c0_i32_1 = arith.constant 0 : i32
    return %c0_i32, %c0_i32_0 : i32, i32
  }
  func.func @transform_2(%arg0: i32) -> (i32, i32) {
    %c0_i32 = arith.constant 0 : i32
    %c0_i32_0 = arith.constant 0 : i32
    %c0_i32_1 = arith.constant 0 : i32
    return %c0_i32, %c0_i32_0 : i32, i32
  }
  func.func @transform_3(%arg0: i32) -> (i32, i32) {
    %c0_i32 = arith.constant 0 : i32
    %c0_i32_0 = arith.constant 0 : i32
    %c0_i32_1 = arith.constant 0 : i32
    return %c0_i32, %c0_i32_0 : i32, i32
  }
  func.func @transform_4(%arg0: i32) -> (i32, i32) {
    %c0_i32 = arith.constant 0 : i32
    %c0_i32_0 = arith.constant 0 : i32
    %c0_i32_1 = arith.constant 0 : i32
    return %c0_i32, %c0_i32_0 : i32, i32
  }
  func.func @transform_5(%arg0: i32) -> (i32, i32) {
    %c0_i32 = arith.constant 0 : i32
    %c0_i32_0 = arith.constant 0 : i32
    %c0_i32_1 = arith.constant 0 : i32
    return %c0_i32, %c0_i32_0 : i32, i32
  }
  func.func @transform_6(%arg0: i32) -> (i32, i32) {
    %c0_i32 = arith.constant 0 : i32
    %c0_i32_0 = arith.constant 0 : i32
    %c0_i32_1 = arith.constant 0 : i32
    return %c0_i32, %c0_i32_0 : i32, i32
  }
  func.func @transform_7(%arg0: i32) -> (i32, i32) {
    %c0_i32 = arith.constant 0 : i32
    %c0_i32_0 = arith.constant 0 : i32
    %c0_i32_1 = arith.constant 0 : i32
    return %c0_i32, %c0_i32_0 : i32, i32
  }
  func.func @transform_8(%arg0: i32) -> (i32, i32) {
    %c0_i32 = arith.constant 0 : i32
    %c0_i32_0 = arith.constant 0 : i32
    %c0_i32_1 = arith.constant 0 : i32
    return %c0_i32, %c0_i32_0 : i32, i32
  }
  func.func @transform_9(%arg0: i32) -> (i32, i32) {
    %c0_i32 = arith.constant 0 : i32
    %c0_i32_0 = arith.constant 0 : i32
    %c0_i32_1 = arith.constant 0 : i32
    return %c0_i32, %c0_i32_0 : i32, i32
  }
  func.func @transform_10(%arg0: i32) -> (i32, i32) {
    %c0_i32 = arith.constant 0 : i32
    %c0_i32_0 = arith.constant 0 : i32
    %c0_i32_1 = arith.constant 0 : i32
    return %c0_i32, %c0_i32_0 : i32, i32
  }
  func.func @transform_11(%arg0: i32) -> (i32, i32) {
    %c0_i32 = arith.constant 0 : i32
    %c0_i32_0 = arith.constant 0 : i32
    %c0_i32_1 = arith.constant 0 : i32
    return %c0_i32, %c0_i32_0 : i32, i32
  }
  func.func @transform_12(%arg0: i32) -> (i32, i32, i32) {
    %c0_i32 = arith.constant 0 : i32
    %c0_i32_0 = arith.constant 0 : i32
    %c0_i32_1 = arith.constant 0 : i32
    return %arg0, %c0_i32, %c0_i32_0 : i32, i32, i32
  }
}

</mosaic_0001>

<bundles_post_ra>
// kernel: repisd_forward.1
= control target key start
LH: loop header
LB: loop body
LE: loop exit
PB: predicated region body
PF: predicated region fallthrough
CT: control target
= control target key end

     0   :  { %s6935_s21 = smov 0   ;;  %s9843_s0 = inlined_call_operand.vmem [shape: f32[2,16,16,3], index: 0, kind: input, shape index: {}]   ;;  %s9844_s1 = inlined_call_operand.vmem [shape: bf16[27,32], index: 1, kind: input, shape index: {}]   ;;  %s9845_s2 = inlined_call_operand.vmem [shape: f32[1,32], index: 2, kind: input, shape index: {}]   ;;  %s9846_s3 = inlined_call_operand.vmem [shape: bf16[50,256], index: 3, kind: input, shape index: {}]   ;;  %s9847_s4 = inlined_call_operand.vmem [shape: bf16[256,50], index: 4, kind: input, shape index: {}]   ;;  %s9848_s5 = inlined_call_operand.vmem [shape: bf16[32,32], index: 5, kind: input, shape index: {}]   ;;  %s9849_s6 = inlined_call_operand.vmem [shape: f32[1,32], index: 6, kind: input, shape index: {}]   ;;  %s9850_s7 = inlined_call_operand.vmem [shape: f32[50,32], index: 7, kind: input, shape index: {}]   ;;  %s9851_s8 = inlined_call_operand.vmem [shape: bf16[576,32], index: 8, kind: input, shape index: {}]   ;;  %s9852_s9 = inlined_call_operand.vmem [shape: f32[1,32], index: 9, kind: input, shape index: {}]   ;;  %s9853_s10 = inlined_call_operand.vmem [shape: bf16[32,2], index: 10, kind: input, shape index: {}]   ;;  %s9854_s11 = inlined_call_operand.vmem [shape: f32[1,2], index: 11, kind: input, shape index: {}]   ;;  %s9855_s12 = inlined_call_operand.vmem [shape: f32[2,2,256], index: 12, kind: output, shape index: {}]  }
   0x1 LB: > { %s5282_s22 = sadd.s32 4294967295, %s6856_s21   ;;  %p5286_p0 = scmp.ge.s32.totalorder %s6856_s21, 1  ;;  %s6856_s21 = sphi %s6935_s21, %s22_s21  }
   0x2   : > { %p362_p1 = scmp.lt.s32.totalorder %s6856_s21, 3 }
   0x4   : > { %p363_p2 = pnand %p5286_p0, %p362_p1 }
   0x6   : > { %366 = sbr.rel (%p363_p2) target bundleno = 2308 (0x904), region = 68 }
   0xb   : > { %vm614_vm0 = vcmask 1040384   ;;  %p404_p3 = scmp.lt.s32.totalorder %s5282_s22, 1  ;;  %v6858_v0 = vmov 0.0   ;;  %vm780_vm1 = vcmask 1046528   ;;  %vm861_vm2 = vcmask 1045504   ;;  %s6859_s27 = smov 3  }
   0xc   : > { %v6943_v1 = vrot.slane %v6858_v0, 7  ;;  %s6860_s28 = smov 9   ;;  %s6861_s29 = smov 6   ;;  %vm2065_vm3 = vcmask 1044480   ;;  %vm1722_vm4 = vcmask 23552   ;;  %vm1755_vm5 = vcmask 48128  }
   0xd   : > { %s10050_s22 = smov (!%p404_p3, %s5282_s22), 1  ;;  %s6862_s30 = smov 18   ;;  %vm1788_vm6 = vcmask 72704   ;;  %vm1821_vm7 = vcmask 97280   ;;  %vm1854_vm8 = vcmask 121856   ;;  %vm1887_vm9 = vcmask 146432  }
   0xe   : > { %v6949_v2 = vsel %vm614_vm0, 0.0, %v6943_v1  ;;  %v731_v3 = vsel %vm614_vm0, %v6943_v1, 0.0  ;;  %v782_v4 = vrot.slane %v6943_v1, 1  ;;  %s5649_s23 = sshll.u32 %s10050_s22, 8  ;;  %v863_v8 = vrot.slane %v6943_v1, 2  ;;  %s6863_s13 = smov 12  }
   0xf   : > { %v781_v5 = vrot.slane %v6949_v2, 1  ;;  %v784_v6 = vrot.slane %v731_v3, 1  ;;  %v862_v7 = vrot.slane %v6949_v2, 2  ;;  %v865_v9 = vrot.slane %v731_v3, 2  ;;  %s6961_s26 = scalar_lea.vmem %s9843_s0, %s5649_s23  ;;  %s6864_s14 = smov 21  }
  0x10   : > { %v415_v12 = vld [vmem:[%s6961_s26] sm:$0xff]  ;;  %v416_v13 = vld [vmem:[%s6961_s26 + $0x8] sm:$0xff]  ;;  %v417_v14 = vld [vmem:[%s6961_s26 + $0x10] sm:$0xff]  ;;  %s6865_s15 = smov 15   ;;  %s6866_s16 = smov 24   ;;  %vm1920_vm10 = vcmask 171008  }
  0x11   : > { %v783_v10 = vsel %vm780_vm1, %v781_v5, %v782_v4  ;;  %v785_v11 = vsel %vm780_vm1, %v782_v4, %v784_v6  ;;  %v617_v16 = vrot.slane %v415_v12, 7  ;;  %v618_v17 = vrot.slane %v416_v13, 7  ;;  %v418_v18 = vld [vmem:[%s6961_s26 + $0x18] sm:$0xff]  ;;  %v419_v56 = vld [vmem:[%s6961_s26 + $0x20] sm:$0xff]  ;;  %v420_v57 = vld [vmem:[%s6961_s26 + $0x28] sm:$0xff]  ;;  %s6868_s23 = smov 32  }
  0x12   : > { %v6968_v15 = vpack.i.bf16 %v785_v11, %v783_v10  ;;  %v6972_v19 = vsel %vm861_vm2, %v862_v7, %v863_v8  ;;  %v620_v20 = vrot.slane %v417_v14, 7  ;;  %v621_v21 = vrot.slane %v418_v18, 7  ;;  %v421_v14 = vld [vmem:[%s6961_s26 + $0x30] sm:$0xff]  ;;  %s5650_s25 = sshll.u32 %s10050_s22, 2 }
  0x13   : > { %9915 = vst [vmem:[#allocation2_spill] sm:$0xff] %v6972_v19  ;;  %v6977_v22 = vsel %vm614_vm0, %v617_v16, %v618_v17  ;;  %v6980_v23 = vsel %vm614_vm0, 0.0, %v617_v16  ;;  %v6983_v24 = vsel %vm861_vm2, %v863_v8, %v865_v9  ;;  %v732_v25 = vsel %vm614_vm0, %v618_v17, 0.0  ;;  %v422_v16 = vld [vmem:[%s6961_s26 + $0x38] sm:$0xff] }
  0x14   : > { %5752 = vrot.lane.b32.xlu0 %v6968_v15, %s6859_s27  ;;  %9916 = vst [vmem:[#allocation3_spill] sm:$0xff] %v6983_v24  ;;  %v5761_v26 = vpack.i.bf16 %v6977_v22, %v6980_v23  ;;  %v786_v27 = vrot.slane %v6980_v23, 1  ;;  %v787_v28 = vrot.slane %v6977_v22, 1  ;;  %v789_v29 = vrot.slane %v732_v25, 1 }
  0x15   : > { %v6991_v30 = vsel %vm614_vm0, %v620_v20, %v621_v21  ;;  %v6994_v31 = vsel %vm614_vm0, 0.0, %v620_v20  ;;  %v733_v32 = vsel %vm614_vm0, %v621_v21, 0.0  ;;  %v7000_v33 = vpack.i.bf16 %v6983_v24, %v6972_v19 }
  0x16   : > { %5762 = vrot.lane.b32.xlu1 %v5761_v26, %s6860_s28  ;;  %v788_v34 = vsel %vm780_vm1, %v786_v27, %v787_v28  ;;  %v790_v35 = vsel %vm780_vm1, %v787_v28, %v789_v29  ;;  %v791_v36 = vrot.slane %v6994_v31, 1  ;;  %v792_v37 = vrot.slane %v6991_v30, 1 }
  0x17   : > { %v794_v38 = vrot.slane %v733_v32, 1  ;;  %v5766_v39 = vpack.i.bf16 %v6991_v30, %v6994_v31  ;;  %v5771_v40 = vpack.i.bf16 %v790_v35, %v788_v34  ;;  %v867_v41 = vrot.slane %v6980_v23, 2 }
  0x18   : > { %v868_v42 = vrot.slane %v6977_v22, 2  ;;  %v870_v43 = vrot.slane %v732_v25, 2  ;;  %v872_v44 = vrot.slane %v6994_v31, 2  ;;  %v873_v45 = vrot.slane %v6991_v30, 2 }
  0x19   : > { %v875_v46 = vrot.slane %v733_v32, 2  ;;  %5767 = vrot.lane.b32.xlu2 %v5766_v39, %s6862_s30  ;;  %v793_v47 = vsel %vm780_vm1, %v791_v36, %v792_v37  ;;  %v795_v48 = vsel %vm780_vm1, %v792_v37, %v794_v38  ;;  %v623_v58 = vrot.slane %v419_v56, 7 }
  0x1a   : > { %v869_v49 = vsel %vm861_vm2, %v867_v41, %v868_v42  ;;  %v871_v50 = vsel %vm861_vm2, %v868_v42, %v870_v43  ;;  %v5781_v51 = vpack.i.bf16 %v795_v48, %v793_v47  ;;  %v874_v52 = vsel %vm861_vm2, %v872_v44, %v873_v45  ;;  %v423_v41 = vld [vmem:[%s6961_s26 + $0x40] sm:$0xff]  ;;  %v424_v42 = vld [vmem:[%s6961_s26 + $0x48] sm:$0xff] }
  0x1b   : > { %v876_v53 = vsel %vm861_vm2, %v873_v45, %v875_v46  ;;  %v5776_v54 = vpack.i.bf16 %v871_v50, %v869_v49  ;;  %v624_v59 = vrot.slane %v420_v57, 7  ;;  %v7035_v62 = vsel %vm614_vm0, 0.0, %v623_v58 }
  0x1c   : > { %5757 = vrot.lane.b32.xlu0 %v7000_v33, %s6861_s29  ;;  %v5786_v55 = vpack.i.bf16 %v876_v53, %v874_v52  ;;  %v877_v63 = vrot.slane %v7035_v62, 2  ;;  %v796_v5 = vrot.slane %v7035_v62, 1  ;;  %v626_v17 = vrot.slane %v421_v14, 7 }
  0x1d   : > { %v734_v60 = vsel %vm614_vm0, %v624_v59, 0.0  ;;  %v7032_v61 = vsel %vm614_vm0, %v623_v58, %v624_v59  ;;  %v627_v18 = vrot.slane %v422_v16, 7  ;;  %v629_v44 = vrot.slane %v423_v41, 7  ;;  %v428_v41 = vld [vmem:[%s6961_s26 + $0x68] sm:$0xff] }
  0x1e   : > { %5772 = vrot.lane.b32.xlu1 %v5771_v40, %s6863_s13  ;;  %v878_v0 = vrot.slane %v7032_v61, 2  ;;  %v880_v3 = vrot.slane %v734_v60, 2  ;;  %v5816_v4 = vpack.i.bf16 %v7032_v61, %v7035_v62  ;;  %v797_v6 = vrot.slane %v7032_v61, 1 }
  0x1f   : > { %v799_v7 = vrot.slane %v734_v60, 1  ;;  %v7056_v20 = vsel %vm614_vm0, %v626_v17, %v627_v18  ;;  %v7059_v21 = vsel %vm614_vm0, 0.0, %v626_v17  ;;  %v735_v25 = vsel %vm614_vm0, %v627_v18, 0.0  ;;  %v5297_v17 = vld [vmem:[%s9844_s1 + $0x8] sm:$0xf] }
  0x20   : > { %v879_v8 = vsel %vm861_vm2, %v877_v63, %v878_v0  ;;  %v881_v9 = vsel %vm861_vm2, %v878_v0, %v880_v3  ;;  %v798_v10 = vsel %vm780_vm1, %v796_v5, %v797_v6  ;;  %v801_v26 = vrot.slane %v7059_v21, 1  ;;  %v425_v0 = vld [vmem:[%s6961_s26 + $0x50] sm:$0xff]  ;;  %v426_v3 = vld [vmem:[%s6961_s26 + $0x58] sm:$0xff]  ;;  %v5652_v18 = vld [vmem:[%s9844_s1 + $0x8] sm:$0x30] }
  0x21   : > { %5777 = vrot.lane.b32.xlu2 %v5776_v54, %s6865_s15  ;;  %v800_v11 = vsel %vm780_vm1, %v797_v6, %v799_v7  ;;  %v5826_v12 = vpack.i.bf16 %v881_v9, %v879_v8  ;;  %v802_v27 = vrot.slane %v7056_v20, 1  ;;  %v804_v28 = vrot.slane %v735_v25, 1 }
  0x22   : > { %v5821_v13 = vpack.i.bf16 %v800_v11, %v798_v10  ;;  %v5856_v29 = vpack.i.bf16 %v7056_v20, %v7059_v21  ;;  %v882_v36 = vrot.slane %v7059_v21, 2  ;;  %v883_v37 = vrot.slane %v7056_v20, 2 }
  0x23   : > { %v803_v32 = vsel %vm780_vm1, %v801_v26, %v802_v27  ;;  %v805_v34 = vsel %vm780_vm1, %v802_v27, %v804_v28  ;;  %v885_v38 = vrot.slane %v735_v25, 2  ;;  %v630_v45 = vrot.slane %v424_v42, 7  ;;  %v5651_v42 = vld [vmem:[%s9844_s1] sm:$0xff] }
  0x24   : > { %5782 = vrot.lane.b32.xlu0 %v5781_v51, %s6864_s14  ;;  %v5861_v35 = vpack.i.bf16 %v805_v34, %v803_v32  ;;  %v7086_v47 = vsel %vm614_vm0, 0.0, %v629_v44  ;;  %v633_v5 = vrot.slane %v426_v3, 7  ;;  %v5298_v25 = vor.u32 %v5652_v18, %v5297_v17 }
  0x25   : > { %v7083_v46 = vsel %vm614_vm0, %v629_v44, %v630_v45  ;;  %v736_v48 = vsel %vm614_vm0, %v630_v45, 0.0  ;;  %v806_v49 = vrot.slane %v7086_v47, 1  ;;  %v887_v52 = vrot.slane %v7086_v47, 2 }
  0x26   : > { %5787 = vrot.lane.b32.xlu1 %v5786_v55, %s6866_s16  ;;  %v807_v50 = vrot.slane %v7083_v46, 1  ;;  %v888_v53 = vrot.slane %v7083_v46, 2  ;;  %v5896_v60 = vpack.i.bf16 %v7083_v46, %v7086_v47  ;;  %v737_v6 = vsel %vm614_vm0, %v633_v5, 0.0 }
  0x27   : > { %v895_v11 = vrot.slane %v737_v6, 2  ;;  %v814_v14 = vrot.slane %v737_v6, 1  ;;  %v6867_v26 = vmov 65535   ;;  %v636_v44 = vrot.slane %v428_v41, 7 }
  0x28   : > { %v889_v58 = vsel %vm861_vm2, %v887_v52, %v888_v53  ;;  %v2066_v27 = vsel %vm2065_vm3, 4294967295, %v6867_v26  ;;  %vm1953_vm11 = vcmask 195584   ;;  %vm2016_vm12 = vcmask 220160  }
  0x29   : > { %5792 = vrot.lane.b32.xlu2 %v5771_v40, %s6859_s27  ;;  %v886_v40 = vsel %vm861_vm2, %v883_v37, %v885_v38  ;;  %v2067_v32 = vsel %vm861_vm2, %v2066_v27, 0  ;;  %vm2320_vm13 = vcmask 261120   ;;  %vm2459_vm14 = vcmask 408576  }
  0x2a   : > { %vm3472_vm15 = vcmask 523264  }
  0x2c   : > { %5797 = vrot.lane.b32.xlu0 %v5776_v54, %s6861_s29  ;;  %v890_v54 = vrot.slane %v736_v48, 2 }
  0x2e   : > { %5802 = vrot.lane.b32.xlu1 %v5766_v39, %s6860_s28  ;;  %v884_v39 = vsel %vm861_vm2, %v882_v36, %v883_v37  ;;  %v891_v59 = vsel %vm861_vm2, %v888_v53, %v890_v54 }
  0x2f   : > { %v5866_v43 = vpack.i.bf16 %v886_v40, %v884_v39  ;;  %v5906_v63 = vpack.i.bf16 %v891_v59, %v889_v58  ;;  %v427_v40 = vld [vmem:[%s6961_s26 + $0x60] sm:$0xff] }
  0x31   : > { %5807 = vrot.lane.b32.xlu2 %v5781_v51, %s6863_s13 }
  0x34   : > { %5812 = vrot.lane.b32.xlu0 %v5786_v55, %s6865_s15 }
  0x36   : > { %5817 = vrot.lane.b32.xlu1 %v5816_v4, %s6862_s30 }
  0x39   : > { %5822 = vrot.lane.b32.xlu2 %v5821_v13, %s6864_s14 }
  0x3c   : > { %5827 = vrot.lane.b32.xlu0 %v5826_v12, %s6866_s16 }
  0x3e   : > { %5832 = vrot.lane.b32.xlu1 %v5781_v51, %s6859_s27  ;;  %v809_v51 = vrot.slane %v736_v48, 1 }
  0x40   : > { %v810_v56 = vsel %vm780_vm1, %v807_v50, %v809_v51 }
  0x41   : > { %5837 = vrot.lane.b32.xlu2 %v5786_v55, %s6861_s29  ;;  %v808_v55 = vsel %vm780_vm1, %v806_v49, %v807_v50  ;;  %v738_v50 = vsel %vm614_vm0, %v636_v44, 0.0 }
  0x42   : > { %v5901_v57 = vpack.i.bf16 %v810_v56, %v808_v55  ;;  %v819_v53 = vrot.slane %v738_v50, 1 }
  0x44   : > { %5842 = vrot.lane.b32.xlu0 %v5816_v4, %s6860_s28  ;;  %v632_v4 = vrot.slane %v425_v0, 7  ;;  %v900_v0 = vrot.slane %v738_v50, 2 }
  0x46   : > { %5847 = vrot.lane.b32.xlu1 %v5821_v13, %s6863_s13  ;;  %v7113_v7 = vsel %vm614_vm0, %v632_v4, %v633_v5  ;;  %v7116_v8 = vsel %vm614_vm0, 0.0, %v632_v4 }
  0x47   : > { %v892_v9 = vrot.slane %v7116_v8, 2  ;;  %v893_v10 = vrot.slane %v7113_v7, 2  ;;  %v5936_v16 = vpack.i.bf16 %v7113_v7, %v7116_v8 }
  0x49   : > { %5852 = vrot.lane.b32.xlu2 %v5826_v12, %s6865_s15  ;;  %v894_v28 = vsel %vm861_vm2, %v892_v9, %v893_v10 }
  0x4c   : > { %5857 = vrot.lane.b32.xlu0 %v5856_v29, %s6862_s30 }
  0x4e   : > { %5862 = vrot.lane.b32.xlu1 %v5861_v35, %s6864_s14 }
  0x51   : > { %5867 = vrot.lane.b32.xlu2 %v5866_v43, %s6866_s16 }
  0x54   : > { %5872 = vrot.lane.b32.xlu0 %v5821_v13, %s6859_s27  ;;  %v812_v13 = vrot.slane %v7113_v7, 1 }
  0x56   : > { %5877 = vrot.lane.b32.xlu1 %v5826_v12, %s6861_s29  ;;  %v811_v12 = vrot.slane %v7116_v8, 1  ;;  %v815_v37 = vsel %vm780_vm1, %v812_v13, %v814_v14 }
  0x58   : > { %v813_v36 = vsel %vm780_vm1, %v811_v12, %v812_v13  ;;  %v429_v12 = vld [vmem:[%s6961_s26 + $0x70] sm:$0xff]  ;;  %v430_v13 = vld [vmem:[%s6961_s26 + $0x78] sm:$0xff] }
  0x59   : > { %5882 = vrot.lane.b32.xlu2 %v5856_v29, %s6860_s28  ;;  %v896_v29 = vsel %vm861_vm2, %v893_v10, %v895_v11  ;;  %v7142_v39 = vpack.i.bf16 %v815_v37, %v813_v36  ;;  %v639_v36 = vrot.slane %v430_v13, 7 }
  0x5a   : > { %v7140_v38 = vpack.i.bf16 %v896_v29, %v894_v28 }
  0x5c   : > { %5887 = vrot.lane.b32.xlu0 %v5861_v35, %s6863_s13 }
  0x5e   : > { %5892 = vrot.lane.b32.xlu1 %v5866_v43, %s6865_s15 }
  0x61   : > { %5897 = vrot.lane.b32.xlu2 %v5896_v60, %s6862_s30 }
  0x64   : > { %5902 = vrot.lane.b32.xlu0 %v5901_v57, %s6864_s14 }
  0x66   : > { %5907 = vrot.lane.b32.xlu1 %v5906_v63, %s6866_s16 }
  0x69   : > { %5912 = vrot.lane.b32.xlu2 %v5861_v35, %s6859_s27  ;;  %v2069_v35 = vand.u32 %v5298_v25, %v2067_v32 }
  0x6b   : > { %2077 = vmatpush.bf16.msra.mxu0 %v2069_v35  ;;  %v638_v35 = vrot.slane %v429_v12, 7 }
  0x6c   : > { %5917 = vrot.lane.b32.xlu0 %v5866_v43, %s6861_s29  ;;  %v635_v43 = vrot.slane %v427_v40, 7 }
  0x6e   : > { %5922 = vrot.lane.b32.xlu1 %v5896_v60, %s6860_s28  ;;  %v7157_v48 = vsel %vm614_vm0, %v635_v43, %v636_v44  ;;  %v7160_v49 = vsel %vm614_vm0, 0.0, %v635_v43 }
  0x6f   : > { %2078 = vmatpush.bf16.msra.mxu0 %v5651_v42  ;;  %v816_v51 = vrot.slane %v7160_v49, 1  ;;  %v817_v52 = vrot.slane %v7157_v48, 1  ;;  %v7173_v56 = vpack.i.bf16 %v7157_v48, %v7160_v49  ;;  %v897_v60 = vrot.slane %v7160_v49, 2 }
  0x71   : > { %5927 = vrot.lane.b32.xlu2 %v5901_v57, %s6863_s13  ;;  %v820_v58 = vsel %vm780_vm1, %v817_v52, %v819_v53 }
  0x73   : > { %v7135_v34 = vpop.permute.xlu2 %5767 }
  0x74   : > { %5932 = vrot.lane.b32.xlu0 %v5906_v63, %s6865_s15  ;;  %v5769_v53 = vunpack.i.l.bf16 %v7135_v34 }
  0x76   : > { %5937 = vrot.lane.b32.xlu1 %v5936_v16, %s6862_s30 }
  0x79   : > { %5942 = vrot.lane.b32.xlu2 %v7142_v39, %s6864_s14 }
  0x7b   : > { %v7153_v45 = vpop.permute.xlu2 %5777 }
  0x7c   : > { %5947 = vrot.lane.b32.xlu0 %v7140_v38, %s6866_s16  ;;  %v5780_v43 = vunpack.i.h.bf16 %v7153_v45  ;;  %v5779_v44 = vunpack.i.l.bf16 %v7153_v45  ;;  %v7217_v45 = vsel %vm614_vm0, 0.0, %v638_v35 }
  0x7e   : > { %5952 = vrot.lane.b32.xlu1 %v5901_v57, %s6859_s27  ;;  %v818_v57 = vsel %vm780_vm1, %v816_v51, %v817_v52  ;;  %v5770_v52 = vunpack.i.h.bf16 %v7135_v34 }
  0x7f   : > { %v7179_v3 = vpack.i.bf16 %v820_v58, %v818_v57  ;;  %v7214_v57 = vsel %vm614_vm0, %v638_v35, %v639_v36  ;;  %v739_v58 = vsel %vm614_vm0, %v639_v36, 0.0 }
  0x81   : > { %5957 = vrot.lane.b32.xlu2 %v5906_v63, %s6861_s29  ;;  %v898_v63 = vrot.slane %v7157_v48, 2 }
  0x83   : > { %v7167_v55 = vpop.permute.xlu2 %5792  ;;  %v899_v9 = vsel %vm861_vm2, %v897_v60, %v898_v63  ;;  %v901_v10 = vsel %vm861_vm2, %v898_v63, %v900_v0 }
  0x84   : > { %5962 = vrot.lane.b32.xlu0 %v5936_v16, %s6860_s28  ;;  %v7193_v17 = vpack.i.bf16 %v901_v10, %v899_v9  ;;  %v5795_v35 = vunpack.i.h.bf16 %v7167_v55  ;;  %v5794_v36 = vunpack.i.l.bf16 %v7167_v55 }
  0x86   : > { %v5753_v54 = vpop.permute.xlu0 %5752  ;;  %5967 = vrot.lane.b32.xlu1 %v7142_v39, %s6863_s13 }
  0x87   : > { %v5755_v4 = vunpack.i.h.bf16 %v5753_v54  ;;  %v5754_v5 = vunpack.i.l.bf16 %v5753_v54 }
  0x88   : > { %v5763_v59 = vpop.permute.xlu1 %5762 }
  0x89   : > { %5972 = vrot.lane.b32.xlu2 %v7140_v38, %s6865_s15  ;;  %v1724_v18 = vsel %vm1722_vm4, %v6943_v1, %v5755_v4  ;;  %v1723_v25 = vsel %vm1722_vm4, %v6949_v2, %v5754_v5  ;;  %v5765_v26 = vunpack.i.h.bf16 %v5763_v59  ;;  %v5764_v27 = vunpack.i.l.bf16 %v5763_v59 }
  0x8a   : > { %v821_v4 = vrot.slane %v7217_v45, 1  ;;  %v822_v5 = vrot.slane %v7214_v57, 1 }
  0x8b   : > { %v7187_v11 = vpop.permute.xlu2 %5807 }
  0x8c   : > { %5977 = vrot.lane.b32.xlu0 %v7173_v56, %s6862_s30 }
  0x8e   : > { %v5758_v6 = vpop.permute.xlu0 %5757  ;;  %5982 = vrot.lane.b32.xlu1 %v7179_v3, %s6864_s14 }
  0x8f   : > { %v5760_v14 = vunpack.i.h.bf16 %v5758_v6  ;;  %v5759_v16 = vunpack.i.l.bf16 %v5758_v6  ;;  %v824_v6 = vrot.slane %v739_v58, 1 }
  0x90   : > { %v5773_v32 = vpop.permute.xlu1 %5772 }
  0x91   : > { %v1756_v28 = vsel %vm1755_vm5, %v1723_v25, %v5759_v16  ;;  %v1757_v29 = vsel %vm1755_vm5, %v1724_v18, %v5760_v14  ;;  %v5775_v41 = vunpack.i.h.bf16 %v5773_v32  ;;  %v5774_v42 = vunpack.i.l.bf16 %v5773_v32  ;;  %5987 = vrot.lane.b32.xlu2 %v7193_v17, %s6866_s16 }
  0x92   : > { %v1789_v37 = vsel %vm1788_vm6, %v1756_v28, %v5764_v27  ;;  %v1790_v40 = vsel %vm1788_vm6, %v1757_v29, %v5765_v26  ;;  %v903_v26 = vrot.slane %v7214_v57, 2  ;;  %v905_v27 = vrot.slane %v739_v58, 2 }
  0x93   : > { %v1823_v50 = vsel %vm1821_vm7, %v1790_v40, %v5775_v41  ;;  %v1822_v51 = vsel %vm1821_vm7, %v1789_v37, %v5774_v42  ;;  %v7220_v59 = vpop.permute.xlu2 %5822  ;;  %v823_v29 = vsel %vm780_vm1, %v821_v4, %v822_v5  ;;  %v825_v32 = vsel %vm780_vm1, %v822_v5, %v824_v6 }
  0x94   : > { %5992 = vrot.lane.b32.xlu0 %v7142_v39, %s6859_s27  ;;  %v1855_v39 = vsel %vm1854_vm8, %v1822_v51, %v5779_v44  ;;  %v1856_v60 = vsel %vm1854_vm8, %v1823_v50, %v5780_v43  ;;  %v7249_v41 = vpack.i.bf16 %v825_v32, %v823_v29  ;;  %v906_v42 = vsel %vm861_vm2, %v903_v26, %v905_v27 }
  0x95   : > { %v1888_v12 = vsel %vm1887_vm9, %v1855_v39, %v5769_v53  ;;  %v1889_v13 = vsel %vm1887_vm9, %v1856_v60, %v5770_v52  ;;  %v6016_v43 = vpack.i.bf16 %v7214_v57, %v7217_v45  ;;  %v1726_v51 = vsel %vm1722_vm4, %v6977_v22, %v5795_v35 }
  0x96   : > { %v5783_v54 = vpop.permute.xlu0 %5782  ;;  %5997 = vrot.lane.b32.xlu1 %v7140_v38, %s6861_s29  ;;  %v902_v38 = vrot.slane %v7217_v45, 2  ;;  %v1725_v52 = vsel %vm1722_vm4, %v6980_v23, %v5794_v36  ;;  %v5810_v23 = vunpack.i.h.bf16 %v7187_v11  ;;  %v5825_v27 = vunpack.i.h.bf16 %v7220_v59 }
  0x97   : > { %v5785_v63 = vunpack.i.h.bf16 %v5783_v54  ;;  %v5784_v0 = vunpack.i.l.bf16 %v5783_v54 }
  0x98   : > { %v5788_v34 = vpop.permute.xlu1 %5787 }
  0x99   : > { %v5790_v9 = vunpack.i.h.bf16 %v5788_v34  ;;  %v5789_v10 = vunpack.i.l.bf16 %v5788_v34  ;;  %v1921_v14 = vsel %vm1920_vm10, %v1888_v12, %v5784_v0  ;;  %v1922_v16 = vsel %vm1920_vm10, %v1889_v13, %v5785_v63  ;;  %6002 = vrot.lane.b32.xlu2 %v7173_v56, %s6860_s28 }
  0x9a   : > { %v904_v56 = vsel %vm861_vm2, %v902_v38, %v903_v26  ;;  %v5809_v0 = vunpack.i.l.bf16 %v7187_v11 }
  0x9b   : > { %v1954_v18 = vsel %vm1953_vm11, %v1921_v14, %v5789_v10  ;;  %v1955_v25 = vsel %vm1953_vm11, %v1922_v16, %v5790_v9  ;;  %v7244_v40 = vpop.permute.xlu2 %5837  ;;  %v7259_v53 = vpack.i.bf16 %v906_v42, %v904_v56  ;;  %v431_v9 = vld [vmem:[%s6961_s26 + $0x80] sm:$0xff]  ;;  %v432_v10 = vld [vmem:[%s6961_s26 + $0x88] sm:$0xff] }
  0x9c   : > { %6007 = vrot.lane.b32.xlu0 %v7179_v3, %s6863_s13  ;;  %v1986_v28 = vpack.c.bf16 %v1955_v25, %v1954_v18  ;;  %v641_v18 = vrot.slane %v431_v9, 7  ;;  %v642_v11 = vrot.slane %v432_v10, 7 }
  0x9e   : > { %v5798_v37 = vpop.permute.xlu0 %5797  ;;  %6012 = vrot.lane.b32.xlu1 %v7193_v17, %s6865_s15  ;;  %5299 = vmatmul.msk.bf16.vlgmr.msra.gmra.mxu0 %vm2016_vm12, %v1986_v28  ;;  %v5824_v28 = vunpack.i.l.bf16 %v7220_v59  ;;  %v740_v36 = vsel %vm614_vm0, %v642_v11, 0.0  ;;  %v7293_v59 = vsel %vm614_vm0, %v641_v18, %v642_v11  ;;  %v434_v11 = vld [vmem:[%s6961_s26 + $0x98] sm:$0xff] }
  0x9f   : > { %v5800_v44 = vunpack.i.h.bf16 %v5798_v37  ;;  %v5799_v50 = vunpack.i.l.bf16 %v5798_v37 }
  0xa0   : > { %v5803_v55 = vpop.permute.xlu1 %5802 }
  0xa1   : > { %v5805_v54 = vunpack.i.h.bf16 %v5803_v55  ;;  %v5804_v58 = vunpack.i.l.bf16 %v5803_v55  ;;  %6017 = vrot.lane.b32.xlu2 %v6016_v43, %s6862_s30  ;;  %v1758_v39 = vsel %vm1755_vm5, %v1725_v52, %v5799_v50  ;;  %v1759_v60 = vsel %vm1755_vm5, %v1726_v51, %v5800_v44 }
  0xa2   : > { %v908_v55 = vrot.slane %v7293_v59, 2 }
  0xa3   : > { %v7266_v22 = vpop.permute.xlu2 %5852  ;;  %v1792_v34 = vsel %vm1788_vm6, %v1759_v60, %v5805_v54  ;;  %v1791_v4 = vsel %vm1788_vm6, %v1758_v39, %v5804_v58 }
  0xa4   : > { %6022 = vrot.lane.b32.xlu0 %v7249_v41, %s6864_s14  ;;  %v1824_v16 = vsel %vm1821_vm7, %v1791_v4, %v5809_v0  ;;  %v1825_v38 = vsel %vm1821_vm7, %v1792_v34, %v5810_v23  ;;  %v829_v23 = vrot.slane %v740_v36, 1 }
  0xa6   : > { %v5813_v63 = vpop.permute.xlu0 %5812  ;;  %6027 = vrot.lane.b32.xlu1 %v7259_v53, %s6866_s16 }
  0xa7   : > { %v5815_v5 = vunpack.i.h.bf16 %v5813_v63  ;;  %v5814_v6 = vunpack.i.l.bf16 %v5813_v63  ;;  %v827_v63 = vrot.slane %v7293_v59, 1 }
  0xa8   : > { %v5818_v12 = vpop.permute.xlu1 %5817 }
  0xa9   : > { %v5820_v13 = vunpack.i.h.bf16 %v5818_v12  ;;  %v5819_v14 = vunpack.i.l.bf16 %v5818_v12  ;;  %v1857_v25 = vsel %vm1854_vm8, %v1824_v16, %v5814_v6  ;;  %v1858_v26 = vsel %vm1854_vm8, %v1825_v38, %v5815_v5  ;;  %6032 = vrot.lane.b32.xlu2 %v7179_v3, %s6859_s27 }
  0xaa   : > { %v5839_v16 = vunpack.i.l.bf16 %v7244_v40 }
  0xab   : > { %v1890_v29 = vsel %vm1887_vm9, %v1857_v25, %v5819_v14  ;;  %v1891_v32 = vsel %vm1887_vm9, %v1858_v26, %v5820_v13  ;;  %v7289_v37 = vpop.permute.xlu2 %5867  ;;  %v830_v13 = vsel %vm780_vm1, %v827_v63, %v829_v23  ;;  %v5840_v14 = vunpack.i.h.bf16 %v7244_v40 }
  0xac   : > { %6037 = vrot.lane.b32.xlu0 %v7193_v17, %s6861_s29  ;;  %v7296_v17 = vsel %vm614_vm0, 0.0, %v641_v18  ;;  %v1923_v3 = vsel %vm1920_vm10, %v1890_v29, %v5824_v28  ;;  %v1924_v44 = vsel %vm1920_vm10, %v1891_v32, %v5825_v27  ;;  %v433_v18 = vld [vmem:[%s6961_s26 + $0x90] sm:$0xff]  ;;  %v645_v40 = vrot.slane %v434_v11, 7 }
  0xad   : > { %v907_v50 = vrot.slane %v7296_v17, 2  ;;  %v6056_v39 = vpack.i.bf16 %v7293_v59, %v7296_v17  ;;  %v826_v60 = vrot.slane %v7296_v17, 1  ;;  %v5869_v23 = vunpack.i.l.bf16 %v7289_v37 }
  0xae   : > { %v5828_v35 = vpop.permute.xlu0 %5827  ;;  %6042 = vrot.lane.b32.xlu1 %v6016_v43, %s6860_s28  ;;  %v910_v43 = vrot.slane %v740_v36, 2  ;;  %v644_v36 = vrot.slane %v433_v18, 7 }
  0xaf   : > { %v5830_v56 = vunpack.i.h.bf16 %v5828_v35  ;;  %v5829_v42 = vunpack.i.l.bf16 %v5828_v35  ;;  %v909_v0 = vsel %vm861_vm2, %v907_v50, %v908_v55  ;;  %v828_v12 = vsel %vm780_vm1, %v826_v60, %v827_v63 }
  0xb0   : > { %v5833_v51 = vpop.permute.xlu1 %5832  ;;  %v911_v34 = vsel %vm861_vm2, %v908_v55, %v910_v43  ;;  %v7326_v25 = vpack.i.bf16 %v830_v13, %v828_v12  ;;  %v7352_v60 = vsel %vm614_vm0, 0.0, %v644_v36 }
  0xb1   : > { %v1956_v52 = vsel %vm1953_vm11, %v1923_v3, %v5829_v42  ;;  %v1957_v54 = vsel %vm1953_vm11, %v1924_v44, %v5830_v56  ;;  %6047 = vrot.lane.b32.xlu2 %v7249_v41, %s6863_s13  ;;  %v5835_v4 = vunpack.i.h.bf16 %v5833_v51  ;;  %v5834_v5 = vunpack.i.l.bf16 %v5833_v51 }
  0xb2   : > { %v1987_v58 = vpack.c.bf16 %v1957_v54, %v1956_v52  ;;  %v7318_v10 = vpack.i.bf16 %v911_v34, %v909_v0  ;;  %v5855_v3 = vunpack.i.h.bf16 %v7266_v22  ;;  %v5854_v44 = vunpack.i.l.bf16 %v7266_v22 }
  0xb3   : > { %v7315_v9 = vpop.permute.xlu2 %5882  ;;  %v1728_v26 = vsel %vm1722_vm4, %v6991_v30, %v5835_v4  ;;  %v1727_v27 = vsel %vm1722_vm4, %v6994_v31, %v5834_v5  ;;  %v5870_v22 = vunpack.i.h.bf16 %v7289_v37  ;;  %v741_v0 = vsel %vm614_vm0, %v645_v40, 0.0 }
  0xb4   : > { %6052 = vrot.lane.b32.xlu0 %v7259_v53, %s6865_s15  ;;  %5300 = vmatmul.msk.bf16.gmra.mxu0 %vm2016_vm12, %v1987_v58  ;;  %v1760_v56 = vsel %vm1755_vm5, %v1727_v27, %v5839_v16  ;;  %v1761_v42 = vsel %vm1755_vm5, %v1728_v26, %v5840_v14  ;;  %v7349_v58 = vsel %vm614_vm0, %v644_v36, %v645_v40  ;;  %v831_v13 = vrot.slane %v7352_v60, 1 }
  0xb5   : > { %v832_v16 = vrot.slane %v7349_v58, 1 }
  0xb6   : > { %v5843_v6 = vpop.permute.xlu0 %5842  ;;  %6057 = vrot.lane.b32.xlu1 %v6056_v39, %s6862_s30 }
  0xb7   : > { %v5845_v28 = vunpack.i.h.bf16 %v5843_v6  ;;  %v5844_v29 = vunpack.i.l.bf16 %v5843_v6 }
  0xb8   : > { %v5848_v38 = vpop.permute.xlu1 %5847 }
  0xb9   : > { %v5850_v32 = vunpack.i.h.bf16 %v5848_v38  ;;  %v5849_v35 = vunpack.i.l.bf16 %v5848_v38  ;;  %6062 = vrot.lane.b32.xlu2 %v7326_v25, %s6864_s14  ;;  %v1793_v30 = vsel %vm1788_vm6, %v1760_v56, %v5844_v29  ;;  %v1794_v31 = vsel %vm1788_vm6, %v1761_v42, %v5845_v28 }
  0xba   : > { %v834_v38 = vrot.slane %v741_v0, 1  ;;  %v833_v29 = vsel %vm780_vm1, %v831_v13, %v832_v16  ;;  %v912_v56 = vrot.slane %v7352_v60, 2  ;;  %v913_v42 = vrot.slane %v7349_v58, 2 }
  0xbb   : > { %v7342_v55 = vpop.permute.xlu2 %5897  ;;  %v1826_v51 = vsel %vm1821_vm7, %v1793_v30, %v5849_v35  ;;  %v1827_v52 = vsel %vm1821_vm7, %v1794_v31, %v5850_v32  ;;  %v915_v30 = vrot.slane %v741_v0, 2  ;;  %v435_v31 = vld [vmem:[%s6961_s26 + $0xa0] sm:$0xff] }
  0xbc   : > { %6067 = vrot.lane.b32.xlu0 %v7318_v10, %s6866_s16  ;;  %v1859_v34 = vsel %vm1854_vm8, %v1826_v51, %v5854_v44  ;;  %v1860_v4 = vsel %vm1854_vm8, %v1827_v52, %v5855_v3  ;;  %v835_v32 = vsel %vm780_vm1, %v832_v16, %v834_v38  ;;  %v436_v3 = vld [vmem:[%s6961_s26 + $0xa8] sm:$0xff]  ;;  %v5900_v38 = vunpack.i.h.bf16 %v7342_v55 }
  0xbd   : > { %v7381_v40 = vpack.i.bf16 %v835_v32, %v833_v29  ;;  %v648_v0 = vrot.slane %v436_v3, 7 }
  0xbe   : > { %v5858_v50 = vpop.permute.xlu0 %5857  ;;  %6072 = vrot.lane.b32.xlu1 %v7249_v41, %s6859_s27 }
  0xbf   : > { %v5860_v54 = vunpack.i.h.bf16 %v5858_v50  ;;  %v5859_v43 = vunpack.i.l.bf16 %v5858_v50  ;;  %v742_v29 = vsel %vm614_vm0, %v648_v0, 0.0 }
  0xc0   : > { %v5863_v63 = vpop.permute.xlu1 %5862 }
  0xc1   : > { %v5865_v5 = vunpack.i.h.bf16 %v5863_v63  ;;  %v5864_v6 = vunpack.i.l.bf16 %v5863_v63  ;;  %v1892_v41 = vsel %vm1887_vm9, %v1859_v34, %v5859_v43  ;;  %v1893_v12 = vsel %vm1887_vm9, %v1860_v4, %v5860_v54  ;;  %6077 = vrot.lane.b32.xlu2 %v7259_v53, %s6861_s29 }
  0xc2   : > { %v914_v63 = vsel %vm861_vm2, %v912_v56, %v913_v42  ;;  %v5885_v34 = vunpack.i.h.bf16 %v7315_v9  ;;  %v5884_v4 = vunpack.i.l.bf16 %v7315_v9 }
  0xc3   : > { %v1925_v14 = vsel %vm1920_vm10, %v1892_v41, %v5864_v6  ;;  %v1926_v37 = vsel %vm1920_vm10, %v1893_v12, %v5865_v5  ;;  %v7370_v28 = vpop.permute.xlu2 %5912 }
  0xc4   : > { %6082 = vrot.lane.b32.xlu0 %v6056_v39, %s6860_s28  ;;  %v1958_v18 = vsel %vm1953_vm11, %v1925_v14, %v5869_v23  ;;  %v1959_v11 = vsel %vm1953_vm11, %v1926_v37, %v5870_v22  ;;  %v7377_v39 = vpack.i.bf16 %v7349_v58, %v7352_v60  ;;  %v916_v22 = vsel %vm861_vm2, %v913_v42, %v915_v30 }
  0xc5   : > { %v1988_v27 = vpack.c.bf16 %v1959_v11, %v1958_v18  ;;  %v647_v23 = vrot.slane %v435_v31, 7  ;;  %v7403_v6 = vpack.i.bf16 %v916_v22, %v914_v63 }
  0xc6   : > { %v5873_v26 = vpop.permute.xlu0 %5872  ;;  %6087 = vrot.lane.b32.xlu1 %v7326_v25, %s6863_s13 }
  0xc7   : > { %5301 = vmatmul.msk.bf16.gmra.mxu0 %vm2016_vm12, %v1988_v27  ;;  %v5875_v35 = vunpack.i.h.bf16 %v5873_v26  ;;  %v5874_v36 = vunpack.i.l.bf16 %v5873_v26  ;;  %v7410_v37 = vsel %vm614_vm0, %v647_v23, %v648_v0  ;;  %v7416_v18 = vsel %vm614_vm0, 0.0, %v647_v23 }
  0xc8   : > { %v5878_v53 = vpop.permute.xlu1 %5877  ;;  %v836_v30 = vrot.slane %v7416_v18, 1  ;;  %v837_v31 = vrot.slane %v7410_v37, 1  ;;  %v917_v63 = vrot.slane %v7416_v18, 2  ;;  %v918_v23 = vrot.slane %v7410_v37, 2 }
  0xc9   : > { %6092 = vrot.lane.b32.xlu2 %v7318_v10, %s6865_s15  ;;  %v5880_v44 = vunpack.i.h.bf16 %v5878_v53  ;;  %v5879_v50 = vunpack.i.l.bf16 %v5878_v53  ;;  %v1730_v54 = vsel %vm1722_vm4, %v7032_v61, %v5875_v35  ;;  %v1729_v43 = vsel %vm1722_vm4, %v7035_v62, %v5874_v36 }
  0xca   : > { %v920_v0 = vrot.slane %v742_v29, 2 }
  0xcb   : > { %v7391_v52 = vpop.permute.xlu2 %5927  ;;  %v1763_v61 = vsel %vm1755_vm5, %v1730_v54, %v5880_v44  ;;  %v1762_v62 = vsel %vm1755_vm5, %v1729_v43, %v5879_v50 }
  0xcc   : > { %6097 = vrot.lane.b32.xlu0 %v7377_v39, %s6862_s30  ;;  %v1795_v16 = vsel %vm1788_vm6, %v1762_v62, %v5884_v4  ;;  %v1796_v9 = vsel %vm1788_vm6, %v1763_v61, %v5885_v34  ;;  %v838_v4 = vsel %vm780_vm1, %v836_v30, %v837_v31  ;;  %v5915_v61 = vunpack.i.h.bf16 %v7370_v28 }
  0xcd   : > { %v5914_v62 = vunpack.i.l.bf16 %v7370_v28  ;;  %v6136_v28 = vpack.i.bf16 %v7410_v37, %v7416_v18 }
  0xce   : > { %v5888_v51 = vpop.permute.xlu0 %5887  ;;  %6102 = vrot.lane.b32.xlu1 %v7381_v40, %s6864_s14 }
  0xcf   : > { %v5890_v41 = vunpack.i.h.bf16 %v5888_v51  ;;  %v5889_v12 = vunpack.i.l.bf16 %v5888_v51 }
  0xd0   : > { %v5893_v5 = vpop.permute.xlu1 %5892 }
  0xd1   : > { %v5895_v13 = vunpack.i.h.bf16 %v5893_v5  ;;  %v5894_v14 = vunpack.i.l.bf16 %v5893_v5  ;;  %6107 = vrot.lane.b32.xlu2 %v7403_v6, %s6866_s16  ;;  %v1828_v11 = vsel %vm1821_vm7, %v1795_v16, %v5889_v12  ;;  %v1829_v26 = vsel %vm1821_vm7, %v1796_v9, %v5890_v41 }
  0xd2   : > { %v921_v16 = vsel %vm861_vm2, %v918_v23, %v920_v0 }
  0xd3   : > { %v7424_v32 = vpop.permute.xlu2 %5942  ;;  %v1861_v53 = vsel %vm1854_vm8, %v1828_v11, %v5894_v14  ;;  %v1862_v35 = vsel %vm1854_vm8, %v1829_v26, %v5895_v13  ;;  %v919_v14 = vsel %vm861_vm2, %v917_v63, %v918_v23  ;;  %v1732_v11 = vsel %vm1722_vm4, %v7056_v20, %v5915_v61 }
  0xd4   : > { %6112 = vrot.lane.b32.xlu0 %v7326_v25, %s6859_s27  ;;  %v5899_v25 = vunpack.i.l.bf16 %v7342_v55  ;;  %v839_v55 = vrot.slane %v742_v29, 1  ;;  %v1895_v44 = vsel %vm1887_vm9, %v1862_v35, %v5900_v38  ;;  %v1731_v26 = vsel %vm1722_vm4, %v7059_v21, %v5914_v62 }
  0xd5   : > { %v5930_v21 = vunpack.i.h.bf16 %v7391_v52  ;;  %v5945_v0 = vunpack.i.h.bf16 %v7424_v32 }
  0xd6   : > { %v5903_v27 = vpop.permute.xlu0 %5902  ;;  %6117 = vrot.lane.b32.xlu1 %v7318_v10, %s6861_s29  ;;  %v1894_v3 = vsel %vm1887_vm9, %v1861_v53, %v5899_v25  ;;  %v840_v5 = vsel %vm780_vm1, %v837_v31, %v839_v55  ;;  %v7463_v25 = vpack.i.bf16 %v921_v16, %v919_v14 }
  0xd7   : > { %v5905_v36 = vunpack.i.h.bf16 %v5903_v27  ;;  %v5904_v56 = vunpack.i.l.bf16 %v5903_v27  ;;  %v7453_v13 = vpack.i.bf16 %v840_v5, %v838_v4 }
  0xd8   : > { %v5908_v42 = vpop.permute.xlu1 %5907 }
  0xd9   : > { %v5910_v50 = vunpack.i.h.bf16 %v5908_v42  ;;  %v5909_v51 = vunpack.i.l.bf16 %v5908_v42  ;;  %v1927_v54 = vsel %vm1920_vm10, %v1894_v3, %v5904_v56  ;;  %v1928_v43 = vsel %vm1920_vm10, %v1895_v44, %v5905_v36  ;;  %6122 = vrot.lane.b32.xlu2 %v7377_v39, %s6860_s28  ;;  %v437_v3 = vld [vmem:[%s6961_s26 + $0xb0] sm:$0xff]  ;;  %v438_v44 = vld [vmem:[%s6961_s26 + $0xb8] sm:$0xff] }
  0xda   : > { %v5929_v56 = vunpack.i.l.bf16 %v7391_v52  ;;  %v651_v52 = vrot.slane %v438_v44, 7 }
  0xdb   : > { %v1960_v10 = vsel %vm1953_vm11, %v1927_v54, %v5909_v51  ;;  %v1961_v22 = vsel %vm1953_vm11, %v1928_v43, %v5910_v50  ;;  %v7448_v12 = vpop.permute.xlu2 %5957 }
  0xdc   : > { %6127 = vrot.lane.b32.xlu0 %v7381_v40, %s6863_s13  ;;  %v1989_v34 = vpack.c.bf16 %v1961_v22, %v1960_v10  ;;  %v650_v10 = vrot.slane %v437_v3, 7  ;;  %v743_v62 = vsel %vm614_vm0, %v651_v52, 0.0 }
  0xde   : > { %v5918_v41 = vpop.permute.xlu0 %5917  ;;  %6132 = vrot.lane.b32.xlu1 %v7403_v6, %s6865_s15  ;;  %5302 = vmatmul.msk.bf16.gmra.mxu0 %vm2016_vm12, %v1989_v34  ;;  %v5944_v34 = vunpack.i.l.bf16 %v7424_v32  ;;  %v7497_v32 = vsel %vm614_vm0, %v650_v10, %v651_v52  ;;  %v440_v52 = vld [vmem:[%s6961_s26 + $0xc8] sm:$0xff] }
  0xdf   : > { %v5920_v9 = vunpack.i.h.bf16 %v5918_v41  ;;  %v5919_v39 = vunpack.i.l.bf16 %v5918_v41 }
  0xe0   : > { %v5923_v38 = vpop.permute.xlu1 %5922 }
  0xe1   : > { %v5925_v27 = vunpack.i.h.bf16 %v5923_v38  ;;  %v5924_v29 = vunpack.i.l.bf16 %v5923_v38  ;;  %v1764_v53 = vsel %vm1755_vm5, %v1731_v26, %v5919_v39  ;;  %v1765_v35 = vsel %vm1755_vm5, %v1732_v11, %v5920_v9  ;;  %6137 = vrot.lane.b32.xlu2 %v6136_v28, %s6862_s30 }
  0xe2   : > { %v923_v38 = vrot.slane %v7497_v32, 2 }
  0xe3   : > { %v7470_v20 = vpop.permute.xlu2 %5972  ;;  %v1798_v42 = vsel %vm1788_vm6, %v1765_v35, %v5925_v27  ;;  %v1797_v30 = vsel %vm1788_vm6, %v1764_v53, %v5924_v29 }
  0xe4   : > { %6142 = vrot.lane.b32.xlu0 %v7453_v13, %s6864_s14  ;;  %v1830_v43 = vsel %vm1821_vm7, %v1797_v30, %v5929_v56  ;;  %v1831_v63 = vsel %vm1821_vm7, %v1798_v42, %v5930_v21  ;;  %v844_v21 = vrot.slane %v743_v62, 1 }
  0xe6   : > { %v5933_v36 = vpop.permute.xlu0 %5932  ;;  %6147 = vrot.lane.b32.xlu1 %v7463_v25, %s6866_s16 }
  0xe7   : > { %v5935_v31 = vunpack.i.h.bf16 %v5933_v36  ;;  %v5934_v55 = vunpack.i.l.bf16 %v5933_v36  ;;  %v842_v36 = vrot.slane %v7497_v32, 1 }
  0xe8   : > { %v5938_v50 = vpop.permute.xlu1 %5937 }
  0xe9   : > { %v5940_v51 = vunpack.i.h.bf16 %v5938_v50  ;;  %v5939_v54 = vunpack.i.l.bf16 %v5938_v50  ;;  %v1863_v22 = vsel %vm1854_vm8, %v1830_v43, %v5934_v55  ;;  %v1864_v23 = vsel %vm1854_vm8, %v1831_v63, %v5935_v31  ;;  %6152 = vrot.lane.b32.xlu2 %v7381_v40, %s6859_s27 }
  0xea   : > { %v5959_v43 = vunpack.i.l.bf16 %v7448_v12 }
  0xeb   : > { %v1896_v4 = vsel %vm1887_vm9, %v1863_v22, %v5939_v54  ;;  %v1897_v5 = vsel %vm1887_vm9, %v1864_v23, %v5940_v51  ;;  %v7493_v41 = vpop.permute.xlu2 %5987  ;;  %v845_v51 = vsel %vm780_vm1, %v842_v36, %v844_v21  ;;  %v5960_v54 = vunpack.i.h.bf16 %v7448_v12 }
  0xec   : > { %6157 = vrot.lane.b32.xlu0 %v7403_v6, %s6861_s29  ;;  %v7500_v6 = vsel %vm614_vm0, 0.0, %v650_v10  ;;  %v1929_v9 = vsel %vm1920_vm10, %v1896_v4, %v5944_v34  ;;  %v1930_v39 = vsel %vm1920_vm10, %v1897_v5, %v5945_v0  ;;  %v439_v10 = vld [vmem:[%s6961_s26 + $0xc0] sm:$0xff]  ;;  %v654_v12 = vrot.slane %v440_v52, 7 }
  0xed   : > { %v922_v40 = vrot.slane %v7500_v6, 2  ;;  %v6176_v53 = vpack.i.bf16 %v7497_v32, %v7500_v6  ;;  %v841_v35 = vrot.slane %v7500_v6, 1  ;;  %v5989_v21 = vunpack.i.l.bf16 %v7493_v41 }
  0xee   : > { %v5948_v61 = vpop.permute.xlu0 %5947  ;;  %6162 = vrot.lane.b32.xlu1 %v6136_v28, %s6860_s28  ;;  %v925_v28 = vrot.slane %v743_v62, 2  ;;  %v653_v62 = vrot.slane %v439_v10, 7 }
  0xef   : > { %v5950_v14 = vunpack.i.h.bf16 %v5948_v61  ;;  %v5949_v16 = vunpack.i.l.bf16 %v5948_v61  ;;  %v924_v56 = vsel %vm861_vm2, %v922_v40, %v923_v38  ;;  %v843_v50 = vsel %vm780_vm1, %v841_v35, %v842_v36 }
  0xf0   : > { %v5953_v11 = vpop.permute.xlu1 %5952  ;;  %v926_v42 = vsel %vm861_vm2, %v923_v38, %v925_v28  ;;  %v7530_v22 = vpack.i.bf16 %v845_v51, %v843_v50  ;;  %v7556_v35 = vsel %vm614_vm0, 0.0, %v653_v62 }
  0xf1   : > { %v1962_v26 = vsel %vm1953_vm11, %v1929_v9, %v5949_v16  ;;  %v1963_v27 = vsel %vm1953_vm11, %v1930_v39, %v5950_v14  ;;  %6167 = vrot.lane.b32.xlu2 %v7453_v13, %s6863_s13  ;;  %v5955_v30 = vunpack.i.h.bf16 %v5953_v11  ;;  %v5954_v31 = vunpack.i.l.bf16 %v5953_v11 }
  0xf2   : > { %v1990_v29 = vpack.c.bf16 %v1963_v27, %v1962_v26  ;;  %v7522_v44 = vpack.i.bf16 %v926_v42, %v924_v56  ;;  %v5975_v9 = vunpack.i.h.bf16 %v7470_v20  ;;  %v5974_v39 = vunpack.i.l.bf16 %v7470_v20 }
  0xf3   : > { %v7519_v3 = vpop.permute.xlu2 %6002  ;;  %v1734_v23 = vsel %vm1722_vm4, %v7083_v46, %v5955_v30  ;;  %v1733_v0 = vsel %vm1722_vm4, %v7086_v47, %v5954_v31  ;;  %v5990_v20 = vunpack.i.h.bf16 %v7493_v41  ;;  %v744_v56 = vsel %vm614_vm0, %v654_v12, 0.0 }
  0xf4   : > { %5303 = vmatmul.msk.bf16.gmra.mxu0 %vm2016_vm12, %v1990_v29  ;;  %6172 = vrot.lane.b32.xlu0 %v7463_v25, %s6865_s15  ;;  %v1766_v14 = vsel %vm1755_vm5, %v1733_v0, %v5959_v43  ;;  %v1767_v16 = vsel %vm1755_vm5, %v1734_v23, %v5960_v54  ;;  %v7553_v29 = vsel %vm614_vm0, %v653_v62, %v654_v12  ;;  %v846_v51 = vrot.slane %v7556_v35, 1 }
  0xf5   : > { %v847_v43 = vrot.slane %v7553_v29, 1 }
  0xf6   : > { %v5963_v55 = vpop.permute.xlu0 %5962  ;;  %6177 = vrot.lane.b32.xlu1 %v6176_v53, %s6862_s30 }
  0xf7   : > { %v5965_v34 = vunpack.i.h.bf16 %v5963_v55  ;;  %v5964_v4 = vunpack.i.l.bf16 %v5963_v55 }
  0xf8   : > { %v5968_v63 = vpop.permute.xlu1 %5967 }
  0xf9   : > { %v5970_v5 = vunpack.i.h.bf16 %v5968_v63  ;;  %v5969_v61 = vunpack.i.l.bf16 %v5968_v63  ;;  %6182 = vrot.lane.b32.xlu2 %v7530_v22, %s6864_s14  ;;  %v1799_v46 = vsel %vm1788_vm6, %v1766_v14, %v5964_v4  ;;  %v1800_v47 = vsel %vm1788_vm6, %v1767_v16, %v5965_v34 }
  0xfa   : > { %v849_v63 = vrot.slane %v744_v56, 1  ;;  %v848_v4 = vsel %vm780_vm1, %v846_v51, %v847_v43  ;;  %v927_v14 = vrot.slane %v7556_v35, 2  ;;  %v928_v16 = vrot.slane %v7553_v29, 2 }
  0xfb   : > { %v7546_v38 = vpop.permute.xlu2 %6017  ;;  %v1832_v11 = vsel %vm1821_vm7, %v1799_v46, %v5969_v61  ;;  %v1833_v26 = vsel %vm1821_vm7, %v1800_v47, %v5970_v5  ;;  %v930_v46 = vrot.slane %v744_v56, 2  ;;  %v441_v47 = vld [vmem:[%s6961_s26 + $0xd0] sm:$0xff] }
  0xfc   : > { %6187 = vrot.lane.b32.xlu0 %v7522_v44, %s6866_s16  ;;  %v1865_v42 = vsel %vm1854_vm8, %v1832_v11, %v5974_v39  ;;  %v1866_v30 = vsel %vm1854_vm8, %v1833_v26, %v5975_v9  ;;  %v850_v5 = vsel %vm780_vm1, %v847_v43, %v849_v63  ;;  %v442_v9 = vld [vmem:[%s6961_s26 + $0xd8] sm:$0xff]  ;;  %v6020_v63 = vunpack.i.h.bf16 %v7546_v38 }
  0xfd   : > { %v7585_v12 = vpack.i.bf16 %v850_v5, %v848_v4  ;;  %v657_v56 = vrot.slane %v442_v9, 7 }
  0xfe   : > { %v5978_v40 = vpop.permute.xlu0 %5977  ;;  %6192 = vrot.lane.b32.xlu1 %v7453_v13, %s6859_s27 }
  0xff   : > { %v5980_v27 = vunpack.i.h.bf16 %v5978_v40  ;;  %v5979_v28 = vunpack.i.l.bf16 %v5978_v40  ;;  %v745_v4 = vsel %vm614_vm0, %v657_v56, 0.0 }
 0x100   : > { %v5983_v36 = vpop.permute.xlu1 %5982 }
 0x101   : > { %v5985_v31 = vunpack.i.h.bf16 %v5983_v36  ;;  %v5984_v55 = vunpack.i.l.bf16 %v5983_v36  ;;  %v1898_v13 = vsel %vm1887_vm9, %v1865_v42, %v5979_v28  ;;  %v1899_v50 = vsel %vm1887_vm9, %v1866_v30, %v5980_v27  ;;  %6197 = vrot.lane.b32.xlu2 %v7463_v25, %s6861_s29 }
 0x102   : > { %v929_v36 = vsel %vm861_vm2, %v927_v14, %v928_v16  ;;  %v6005_v42 = vunpack.i.h.bf16 %v7519_v3  ;;  %v6004_v30 = vunpack.i.l.bf16 %v7519_v3 }
 0x103   : > { %v1931_v54 = vsel %vm1920_vm10, %v1898_v13, %v5984_v55  ;;  %v1932_v41 = vsel %vm1920_vm10, %v1899_v50, %v5985_v31  ;;  %v7574_v34 = vpop.permute.xlu2 %6032 }
 0x104   : > { %6202 = vrot.lane.b32.xlu0 %v6176_v53, %s6860_s28  ;;  %v1964_v10 = vsel %vm1953_vm11, %v1931_v54, %v5989_v21  ;;  %v1965_v52 = vsel %vm1953_vm11, %v1932_v41, %v5990_v20  ;;  %v7581_v53 = vpack.i.bf16 %v7553_v29, %v7556_v35  ;;  %v931_v20 = vsel %vm861_vm2, %v928_v16, %v930_v46 }
 0x105   : > { %v1991_v0 = vpack.c.bf16 %v1965_v52, %v1964_v10  ;;  %v656_v21 = vrot.slane %v441_v47, 7 }
 0x106   : > { %v5993_v23 = vpop.permute.xlu0 %5992  ;;  %6207 = vrot.lane.b32.xlu1 %v7530_v22, %s6863_s13 }
 0x107   : > { %5304 = vmatmul.msk.bf16.gmra.mxu0 %vm2016_vm12, %v1991_v0  ;;  %v5995_v61 = vunpack.i.h.bf16 %v5993_v23  ;;  %v5994_v62 = vunpack.i.l.bf16 %v5993_v23  ;;  %v7614_v41 = vsel %vm614_vm0, %v656_v21, %v657_v56  ;;  %v7620_v10 = vsel %vm614_vm0, 0.0, %v656_v21 }
 0x108   : > { %v5998_v25 = vpop.permute.xlu1 %5997  ;;  %v851_v46 = vrot.slane %v7620_v10, 1  ;;  %v852_v47 = vrot.slane %v7614_v41, 1  ;;  %v933_v21 = vrot.slane %v7614_v41, 2  ;;  %v935_v56 = vrot.slane %v745_v4, 2 }
 0x109   : > { %6212 = vrot.lane.b32.xlu2 %v7522_v44, %s6865_s15  ;;  %v6000_v39 = vunpack.i.h.bf16 %v5998_v25  ;;  %v5999_v40 = vunpack.i.l.bf16 %v5998_v25  ;;  %v1736_v26 = vsel %vm1722_vm4, %v7113_v7, %v5995_v61  ;;  %v1735_v27 = vsel %vm1722_vm4, %v7116_v8, %v5994_v62 }
 0x10a   : > { %v7607_v7 = vpack.i.bf16 %v931_v20, %v929_v36 }
 0x10b   : > { %v7601_v28 = vpop.permute.xlu2 %6047  ;;  %v1769_v8 = vsel %vm1755_vm5, %v1736_v26, %v6000_v39  ;;  %v1768_v55 = vsel %vm1755_vm5, %v1735_v27, %v5999_v40 }
 0x10c   : > { %6217 = vrot.lane.b32.xlu0 %v7581_v53, %s6862_s30  ;;  %v1801_v43 = vsel %vm1788_vm6, %v1768_v55, %v6004_v30  ;;  %v1802_v3 = vsel %vm1788_vm6, %v1769_v8, %v6005_v42  ;;  %v853_v30 = vsel %vm780_vm1, %v851_v46, %v852_v47  ;;  %v6035_v8 = vunpack.i.h.bf16 %v7574_v34 }
 0x10d   : > { %v6034_v55 = vunpack.i.l.bf16 %v7574_v34  ;;  %v6256_v34 = vpack.i.bf16 %v7614_v41, %v7620_v10 }
 0x10e   : > { %v6008_v11 = vpop.permute.xlu0 %6007  ;;  %6222 = vrot.lane.b32.xlu1 %v7585_v12, %s6864_s14 }
 0x10f   : > { %v6010_v13 = vunpack.i.h.bf16 %v6008_v11  ;;  %v6009_v50 = vunpack.i.l.bf16 %v6008_v11 }
 0x110   : > { %v6013_v31 = vpop.permute.xlu1 %6012 }
 0x111   : > { %v6015_v51 = vunpack.i.h.bf16 %v6013_v31  ;;  %v6014_v54 = vunpack.i.l.bf16 %v6013_v31  ;;  %6227 = vrot.lane.b32.xlu2 %v7607_v7, %s6866_s16  ;;  %v1834_v52 = vsel %vm1821_vm7, %v1801_v43, %v6009_v50  ;;  %v1835_v23 = vsel %vm1821_vm7, %v1802_v3, %v6010_v13 }
 0x112   : > { %v936_v43 = vsel %vm861_vm2, %v933_v21, %v935_v56 }
 0x113   : > { %v1867_v5 = vsel %vm1854_vm8, %v1834_v52, %v6014_v54  ;;  %v1868_v25 = vsel %vm1854_vm8, %v1835_v23, %v6015_v51  ;;  %v7632_v14 = vpop.permute.xlu2 %6062  ;;  %v1738_v52 = vsel %vm1722_vm4, %v7157_v48, %v6035_v8  ;;  %v1737_v23 = vsel %vm1722_vm4, %v7160_v49, %v6034_v55 }
 0x114   : > { %6232 = vrot.lane.b32.xlu0 %v7530_v22, %s6859_s27  ;;  %v6019_v22 = vunpack.i.l.bf16 %v7546_v38  ;;  %v854_v38 = vrot.slane %v745_v4, 1  ;;  %v1901_v39 = vsel %vm1887_vm9, %v1868_v25, %v6020_v63  ;;  %v6050_v48 = vunpack.i.h.bf16 %v7601_v28 }
 0x115   : > { %v6049_v49 = vunpack.i.l.bf16 %v7601_v28  ;;  %v6065_v56 = vunpack.i.h.bf16 %v7632_v14 }
 0x116   : > { %v6023_v0 = vpop.permute.xlu0 %6022  ;;  %6237 = vrot.lane.b32.xlu1 %v7522_v44, %s6861_s29  ;;  %v1900_v9 = vsel %vm1887_vm9, %v1867_v5, %v6019_v22  ;;  %v932_v44 = vrot.slane %v7620_v10, 2  ;;  %v855_v31 = vsel %vm780_vm1, %v852_v47, %v854_v38 }
 0x117   : > { %v6025_v61 = vunpack.i.h.bf16 %v6023_v0  ;;  %v6024_v62 = vunpack.i.l.bf16 %v6023_v0  ;;  %v7657_v51 = vpack.i.bf16 %v855_v31, %v853_v30 }
 0x118   : > { %v6028_v16 = vpop.permute.xlu1 %6027  ;;  %v934_v54 = vsel %vm861_vm2, %v932_v44, %v933_v21 }
 0x119   : > { %v6030_v40 = vunpack.i.h.bf16 %v6028_v16  ;;  %v6029_v11 = vunpack.i.l.bf16 %v6028_v16  ;;  %v1933_v26 = vsel %vm1920_vm10, %v1900_v9, %v6024_v62  ;;  %v1934_v27 = vsel %vm1920_vm10, %v1901_v39, %v6025_v61  ;;  %6242 = vrot.lane.b32.xlu2 %v7581_v53, %s6860_s28  ;;  %v443_v9 = vld [vmem:[%s6961_s26 + $0xe0] sm:$0xff]  ;;  %v444_v39 = vld [vmem:[%s6961_s26 + $0xe8] sm:$0xff] }
 0x11a   : > { %v7667_v22 = vpack.i.bf16 %v936_v43, %v934_v54  ;;  %v659_v44 = vrot.slane %v443_v9, 7 }
 0x11b   : > { %v1966_v36 = vsel %vm1953_vm11, %v1933_v26, %v6029_v11  ;;  %v1967_v20 = vsel %vm1953_vm11, %v1934_v27, %v6030_v40  ;;  %v7655_v50 = vpop.permute.xlu2 %6077 }
 0x11c   : > { %6247 = vrot.lane.b32.xlu0 %v7585_v12, %s6863_s13  ;;  %v1992_v42 = vpack.c.bf16 %v1967_v20, %v1966_v36  ;;  %v660_v36 = vrot.slane %v444_v39, 7 }
 0x11e   : > { %v6038_v13 = vpop.permute.xlu0 %6037  ;;  %6252 = vrot.lane.b32.xlu1 %v7607_v7, %s6865_s15  ;;  %5305 = vmatmul.msk.bf16.gmra.mxu0 %vm2016_vm12, %v1992_v42  ;;  %v6064_v42 = vunpack.i.l.bf16 %v7632_v14  ;;  %v746_v55 = vsel %vm614_vm0, %v660_v36, 0.0  ;;  %v7699_v43 = vsel %vm614_vm0, %v659_v44, %v660_v36  ;;  %v7702_v14 = vsel %vm614_vm0, 0.0, %v659_v44  ;;  %v445_v36 = vld [vmem:[%s6961_s26 + $0xf0] sm:$0xff] }
 0x11f   : > { %v6040_v3 = vunpack.i.h.bf16 %v6038_v13  ;;  %v6039_v53 = vunpack.i.l.bf16 %v6038_v13 }
 0x120   : > { %v6043_v63 = vpop.permute.xlu1 %6042 }
 0x121   : > { %v6045_v0 = vunpack.i.h.bf16 %v6043_v63  ;;  %v6044_v4 = vunpack.i.l.bf16 %v6043_v63  ;;  %v1770_v5 = vsel %vm1755_vm5, %v1737_v23, %v6039_v53  ;;  %v1771_v25 = vsel %vm1755_vm5, %v1738_v52, %v6040_v3  ;;  %6257 = vrot.lane.b32.xlu2 %v6256_v34, %s6862_s30 }
 0x122   : > { %v938_v63 = vrot.slane %v7699_v43, 2 }
 0x123   : > { %v7678_v62 = vpop.permute.xlu2 %6092  ;;  %v1804_v16 = vsel %vm1788_vm6, %v1771_v25, %v6045_v0  ;;  %v1803_v46 = vsel %vm1788_vm6, %v1770_v5, %v6044_v4  ;;  %v940_v0 = vrot.slane %v746_v55, 2  ;;  %v7712_v5 = vpop.f32.mrf.mxu0  ;;  %v7716_v25 = vpack.i.bf16 %v7699_v43, %v7702_v14 }
 0x124   : > { %6262 = vrot.lane.b32.xlu0 %v7657_v51, %s6864_s14  ;;  %v1836_v27 = vsel %vm1821_vm7, %v1803_v46, %v6049_v49  ;;  %v1837_v28 = vsel %vm1821_vm7, %v1804_v16, %v6050_v48  ;;  %v857_v48 = vrot.slane %v7699_v43, 1  ;;  %v859_v49 = vrot.slane %v746_v55, 1 }
 0x125   : > { %v941_v46 = vsel %vm861_vm2, %v938_v63, %v940_v0 }
 0x126   : > { %v6053_v61 = vpop.permute.xlu0 %6052  ;;  %6267 = vrot.lane.b32.xlu1 %v7667_v22, %s6866_s16 }
 0x127   : > { %v6055_v47 = vunpack.i.h.bf16 %v6053_v61  ;;  %v6054_v38 = vunpack.i.l.bf16 %v6053_v61  ;;  %v856_v61 = vrot.slane %v7702_v14, 1 }
 0x128   : > { %v6058_v40 = vpop.permute.xlu1 %6057 }
 0x129   : > { %v6060_v11 = vunpack.i.h.bf16 %v6058_v40  ;;  %v6059_v26 = vunpack.i.l.bf16 %v6058_v40  ;;  %v1869_v20 = vsel %vm1854_vm8, %v1836_v27, %v6054_v38  ;;  %v1870_v21 = vsel %vm1854_vm8, %v1837_v28, %v6055_v47  ;;  %6272 = vrot.lane.b32.xlu2 %v7585_v12, %s6859_s27 }
 0x12a   : > { %v937_v12 = vrot.slane %v7702_v14, 2  ;;  %v6080_v27 = vunpack.i.h.bf16 %v7655_v50  ;;  %v6079_v28 = vunpack.i.l.bf16 %v7655_v50 }
 0x12b   : > { %v1902_v30 = vsel %vm1887_vm9, %v1869_v20, %v6059_v26  ;;  %v1903_v31 = vsel %vm1887_vm9, %v1870_v21, %v6060_v11  ;;  %v858_v11 = vsel %vm780_vm1, %v856_v61, %v857_v48  ;;  %v860_v26 = vsel %vm780_vm1, %v857_v48, %v859_v49  ;;  %v446_v20 = vld [vmem:[%s6961_s26 + $0xf8] sm:$0xff]  ;;  %s6869_s26 = smov 64  }
 0x12c   : > { %6277 = vrot.lane.b32.xlu0 %v7607_v7, %s6861_s29  ;;  %v7704_v7 = vpop.permute.xlu2 %6107  ;;  %v1935_v3 = vsel %vm1920_vm10, %v1902_v30, %v6064_v42  ;;  %v1936_v53 = vsel %vm1920_vm10, %v1903_v31, %v6065_v56  ;;  %v939_v16 = vsel %vm861_vm2, %v937_v12, %v938_v63  ;;  %v7739_v21 = vpack.i.bf16 %v860_v26, %v858_v11 }
 0x12d   : > { %v7731_v40 = vpack.i.bf16 %v941_v46, %v939_v16  ;;  %v663_v50 = vrot.slane %v446_v20, 7  ;;  %v6095_v12 = vunpack.i.h.bf16 %v7678_v62  ;;  %v6094_v63 = vunpack.i.l.bf16 %v7678_v62 }
 0x12e   : > { %v6068_v8 = vpop.permute.xlu0 %6067  ;;  %6282 = vrot.lane.b32.xlu1 %v6256_v34, %s6860_s28  ;;  %v6110_v46 = vunpack.i.h.bf16 %v7704_v7  ;;  %v6109_v62 = vunpack.i.l.bf16 %v7704_v7 }
 0x12f   : > { %v6070_v13 = vunpack.i.h.bf16 %v6068_v8  ;;  %v6069_v54 = vunpack.i.l.bf16 %v6068_v8 }
 0x130   : > { %v6073_v52 = vpop.permute.xlu1 %6072 }
 0x131   : > { %v1968_v23 = vsel %vm1953_vm11, %v1935_v3, %v6069_v54  ;;  %v1969_v34 = vsel %vm1953_vm11, %v1936_v53, %v6070_v13  ;;  %6287 = vrot.lane.b32.xlu2 %v7657_v51, %s6863_s13  ;;  %v6075_v47 = vunpack.i.h.bf16 %v6073_v52  ;;  %v6074_v38 = vunpack.i.l.bf16 %v6073_v52  ;;  %v7747_v54 = vpop.f32.mrf.mxu0 }
 0x132   : > { %v1993_v4 = vpack.c.bf16 %v1969_v34, %v1968_v23  ;;  %v662_v13 = vrot.slane %v445_v36, 7 }
 0x133   : > { %v1740_v56 = vsel %vm1722_vm4, %v7214_v57, %v6075_v47  ;;  %v1739_v42 = vsel %vm1722_vm4, %v7217_v45, %v6074_v38  ;;  %v747_v47 = vsel %vm614_vm0, %v663_v50, 0.0 }
 0x134   : > { %5306 = vmatmul.msk.bf16.gmra.mxu0 %vm2016_vm12, %v1993_v4  ;;  %6292 = vrot.lane.b32.xlu0 %v7667_v22, %s6865_s15  ;;  %v7729_v39 = vpop.permute.xlu2 %6122  ;;  %v1772_v3 = vsel %vm1755_vm5, %v1739_v42, %v6079_v28  ;;  %v1773_v53 = vsel %vm1755_vm5, %v1740_v56, %v6080_v27  ;;  %v664_v48 = vsel %vm614_vm0, %v662_v13, %v663_v50  ;;  %v730_v49 = vsel %vm614_vm0, 0.0, %v662_v13 }
 0x135   : > { %v944_v28 = vrot.slane %v730_v49, 1  ;;  %v945_v7 = vrot.slane %v664_v48, 1  ;;  %v947_v20 = vrot.slane %v747_v47, 1  ;;  %v6336_v13 = vpack.i.bf16 %v664_v48, %v730_v49 }
 0x136   : > { %v6083_v9 = vpop.permute.xlu0 %6082  ;;  %6297 = vrot.lane.b32.xlu1 %v7716_v25, %s6862_s30 }
 0x137   : > { %v6085_v30 = vunpack.i.h.bf16 %v6083_v9  ;;  %v6084_v31 = vunpack.i.l.bf16 %v6083_v9  ;;  %v948_v50 = vsel %vm780_vm1, %v945_v7, %v947_v20 }
 0x138   : > { %v6088_v44 = vpop.permute.xlu1 %6087 }
 0x139   : > { %v6090_v8 = vunpack.i.h.bf16 %v6088_v44  ;;  %v6089_v55 = vunpack.i.l.bf16 %v6088_v44  ;;  %6302 = vrot.lane.b32.xlu2 %v7739_v21, %s6864_s14  ;;  %v1805_v57 = vsel %vm1788_vm6, %v1772_v3, %v6084_v31  ;;  %v1806_v45 = vsel %vm1788_vm6, %v1773_v53, %v6085_v30  ;;  %v7776_v56 = vpop.f32.mrf.mxu0 }
 0x13b   : > { %v1838_v23 = vsel %vm1821_vm7, %v1805_v57, %v6089_v55  ;;  %v1839_v34 = vsel %vm1821_vm7, %v1806_v45, %v6090_v8 }
 0x13c   : > { %6307 = vrot.lane.b32.xlu0 %v7731_v40, %s6866_s16  ;;  %v7761_v61 = vpop.permute.xlu2 %6137  ;;  %v1871_v38 = vsel %vm1854_vm8, %v1838_v23, %v6094_v63  ;;  %v1872_v9 = vsel %vm1854_vm8, %v1839_v34, %v6095_v12  ;;  %v950_v12 = vrot.slane %v664_v48, 2  ;;  %v952_v63 = vrot.slane %v747_v47, 2 }
 0x13d   : > { %v6124_v47 = vunpack.i.l.bf16 %v7729_v39  ;;  %v6139_v20 = vunpack.i.l.bf16 %v7761_v61 }
 0x13e   : > { %v6098_v52 = vpop.permute.xlu0 %6097  ;;  %6312 = vrot.lane.b32.xlu1 %v7657_v51, %s6859_s27 }
 0x13f   : > { %v6100_v0 = vunpack.i.h.bf16 %v6098_v52  ;;  %v6099_v4 = vunpack.i.l.bf16 %v6098_v52 }
 0x140   : > { %v6103_v16 = vpop.permute.xlu1 %6102 }
 0x141   : > { %v6105_v51 = vunpack.i.h.bf16 %v6103_v16  ;;  %v6104_v11 = vunpack.i.l.bf16 %v6103_v16  ;;  %v1904_v26 = vsel %vm1887_vm9, %v1871_v38, %v6099_v4  ;;  %v1905_v27 = vsel %vm1887_vm9, %v1872_v9, %v6100_v0  ;;  %6317 = vrot.lane.b32.xlu2 %v7667_v22, %s6861_s29  ;;  %v7792_v0 = vpop.f32.mrf.mxu0 }
 0x142   : > { %v949_v22 = vrot.slane %v730_v49, 2  ;;  %v953_v49 = vsel %vm861_vm2, %v950_v12, %v952_v63 }
 0x143   : > { %v1937_v44 = vsel %vm1920_vm10, %v1904_v26, %v6104_v11  ;;  %v1938_v36 = vsel %vm1920_vm10, %v1905_v27, %v6105_v51 }
 0x144   : > { %6322 = vrot.lane.b32.xlu0 %v7716_v25, %s6860_s28  ;;  %v1970_v42 = vsel %vm1953_vm11, %v1937_v44, %v6109_v62  ;;  %v1971_v30 = vsel %vm1953_vm11, %v1938_v36, %v6110_v46  ;;  %v7784_v55 = vpop.permute.xlu2 %6152  ;;  %v946_v25 = vsel %vm780_vm1, %v944_v28, %v945_v7  ;;  %v951_v48 = vsel %vm861_vm2, %v949_v22, %v950_v12 }
 0x145   : > { %v1994_v8 = vpack.c.bf16 %v1971_v30, %v1970_v42  ;;  %v6341_v45 = vpack.i.bf16 %v948_v50, %v946_v25  ;;  %v6125_v62 = vunpack.i.h.bf16 %v7729_v39  ;;  %v6346_v9 = vpack.i.bf16 %v953_v49, %v951_v48 }
 0x146   : > { %v6113_v31 = vpop.permute.xlu0 %6112  ;;  %6327 = vrot.lane.b32.xlu1 %v7739_v21, %s6863_s13  ;;  %v6140_v7 = vunpack.i.h.bf16 %v7761_v61 }
 0x147   : > { %5307 = vmatmul.msk.bf16.gmra.mxu0 %vm2016_vm12, %v1994_v8  ;;  %v6115_v53 = vunpack.i.h.bf16 %v6113_v31  ;;  %v6114_v57 = vunpack.i.l.bf16 %v6113_v31 }
 0x148   : > { %v6118_v3 = vpop.permute.xlu1 %6117 }
 0x149   : > { %6332 = vrot.lane.b32.xlu2 %v7731_v40, %s6865_s15  ;;  %v6120_v52 = vunpack.i.h.bf16 %v6118_v3  ;;  %v6119_v23 = vunpack.i.l.bf16 %v6118_v3  ;;  %v1742_v4 = vsel %vm1722_vm4, %v7293_v59, %v6115_v53  ;;  %v1741_v16 = vsel %vm1722_vm4, %v7296_v17, %v6114_v57  ;;  %v7816_v30 = vpop.f32.mrf.mxu0 }
 0x14b   : > { %v1775_v51 = vsel %vm1755_vm5, %v1742_v4, %v6120_v52  ;;  %v1774_v59 = vsel %vm1755_vm5, %v1741_v16, %v6119_v23  ;;  %v6154_v4 = vunpack.i.l.bf16 %v7784_v55 }
 0x14c   : > { %6337 = vrot.lane.b32.xlu0 %v6336_v13, %s6862_s30  ;;  %v7799_v46 = vpop.permute.xlu2 %6167  ;;  %v1807_v28 = vsel %vm1788_vm6, %v1774_v59, %v6124_v47  ;;  %v1808_v44 = vsel %vm1788_vm6, %v1775_v51, %v6125_v62 }
 0x14e   : > { %v6128_v34 = vpop.permute.xlu0 %6127  ;;  %6342 = vrot.lane.b32.xlu1 %v6341_v45, %s6864_s14 }
 0x14f   : > { %v6130_v11 = vunpack.i.h.bf16 %v6128_v34  ;;  %v6129_v17 = vunpack.i.l.bf16 %v6128_v34  ;;  %v6155_v34 = vunpack.i.h.bf16 %v7784_v55  ;;  %v1743_v55 = vsel %vm1722_vm4, %v7352_v60, %v6154_v4 }
 0x150   : > { %v6133_v38 = vpop.permute.xlu1 %6132 }
 0x151   : > { %v6135_v26 = vunpack.i.h.bf16 %v6133_v38  ;;  %v6134_v27 = vunpack.i.l.bf16 %v6133_v38  ;;  %6347 = vrot.lane.b32.xlu2 %v6346_v9, %s6866_s16  ;;  %v1840_v39 = vsel %vm1821_vm7, %v1807_v28, %v6129_v17  ;;  %v1841_v36 = vsel %vm1821_vm7, %v1808_v44, %v6130_v11  ;;  %v7836_v49 = vpop.f32.mrf.mxu0 }
 0x152   : > { %v6376_v38 = vpack.i.bf16 %v6943_v1, %v6949_v2 }
 0x153   : > { %v1873_v31 = vsel %vm1854_vm8, %v1840_v39, %v6134_v27  ;;  %v6169_v27 = vunpack.i.l.bf16 %v7799_v46 }
 0x154   : > { %6352 = vrot.lane.b32.xlu0 %v7739_v21, %s6859_s27  ;;  %v1874_v21 = vsel %vm1854_vm8, %v1841_v36, %v6135_v26  ;;  %v6183_v50 = vpop.permute.xlu2 %6182  ;;  %v1906_v53 = vsel %vm1887_vm9, %v1873_v31, %v6139_v20  ;;  %v6170_v26 = vunpack.i.h.bf16 %v7799_v46 }
 0x155   : > { %v1907_v57 = vsel %vm1887_vm9, %v1874_v21, %v6140_v7 }
 0x156   : > { %v6143_v42 = vpop.permute.xlu0 %6142  ;;  %6357 = vrot.lane.b32.xlu1 %v7731_v40, %s6861_s29 }
 0x157   : > { %v6145_v8 = vunpack.i.h.bf16 %v6143_v42  ;;  %v6144_v25 = vunpack.i.l.bf16 %v6143_v42 }
 0x158   : > { %v6148_v3 = vpop.permute.xlu1 %6147 }
 0x159   : > { %v6150_v22 = vunpack.i.h.bf16 %v6148_v3  ;;  %v6149_v61 = vunpack.i.l.bf16 %v6148_v3  ;;  %v1939_v12 = vsel %vm1920_vm10, %v1906_v53, %v6144_v25  ;;  %v1940_v63 = vsel %vm1920_vm10, %v1907_v57, %v6145_v8  ;;  %6362 = vrot.lane.b32.xlu2 %v6336_v13, %s6860_s28 }
 0x15a   : > { %v1744_v13 = vsel %vm1722_vm4, %v7349_v58, %v6155_v34  ;;  %v6185_v8 = vunpack.i.h.bf16 %v6183_v50  ;;  %v6184_v25 = vunpack.i.l.bf16 %v6183_v50 }
 0x15b   : > { %v1972_v52 = vsel %vm1953_vm11, %v1939_v12, %v6149_v61  ;;  %v1973_v40 = vsel %vm1953_vm11, %v1940_v63, %v6150_v22  ;;  %v7855_v36 = vpop.f32.mrf.mxu0 }
 0x15c   : > { %6367 = vrot.lane.b32.xlu0 %v6341_v45, %s6863_s13  ;;  %v1995_v23 = vpack.c.bf16 %v1973_v40, %v1972_v52  ;;  %v7834_v48 = vpop.permute.xlu2 %6197 }
 0x15e   : > { %v6158_v16 = vpop.permute.xlu0 %6157  ;;  %6372 = vrot.lane.b32.xlu1 %v6346_v9, %s6865_s15  ;;  %5308 = vmatmul.msk.bf16.gmra.mxu0 %vm2016_vm12, %v1995_v23 }
 0x15f   : > { %v6160_v45 = vunpack.i.h.bf16 %v6158_v16  ;;  %v6159_v62 = vunpack.i.l.bf16 %v6158_v16 }
 0x160   : > { %v6163_v47 = vpop.permute.xlu1 %6162 }
 0x161   : > { %v6165_v51 = vunpack.i.h.bf16 %v6163_v47  ;;  %v6164_v9 = vunpack.i.l.bf16 %v6163_v47  ;;  %v1776_v59 = vsel %vm1755_vm5, %v1743_v55, %v6159_v62  ;;  %v1777_v11 = vsel %vm1755_vm5, %v1744_v13, %v6160_v45  ;;  %6377 = vrot.lane.b32.xlu2 %v6376_v38, %s6862_s30 }
 0x162   : > { %v6200_v38 = vunpack.i.h.bf16 %v7834_v48  ;;  %v6199_v13 = vunpack.i.l.bf16 %v7834_v48 }
 0x163   : > { %v1810_v60 = vsel %vm1788_vm6, %v1777_v11, %v6165_v51  ;;  %v1809_v28 = vsel %vm1788_vm6, %v1776_v59, %v6164_v9  ;;  %v7867_v16 = vpop.f32.mrf.mxu0 }
 0x164   : > { %6382 = vrot.lane.b32.xlu0 %v6968_v15, %s6864_s14  ;;  %v6213_v58 = vpop.permute.xlu2 %6212  ;;  %v1842_v31 = vsel %vm1821_vm7, %v1809_v28, %v6169_v27  ;;  %v1843_v21 = vsel %vm1821_vm7, %v1810_v60, %v6170_v26 }
 0x166   : > { %v6173_v17 = vpop.permute.xlu0 %6172  ;;  %6387 = vrot.lane.b32.xlu1 %v7000_v33, %s6866_s16 }
 0x167   : > { %v6175_v44 = vunpack.i.h.bf16 %v6173_v17  ;;  %v6174_v39 = vunpack.i.l.bf16 %v6173_v17 }
 0x168   : > { %v6178_v7 = vpop.permute.xlu1 %6177 }
 0x169   : > { %v6180_v20 = vunpack.i.h.bf16 %v6178_v7  ;;  %v6179_v42 = vunpack.i.l.bf16 %v6178_v7  ;;  %v1875_v46 = vsel %vm1854_vm8, %v1842_v31, %v6174_v39  ;;  %v1876_v33 = vsel %vm1854_vm8, %v1843_v21, %v6175_v44 }
 0x16a   : > { %v6215_v39 = vunpack.i.h.bf16 %v6213_v58  ;;  %v6214_v7 = vunpack.i.l.bf16 %v6213_v58 }
 0x16b   : > { %v1908_v3 = vsel %vm1887_vm9, %v1875_v46, %v6179_v42  ;;  %v1909_v53 = vsel %vm1887_vm9, %v1876_v33, %v6180_v20 }
 0x16c   : > { %v6228_v12 = vpop.permute.xlu2 %6227  ;;  %v1941_v63 = vsel %vm1920_vm10, %v1908_v3, %v6184_v25  ;;  %v1942_v52 = vsel %vm1920_vm10, %v1909_v53, %v6185_v8 }
 0x16d   : > { %v6230_v46 = vunpack.i.h.bf16 %v6228_v12  ;;  %v6229_v33 = vunpack.i.l.bf16 %v6228_v12 }
 0x16e   : > { %v6188_v57 = vpop.permute.xlu0 %6187  ;;  %6402 = vrot.lane.b32.xlu1 %v6968_v15, %s6869_s26  ;;  %v5668_v15 = vld [vmem:[%s9847_s4 + $0x48] sm:$0xff] }
 0x16f   : > { %v6190_v22 = vunpack.i.h.bf16 %v6188_v57  ;;  %v6189_v61 = vunpack.i.l.bf16 %v6188_v57 }
 0x170   : > { %v6193_v40 = vpop.permute.xlu1 %6192 }
 0x171   : > { %v1974_v23 = vsel %vm1953_vm11, %v1941_v63, %v6189_v61  ;;  %v1975_v34 = vsel %vm1953_vm11, %v1942_v52, %v6190_v22  ;;  %v6195_v50 = vunpack.i.h.bf16 %v6193_v40  ;;  %v6194_v45 = vunpack.i.l.bf16 %v6193_v40  ;;  %v7876_v17 = vpop.f32.mrf.mxu0 }
 0x172   : > { %v1996_v4 = vpack.c.bf16 %v1975_v34, %v1974_v23 }
 0x173   : > { %v1746_v51 = vsel %vm1722_vm4, %v7410_v37, %v6195_v50  ;;  %v1745_v9 = vsel %vm1722_vm4, %v7416_v18, %v6194_v45 }
 0x174   : > { %5309 = vmatmul.msk.bf16.gmra.mxu0 %vm2016_vm12, %v1996_v4  ;;  %v6243_v47 = vpop.permute.xlu2 %6242  ;;  %v1778_v60 = vsel %vm1755_vm5, %v1745_v9, %v6199_v13  ;;  %v1779_v28 = vsel %vm1755_vm5, %v1746_v51, %v6200_v38 }
 0x176   : > { %v6203_v62 = vpop.permute.xlu0 %6202 }
 0x177   : > { %v6205_v59 = vunpack.i.h.bf16 %v6203_v62  ;;  %v6204_v11 = vunpack.i.l.bf16 %v6203_v62 }
 0x178   : > { %v6208_v55 = vpop.permute.xlu1 %6207 }
 0x179   : > { %v6210_v26 = vunpack.i.h.bf16 %v6208_v55  ;;  %v6209_v27 = vunpack.i.l.bf16 %v6208_v55  ;;  %v1811_v44 = vsel %vm1788_vm6, %v1778_v60, %v6204_v11  ;;  %v1812_v48 = vsel %vm1788_vm6, %v1779_v28, %v6205_v59  ;;  %v7890_v52 = vpop.f32.mrf.mxu0 }
 0x17a   : > { %v6245_v11 = vunpack.i.h.bf16 %v6243_v47 }
 0x17b   : > { %v1844_v20 = vsel %vm1821_vm7, %v1811_v44, %v6209_v27  ;;  %v1845_v18 = vsel %vm1821_vm7, %v1812_v48, %v6210_v26  ;;  %v6244_v26 = vunpack.i.l.bf16 %v6243_v47 }
 0x17c   : > { %v1877_v8 = vsel %vm1854_vm8, %v1844_v20, %v6214_v7  ;;  %v1878_v25 = vsel %vm1854_vm8, %v1845_v18, %v6215_v39  ;;  %v6258_v57 = vpop.permute.xlu2 %6257 }
 0x17e   : > { %v6218_v37 = vpop.permute.xlu0 %6217 }
 0x17f   : > { %v6220_v42 = vunpack.i.h.bf16 %v6218_v37  ;;  %v6219_v31 = vunpack.i.l.bf16 %v6218_v37 }
 0x180   : > { %v6223_v21 = vpop.permute.xlu1 %6222 }
 0x181   : > { %v6225_v3 = vunpack.i.h.bf16 %v6223_v21  ;;  %v6224_v53 = vunpack.i.l.bf16 %v6223_v21  ;;  %v1910_v22 = vsel %vm1887_vm9, %v1877_v8, %v6219_v31  ;;  %v1911_v58 = vsel %vm1887_vm9, %v1878_v25, %v6220_v42 }
 0x182   : > { %v6259_v42 = vunpack.i.l.bf16 %v6258_v57 }
 0x183   : > { %v1943_v61 = vsel %vm1920_vm10, %v1910_v22, %v6224_v53  ;;  %v1944_v63 = vsel %vm1920_vm10, %v1911_v58, %v6225_v3 }
 0x184   : > { %v1976_v40 = vsel %vm1953_vm11, %v1943_v61, %v6229_v33  ;;  %v1977_v12 = vsel %vm1953_vm11, %v1944_v63, %v6230_v46  ;;  %v6273_v62 = vpop.permute.xlu2 %6272  ;;  %v7895_v38 = vpop.f32.mrf.mxu0 }
 0x185   : > { %v1997_v34 = vpack.c.bf16 %v1977_v12, %v1976_v40 }
 0x186   : > { %v6233_v23 = vpop.permute.xlu0 %6232 }
 0x187   : > { %5310 = vmatmul.msk.bf16.gmra.mxu0 %vm2016_vm12, %v1997_v34  ;;  %v6235_v50 = vunpack.i.h.bf16 %v6233_v23  ;;  %v6234_v45 = vunpack.i.l.bf16 %v6233_v23  ;;  %v6275_v34 = vunpack.i.h.bf16 %v6273_v62 }
 0x188   : > { %v6238_v4 = vpop.permute.xlu1 %6237 }
 0x189   : > { %v6240_v13 = vunpack.i.h.bf16 %v6238_v4  ;;  %v6239_v55 = vunpack.i.l.bf16 %v6238_v4  ;;  %v1748_v9 = vsel %vm1722_vm4, %v7497_v32, %v6235_v50  ;;  %v1747_v59 = vsel %vm1722_vm4, %v7500_v6, %v6234_v45 }
 0x18a   : > { %v6260_v6 = vunpack.i.h.bf16 %v6258_v57  ;;  %v6274_v4 = vunpack.i.l.bf16 %v6273_v62 }
 0x18b   : > { %v1781_v60 = vsel %vm1755_vm5, %v1748_v9, %v6240_v13  ;;  %v1780_v28 = vsel %vm1755_vm5, %v1747_v59, %v6239_v55  ;;  %v1750_v59 = vsel %vm1722_vm4, %v7553_v29, %v6275_v34 }
 0x18c   : > { %v1813_v37 = vsel %vm1788_vm6, %v1780_v28, %v6244_v26  ;;  %v1814_v20 = vsel %vm1788_vm6, %v1781_v60, %v6245_v11  ;;  %v6288_v31 = vpop.permute.xlu2 %6287  ;;  %v7907_v21 = vpop.f32.mrf.mxu0  ;;  %v1749_v11 = vsel %vm1722_vm4, %v7556_v35, %v6274_v4 }
 0x18e   : > { %v6248_v51 = vpop.permute.xlu0 %6247 }
 0x18f   : > { %v6250_v44 = vunpack.i.h.bf16 %v6248_v51  ;;  %v6249_v48 = vunpack.i.l.bf16 %v6248_v51 }
 0x190   : > { %v6253_v27 = vpop.permute.xlu1 %6252 }
 0x191   : > { %v6255_v39 = vunpack.i.h.bf16 %v6253_v27  ;;  %v6254_v7 = vunpack.i.l.bf16 %v6253_v27  ;;  %v1846_v32 = vsel %vm1821_vm7, %v1813_v37, %v6249_v48  ;;  %v1847_v18 = vsel %vm1821_vm7, %v1814_v20, %v6250_v44 }
 0x192   : > { %v6290_v44 = vunpack.i.h.bf16 %v6288_v31  ;;  %v6289_v48 = vunpack.i.l.bf16 %v6288_v31 }
 0x193   : > { %v1879_v46 = vsel %vm1854_vm8, %v1846_v32, %v6254_v7  ;;  %v1880_v33 = vsel %vm1854_vm8, %v1847_v18, %v6255_v39 }
 0x194   : > { %v1912_v53 = vsel %vm1887_vm9, %v1879_v46, %v6259_v42  ;;  %v1913_v22 = vsel %vm1887_vm9, %v1880_v33, %v6260_v6  ;;  %v6303_v13 = vpop.permute.xlu2 %6302 }
 0x195   : > { %v6305_v31 = vunpack.i.h.bf16 %v6303_v13 }
 0x196   : > { %v6263_v47 = vpop.permute.xlu0 %6262 }
 0x197   : > { %v6265_v8 = vunpack.i.h.bf16 %v6263_v47  ;;  %v6264_v25 = vunpack.i.l.bf16 %v6263_v47 }
 0x198   : > { %v6268_v3 = vpop.permute.xlu1 %6267 }
 0x199   : > { %v6270_v58 = vunpack.i.h.bf16 %v6268_v3  ;;  %v6269_v61 = vunpack.i.l.bf16 %v6268_v3  ;;  %v1945_v63 = vsel %vm1920_vm10, %v1912_v53, %v6264_v25  ;;  %v1946_v57 = vsel %vm1920_vm10, %v1913_v22, %v6265_v8 }
 0x19a   : > { %v6304_v8 = vunpack.i.l.bf16 %v6303_v13  ;;  %v7940_v13 = vld [vmem:[%s9845_s2] ss:$0 sm:$0xff] }
 0x19b   : > { %v1978_v40 = vsel %vm1953_vm11, %v1945_v63, %v6269_v61  ;;  %v1979_v12 = vsel %vm1953_vm11, %v1946_v57, %v6270_v58  ;;  %v2110_v45 = vpop.f32.mrf.mxu0 }
 0x19c   : > { %v1998_v23 = vpack.c.bf16 %v1979_v12, %v1978_v40  ;;  %v6318_v35 = vpop.permute.xlu2 %6317 }
 0x19e   : > { %v6278_v50 = vpop.permute.xlu0 %6277  ;;  %5311 = vmatmul.msk.bf16.gmra.mxu0 %vm2016_vm12, %v1998_v23 }
 0x19f   : > { %v6280_v55 = vunpack.i.h.bf16 %v6278_v50  ;;  %v6279_v51 = vunpack.i.l.bf16 %v6278_v50 }
 0x1a0   : > { %v6283_v9 = vpop.permute.xlu1 %6282 }
 0x1a1   : > { %v6285_v26 = vunpack.i.h.bf16 %v6283_v9  ;;  %v6284_v27 = vunpack.i.l.bf16 %v6283_v9  ;;  %v1782_v60 = vsel %vm1755_vm5, %v1749_v11, %v6279_v51  ;;  %v1783_v62 = vsel %vm1755_vm5, %v1750_v59, %v6280_v55 }
 0x1a2   : > { %v7943_v9 = vadd.f32 %v7940_v13, %v2110_v45 }
 0x1a3   : > { %v1816_v39 = vsel %vm1788_vm6, %v1783_v62, %v6285_v26  ;;  %v1815_v7 = vsel %vm1788_vm6, %v1782_v60, %v6284_v27  ;;  %v2112_v32 = vpop.f32.mrf.mxu0  ;;  %v6320_v27 = vunpack.i.h.bf16 %v6318_v35  ;;  %v6319_v60 = vunpack.i.l.bf16 %v6318_v35 }
 0x1a4   : > { %v1848_v42 = vsel %vm1821_vm7, %v1815_v7, %v6289_v48  ;;  %v1849_v47 = vsel %vm1821_vm7, %v1816_v39, %v6290_v44  ;;  %v6333_v4 = vpop.permute.xlu2 %6332  ;;  %v7949_v11 = vadd.f32 %v7940_v13, %v2112_v32 }
 0x1a5   : > { %v6335_v35 = vunpack.i.h.bf16 %v6333_v4 }
 0x1a6   : > { %v6293_v28 = vpop.permute.xlu0 %6292 }
 0x1a7   : > { %v6295_v37 = vunpack.i.h.bf16 %v6293_v28  ;;  %v6294_v20 = vunpack.i.l.bf16 %v6293_v28 }
 0x1a8   : > { %v6298_v29 = vpop.permute.xlu1 %6297 }
 0x1a9   : > { %v6300_v18 = vunpack.i.h.bf16 %v6298_v29  ;;  %v6299_v6 = vunpack.i.l.bf16 %v6298_v29  ;;  %v1881_v46 = vsel %vm1854_vm8, %v1848_v42, %v6294_v20  ;;  %v1882_v33 = vsel %vm1854_vm8, %v1849_v47, %v6295_v37 }
 0x1aa   : > { %v7960_v20 = vadd.f32 %v7940_v13, %v7907_v21 }
 0x1ab   : > { %v1914_v25 = vsel %vm1887_vm9, %v1881_v46, %v6299_v6  ;;  %v1915_v3 = vsel %vm1887_vm9, %v1882_v33, %v6300_v18  ;;  %v9875_v18 = vmax.f32 %v7949_v11, 0.0  ;;  %v6334_v46 = vunpack.i.l.bf16 %v6333_v4 }
 0x1ac   : > { %v1947_v61 = vsel %vm1920_vm10, %v1914_v25, %v6304_v8  ;;  %v1948_v63 = vsel %vm1920_vm10, %v1915_v3, %v6305_v31  ;;  %v6348_v31 = vpop.permute.xlu2 %6347 }
 0x1ae   : > { %v6308_v53 = vpop.permute.xlu0 %6307 }
 0x1af   : > { %v6310_v22 = vunpack.i.h.bf16 %v6308_v53  ;;  %v6309_v58 = vunpack.i.l.bf16 %v6308_v53 }
 0x1b0   : > { %v6313_v12 = vpop.permute.xlu1 %6312 }
 0x1b1   : > { %v1980_v57 = vsel %vm1953_vm11, %v1947_v61, %v6309_v58  ;;  %v1981_v40 = vsel %vm1953_vm11, %v1948_v63, %v6310_v22  ;;  %v2115_v23 = vpop.f32.mrf.mxu0  ;;  %v6315_v50 = vunpack.i.h.bf16 %v6313_v12  ;;  %v6314_v55 = vunpack.i.l.bf16 %v6313_v12 }
 0x1b2   : > { %v1999_v34 = vpack.c.bf16 %v1981_v40, %v1980_v57  ;;  %v7946_v59 = vadd.f32 %v7940_v13, %v2115_v23  ;;  %v7978_v22 = vadd.f32 %v7940_v13, %v7890_v52  ;;  %v7982_v58 = vadd.f32 %v7940_v13, %v7895_v38 }
 0x1b3   : > { %v1752_v26 = vsel %vm1722_vm4, %v7614_v41, %v6315_v50  ;;  %v1751_v44 = vsel %vm1722_vm4, %v7620_v10, %v6314_v55  ;;  %v9872_v41 = vmax.f32 %v7943_v9, 0.0  ;;  %v9877_v61 = vmax.f32 %v7960_v20, 0.0 }
 0x1b4   : > { %5312 = vmatmul.msk.bf16.gmra.mxu0 %vm2016_vm12, %v1999_v34  ;;  %v9870_v32 = vmax.f32 %v7946_v59, 0.0  ;;  %v1784_v10 = vsel %vm1755_vm5, %v1751_v44, %v6319_v60  ;;  %v1785_v6 = vsel %vm1755_vm5, %v1752_v26, %v6320_v27  ;;  %v6350_v40 = vunpack.i.h.bf16 %v6348_v31 }
 0x1b5   : > { %v2198_v57 = vpack.c.bf16 %v9875_v18, %v9872_v41  ;;  %v6349_v12 = vunpack.i.l.bf16 %v6348_v31  ;;  %v7995_v55 = vadd.f32 %v7940_v13, %v7876_v17  ;;  %v9879_v44 = vmax.f32 %v7978_v22, 0.0  ;;  %v5655_v41 = vld [vmem:[%s9846_s3 + $0x14] sm:$0xf] }
 0x1b6   : > { %v6323_v51 = vpop.permute.xlu0 %6322 }
 0x1b7   : > { %v6325_v48 = vunpack.i.h.bf16 %v6323_v51  ;;  %v6324_v39 = vunpack.i.l.bf16 %v6323_v51  ;;  %v9876_v51 = vmax.f32 %v7982_v58, 0.0 }
 0x1b8   : > { %v6328_v62 = vpop.permute.xlu1 %6327 }
 0x1b9   : > { %v2117_v28 = vpop.f32.mrf.mxu0  ;;  %v6330_v7 = vunpack.i.h.bf16 %v6328_v62  ;;  %v6329_v37 = vunpack.i.l.bf16 %v6328_v62  ;;  %v1817_v42 = vsel %vm1788_vm6, %v1784_v10, %v6324_v39  ;;  %v1818_v47 = vsel %vm1788_vm6, %v1785_v6, %v6325_v48  ;;  %v6363_v6 = vpop.permute.xlu2 %6362 }
 0x1ba   : > { %v7956_v45 = vadd.f32 %v7940_v13, %v2117_v28  ;;  %v8004_v28 = vadd.f32 %v7940_v13, %v7867_v16  ;;  %v2197_v39 = vpack.c.bf16 %v9877_v61, %v9876_v51  ;;  %v8018_v16 = vadd.f32 %v7940_v13, %v7836_v49 }
 0x1bb   : > { %v1850_v8 = vsel %vm1821_vm7, %v1817_v42, %v6329_v37  ;;  %v1851_v25 = vsel %vm1821_vm7, %v1818_v47, %v6330_v7  ;;  %v8013_v7 = vadd.f32 %v7940_v13, %v7855_v36  ;;  %v9878_v37 = vmax.f32 %v7995_v55, 0.0 }
 0x1bc   : > { %v9871_v29 = vmax.f32 %v7956_v45, 0.0  ;;  %v1883_v23 = vsel %vm1854_vm8, %v1850_v8, %v6334_v46  ;;  %v1884_v52 = vsel %vm1854_vm8, %v1851_v25, %v6335_v35  ;;  %v9881_v35 = vmax.f32 %v8004_v28, 0.0 }
 0x1bd   : > { %v2196_v36 = vpack.c.bf16 %v9879_v44, %v9878_v37  ;;  %v8028_v42 = vadd.f32 %v7940_v13, %v7816_v30  ;;  %v9880_v49 = vmax.f32 %v8013_v7, 0.0 }
 0x1be   : > { %v6338_v21 = vpop.permute.xlu0 %6337  ;;  %v2199_v33 = vpack.c.bf16 %v9871_v29, %v9870_v32 }
 0x1bf   : > { %v6340_v3 = vunpack.i.h.bf16 %v6338_v21  ;;  %v6339_v53 = vunpack.i.l.bf16 %v6338_v21  ;;  %v8033_v21 = vadd.f32 %v7940_v13, %v7792_v0  ;;  %v2195_v30 = vpack.c.bf16 %v9881_v35, %v9880_v49 }
 0x1c0   : > { %2245 = vmatpush.bf16.msrb.mxu0 %v2199_v33  ;;  %5715 = vmatpush.bf16.msra.mxu1 %v2199_v33  ;;  %v6343_v63 = vpop.permute.xlu1 %6342  ;;  %v2165_v33 = vmax.f32 %v8018_v16, 0.0 }
 0x1c1   : > { %v6345_v34 = vunpack.i.h.bf16 %v6343_v63  ;;  %v6344_v4 = vunpack.i.l.bf16 %v6343_v63  ;;  %v1916_v38 = vsel %vm1887_vm9, %v1883_v23, %v6339_v53  ;;  %v1917_v50 = vsel %vm1887_vm9, %v1884_v52, %v6340_v3 }
 0x1c2   : > { %v8042_v3 = vadd.f32 %v7940_v13, %v7776_v56  ;;  %v9884_v53 = vmax.f32 %v8028_v42, 0.0  ;;  %v9883_v56 = vmax.f32 %v8033_v21, 0.0  ;;  %v6364_v23 = vunpack.i.l.bf16 %v6363_v6 }
 0x1c3   : > { %v1949_v26 = vsel %vm1920_vm10, %v1916_v38, %v6344_v4  ;;  %v1950_v27 = vsel %vm1920_vm10, %v1917_v50, %v6345_v34 }
 0x1c4   : > { %2246 = vmatpush.bf16.msrb.mxu0 %v2198_v57  ;;  %5716 = vmatpush.bf16.msra.mxu1 %v2198_v57  ;;  %v1982_v60 = vsel %vm1953_vm11, %v1949_v26, %v6349_v12  ;;  %v1983_v62 = vsel %vm1953_vm11, %v1950_v27, %v6350_v40  ;;  %v8051_v57 = vadd.f32 %v7940_v13, %v7712_v5  ;;  %v6365_v12 = vunpack.i.h.bf16 %v6363_v6  ;;  %v6378_v26 = vpop.permute.xlu2 %6377 }
 0x1c5   : > { %v2000_v17 = vpack.c.bf16 %v1983_v62, %v1982_v60  ;;  %v8055_v40 = vadd.f32 %v7940_v13, %v7747_v54  ;;  %v9882_v54 = vmax.f32 %v8042_v3, 0.0  ;;  %v6380_v6 = vunpack.i.h.bf16 %v6378_v26 }
 0x1c6   : > { %v6353_v48 = vpop.permute.xlu0 %6352  ;;  %v2160_v27 = vmax.f32 %v8051_v57, 0.0 }
 0x1c7   : > { %5313 = vmatmul.msk.bf16.gmra.mxu0 %vm2016_vm12, %v2000_v17  ;;  %v6355_v47 = vunpack.i.h.bf16 %v6353_v48  ;;  %v6354_v46 = vunpack.i.l.bf16 %v6353_v48  ;;  %v2161_v60 = vmax.f32 %v8055_v40, 0.0  ;;  %v2193_v48 = vpack.c.bf16 %v9883_v56, %v9882_v54 }
 0x1c8   : > { %2247 = vmatpush.bf16.msrb.mxu0 %v2197_v39  ;;  %5717 = vmatpush.bf16.msra.mxu1 %v2197_v39  ;;  %v6358_v10 = vpop.permute.xlu1 %6357 }
 0x1c9   : > { %v6360_v31 = vunpack.i.h.bf16 %v6358_v10  ;;  %v6359_v8 = vunpack.i.l.bf16 %v6358_v10  ;;  %v1754_v0 = vsel %vm1722_vm4, %v7699_v43, %v6355_v47  ;;  %v1753_v63 = vsel %vm1722_vm4, %v7702_v14, %v6354_v46 }
 0x1ca   : > { %v2194_v43 = vpack.c.bf16 %v2165_v33, %v9884_v53 }
 0x1cb   : > { %v1787_v14 = vsel %vm1755_vm5, %v1754_v0, %v6360_v31  ;;  %v1786_v5 = vsel %vm1755_vm5, %v1753_v63, %v6359_v8  ;;  %v2192_v0 = vpack.c.bf16 %v2161_v60, %v2160_v27 }
 0x1cc   : > { %2248 = vmatpush.bf16.msrb.mxu0 %v2196_v36  ;;  %5718 = vmatpush.bf16.msra.mxu1 %v2196_v36  ;;  %v1819_v62 = vsel %vm1788_vm6, %v1786_v5, %v6364_v23  ;;  %v1820_v17 = vsel %vm1788_vm6, %v1787_v14, %v6365_v12  ;;  %v6379_v36 = vunpack.i.l.bf16 %v6378_v26 }
 0x1ce   : > { %v6368_v25 = vpop.permute.xlu0 %6367 }
 0x1cf   : > { %v6370_v34 = vunpack.i.h.bf16 %v6368_v25  ;;  %v6369_v4 = vunpack.i.l.bf16 %v6368_v25 }
 0x1d0   : > { %2249 = vmatpush.bf16.msrb.mxu0 %v2195_v30  ;;  %5719 = vmatpush.bf16.msra.mxu1 %v2195_v30  ;;  %v6373_v52 = vpop.permute.xlu1 %6372 }
 0x1d1   : > { %v6375_v38 = vunpack.i.h.bf16 %v6373_v52  ;;  %v6374_v50 = vunpack.i.l.bf16 %v6373_v52  ;;  %v1852_v39 = vsel %vm1821_vm7, %v1819_v62, %v6369_v4  ;;  %v1853_v10 = vsel %vm1821_vm7, %v1820_v17, %v6370_v34 }
 0x1d3   : > { %v1885_v46 = vsel %vm1854_vm8, %v1852_v39, %v6374_v50  ;;  %v1886_v31 = vsel %vm1854_vm8, %v1853_v10, %v6375_v38  ;;  %v8087_v38 = vpop.f32.mrf.mxu0 }
 0x1d4   : > { %2250 = vmatpush.bf16.msrb.mxu0 %v2194_v43  ;;  %5720 = vmatpush.bf16.msra.mxu1 %v2194_v43  ;;  %v1918_v63 = vsel %vm1887_vm9, %v1885_v46, %v6379_v36  ;;  %v1919_v12 = vsel %vm1887_vm9, %v1886_v31, %v6380_v6  ;;  %v5317_v46 = vld [vmem:[%s9846_s3] sm:$0xf]  ;;  %v5654_v31 = vld [vmem:[%s9846_s3 + $0x4] sm:$0xf0] }
 0x1d6   : > { %v6383_v47 = vpop.permute.xlu0 %6382 }
 0x1d7   : > { %v6385_v8 = vunpack.i.h.bf16 %v6383_v47  ;;  %v6384_v25 = vunpack.i.l.bf16 %v6383_v47 }
 0x1d8   : > { %2251 = vmatpush.bf16.msrb.mxu0 %v2193_v48  ;;  %5721 = vmatpush.bf16.msra.mxu1 %v2193_v48  ;;  %v6388_v30 = vpop.permute.xlu1 %6387 }
 0x1d9   : > { %v6390_v23 = vunpack.i.h.bf16 %v6388_v30  ;;  %v6389_v52 = vunpack.i.l.bf16 %v6388_v30  ;;  %v1951_v43 = vsel %vm1920_vm10, %v1918_v63, %v6384_v25  ;;  %v1952_v14 = vsel %vm1920_vm10, %v1919_v12, %v6385_v8  ;;  %v5656_v63 = vld [vmem:[%s9846_s3 + $0x14] sm:$0xf0] }
 0x1da   : > { %v5318_v8 = vor.u32 %v5654_v31, %v5317_v46 }
 0x1db   : > { %v1984_v5 = vsel %vm1953_vm11, %v1951_v43, %v6389_v52  ;;  %v1985_v34 = vsel %vm1953_vm11, %v1952_v14, %v6390_v23  ;;  %v8090_v50 = vpop.f32.mrf.mxu0 }
 0x1dc   : > { %2252 = vmatpush.bf16.msrb.mxu0 %v2192_v0  ;;  %5722 = vmatpush.bf16.msra.mxu1 %v2192_v0  ;;  %v2001_v4 = vpack.c.bf16 %v1985_v34, %v1984_v5  ;;  %v5325_v0 = vld [vmem:[%s9846_s3 + $0x10] sm:$0xf] }
 0x1dd   : > { %v5326_v12 = vor.u32 %v5656_v63, %v5325_v0 }
 0x1de   : > { %5314 = vmatmul.msk.bf16.gmra.mxu0 %vm2016_vm12, %v2001_v4 }
 0x1e3   : > { %v2125_v26 = vpop.f32.mrf.mxu0 }
 0x1eb   : > { %v2127_v62 = vpop.f32.mrf.mxu0 }
 0x1ee   : > { %2253 = vmatmul.bf16.vlgmr.msrb.gmra.mxu0 %v5318_v8 }
 0x1f3   : > { %v2130_v17 = vpop.f32.mrf.mxu0 }
 0x1fb   : > { %v2132_v48 = vpop.f32.mrf.mxu0 }
 0x1fe   : > { %2258 = vmatmul.bf16.gmra.mxu0 %v5326_v12 }
 0x204   : > { %v2135_v39 = vpop.f32.mrf.mxu0 }
 0x20c   : > { %v2137_v10 = vpop.f32.mrf.mxu0 }
 0x21b   : > { %v2140_v6 = vpop.f32.mrf.mxu0 }
 0x223   : > { %v2142_v36 = vpop.f32.mrf.mxu0 }
 0x231   : > { %v2145_v47 = vpop.f32.mrf.mxu0 }
 0x232   : > { %v8127_v12 = vadd.f32 %v7940_v13, %v2145_v47 }
 0x234   : > { %v9860_v47 = vmax.f32 %v8127_v12, 0.0 }
 0x239   : > { %v2147_v25 = vpop.f32.mrf.mxu0 }
 0x23a   : > { %v8119_v8 = vadd.f32 %v7940_v13, %v2147_v25 }
 0x23c   : > { %v9861_v25 = vmax.f32 %v8119_v8, 0.0 }
 0x244   : > { %v2150_v30 = vpop.f32.mrf.mxu0 }
 0x245   : > { %v8114_v4 = vadd.f32 %v7940_v13, %v2150_v30 }
 0x247   : > { %v9858_v30 = vmax.f32 %v8114_v4, 0.0 }
 0x24c   : > { %v2152_v23 = vpop.f32.mrf.mxu0 }
 0x24d   : > { %v8108_v5 = vadd.f32 %v7940_v13, %v2152_v23  ;;  %v8131_v23 = vadd.f32 %v7940_v13, %v2142_v36 }
 0x24f   : > { %v9859_v0 = vmax.f32 %v8108_v5, 0.0  ;;  %v9863_v36 = vmax.f32 %v8131_v23, 0.0 }
 0x25b   : > { %v2155_v52 = vpop.f32.mrf.mxu0 }
 0x25c   : > { %v8105_v43 = vadd.f32 %v7940_v13, %v2155_v52  ;;  %v2206_v52 = vpack.c.bf16 %v9859_v0, %v9858_v30  ;;  %v8155_v30 = vadd.f32 %v7940_v13, %v2132_v48  ;;  %v8163_v0 = vadd.f32 %v7940_v13, %v2130_v17 }
 0x25d   : > { %v8178_v17 = vadd.f32 %v7940_v13, %v2125_v26 }
 0x25e   : > { %9917 = vst [vmem:[#allocation4_spill] sm:$0xff] %v8105_v43  ;;  %v9856_v46 = vmax.f32 %v8105_v43, 0.0  ;;  %v9867_v48 = vmax.f32 %v8155_v30, 0.0 }
 0x263   : > { %v2157_v14 = vpop.f32.mrf.mxu0 }
 0x264   : > { %v8111_v34 = vadd.f32 %v7940_v13, %v2157_v14  ;;  %v8139_v14 = vadd.f32 %v7940_v13, %v2140_v6 }
 0x266   : > { %9918 = vst [vmem:[#allocation5_spill] sm:$0xff] %v8111_v34  ;;  %v9857_v31 = vmax.f32 %v8111_v34, 0.0  ;;  %v9862_v6 = vmax.f32 %v8139_v14, 0.0 }
 0x268   : > { %v2207_v63 = vpack.c.bf16 %v9857_v31, %v9856_v46  ;;  %v8143_v46 = vadd.f32 %v7940_v13, %v2137_v10  ;;  %v8151_v31 = vadd.f32 %v7940_v13, %v2135_v39 }
 0x26a   : > { %2273 = vmatpush.bf16.msra.mxu0 %v2207_v63  ;;  %5723 = vmatpush.bf16.msra.mxu2 %v2207_v63  ;;  %v2205_v63 = vpack.c.bf16 %v9861_v25, %v9860_v47  ;;  %v9865_v10 = vmax.f32 %v8143_v46, 0.0  ;;  %v9864_v39 = vmax.f32 %v8151_v31, 0.0  ;;  %v8167_v47 = vadd.f32 %v7940_v13, %v2127_v62  ;;  %v5333_v25 = vld [vmem:[%s9846_s3 + $0x20] sm:$0xf]  ;;  %v5658_v62 = vld [vmem:[%s9846_s3 + $0x24] sm:$0xf0] }
 0x26e   : > { %2274 = vmatpush.bf16.msra.mxu0 %v2206_v52  ;;  %5724 = vmatpush.bf16.msra.mxu2 %v2206_v52  ;;  %v2204_v52 = vpack.c.bf16 %v9863_v36, %v9862_v6  ;;  %v9866_v6 = vmax.f32 %v8163_v0, 0.0  ;;  %v8186_v36 = vadd.f32 %v7940_v13, %v8090_v50 }
 0x270   : > { %v2202_v26 = vpack.c.bf16 %v9867_v48, %v9866_v6  ;;  %v5653_v6 = vld [vmem:[%s9846_s3 + $0x4] sm:$0xf] }
 0x272   : > { %2275 = vmatpush.bf16.msra.mxu0 %v2205_v63  ;;  %5725 = vmatpush.bf16.msra.mxu2 %v2205_v63  ;;  %v2203_v63 = vpack.c.bf16 %v9865_v10, %v9864_v39  ;;  %v9869_v39 = vmax.f32 %v8167_v47, 0.0  ;;  %v8195_v10 = vadd.f32 %v7940_v13, %v8087_v38  ;;  %v5319_v13 = vld [vmem:[%s9846_s3 + $0x8] sm:$0xf0]  ;;  %v5657_v38 = vld [vmem:[%s9846_s3 + $0x24] sm:$0xf] }
 0x273   : > { %v5322_v48 = vor.u32 %v5653_v6, %v5319_v13  ;;  %v2254_v6 = vpop.f32.mrf.mxu0 }
 0x276   : > { %2276 = vmatpush.bf16.msra.mxu0 %v2204_v52  ;;  %5726 = vmatpush.bf16.msra.mxu2 %v2204_v52  ;;  %v5334_v52 = vor.u32 %v5658_v62, %v5333_v25  ;;  %v9874_v25 = vmax.f32 %v8186_v36, 0.0  ;;  %v9873_v62 = vmax.f32 %v8195_v10, 0.0 }
 0x278   : > { %2263 = vmatmul.bf16.vlgmr.msra.gmra.mxu1 %v5334_v52  ;;  %v5335_v52 = vld [vmem:[%s9846_s3 + $0x28] sm:$0xf0] }
 0x27a   : > { %2277 = vmatpush.bf16.msra.mxu0 %v2203_v63  ;;  %5727 = vmatpush.bf16.msra.mxu2 %v2203_v63  ;;  %v9868_v63 = vmax.f32 %v8178_v17, 0.0 }
 0x27c   : > { %v2201_v50 = vpack.c.bf16 %v9869_v39, %v9868_v63  ;;  %v5338_v63 = vor.u32 %v5657_v38, %v5335_v52 }
 0x27e   : > { %2278 = vmatpush.bf16.msra.mxu0 %v2202_v26  ;;  %5728 = vmatpush.bf16.msra.mxu2 %v2202_v26  ;;  %v2200_v26 = vpack.c.bf16 %v9874_v25, %v9873_v62  ;;  %v5327_v62 = vld [vmem:[%s9846_s3 + $0x18] sm:$0xf0] }
 0x27f   : > { %v5330_v25 = vor.u32 %v5655_v41, %v5327_v62 }
 0x282   : > { %2279 = vmatpush.bf16.msra.mxu0 %v2201_v50  ;;  %5729 = vmatpush.bf16.msra.mxu2 %v2201_v50  ;;  %v458_v50 = vld [vmem:[%s9846_s3 + $0x30] sm:$0x11] }
 0x283   : > { %v2227_v39 = vunpack.c.l.b16 %v458_v50  ;;  %v2228_v29 = vunpack.c.h.b16 %v458_v50 }
 0x285   : > { %v2235_v32 = vpack.c.b16 %v2227_v39, %v2227_v39  ;;  %v2236_v18 = vpack.c.b16 %v2228_v29, %v2228_v29  ;;  %v5675_v39 = vld [vmem:[%s9848_s5] sm:$0xff] }
 0x286   : > { %2280 = vmatpush.bf16.msra.mxu0 %v2200_v26  ;;  %5730 = vmatpush.bf16.msra.mxu2 %v2200_v26 }
 0x288   : > { %2268 = vmatmul.bf16.gmra.mxu1 %v2235_v32  ;;  %v2256_v32 = vpop.f32.mrf.mxu0 }
 0x289   : > { %2281 = vmatmul.bf16.vlgmr.msra.gmra.mxu0 %v5322_v48  ;;  %2291 = vmatmul.bf16.vlgmr.msra.gmra.mxu2 %v5338_v63  ;;  %v5676_v48 = vld [vmem:[%s9848_s5 + $0x8] sm:$0xff] }
 0x28a   : > { %2339 = vmatpush.bf16.msra.mxu3 %v5676_v48 }
 0x28e   : > { %2340 = vmatpush.bf16.msra.mxu3 %v5675_v39 }
 0x290   : > { %v2259_v63 = vpop.f32.mrf.mxu0 }
 0x298   : > { %v2261_v13 = vpop.f32.mrf.mxu0 }
 0x299   : > { %2286 = vmatmul.bf16.gmra.mxu0 %v5330_v25  ;;  %2296 = vmatmul.bf16.gmra.mxu2 %v2236_v18 }
 0x2f5   : > { %v2264_v38 = vpop.f32.mrf.mxu1 }
 0x2fd   : > { %v2266_v41 = vpop.f32.mrf.mxu1 }
 0x305   : > { %v2269_v50 = vpop.f32.mrf.mxu1 }
 0x306   : > { %v2282_v52 = vpop.f32.mrf.mxu0 }
 0x307   : > { %v2283_v18 = vadd.f32 %v2282_v52, %v2254_v6 }
 0x30c   : > { %v2292_v29 = vpop.f32.mrf.mxu2 }
 0x30d   : > { %v2271_v61 = vpop.f32.mrf.mxu1  ;;  %v2293_v56 = vadd.f32 %v2292_v29, %v2264_v38 }
 0x30e   : > { %v2284_v25 = vpop.f32.mrf.mxu0 }
 0x30f   : > { %v2285_v62 = vadd.f32 %v2284_v25, %v2256_v32 }
 0x311   : > { %v2301_v26 = vpack.c.bf16 %v2285_v62, %v2283_v18 }
 0x313   : > { %5347 = vmatmul.msk.bf16.vlgmr.msra.gmra.mxu3 %vm2320_vm13, %v2301_v26 }
 0x314   : > { %v2294_v48 = vpop.f32.mrf.mxu2 }
 0x315   : > { %v2295_v53 = vadd.f32 %v2294_v48, %v2266_v41  ;;  %v501_v41 = vld [vmem:[%s9850_s7 + $0x28] sm:$0xff]  ;;  %v500_v48 = vld [vmem:[%s9850_s7 + $0x20] sm:$0xff] }
 0x316   : > { %v2287_v51 = vpop.f32.mrf.mxu0 }
 0x317   : > { %v2288_v39 = vadd.f32 %v2287_v51, %v2259_v63  ;;  %v2303_v6 = vpack.c.bf16 %v2295_v53, %v2293_v56 }
 0x31c   : > { %v2297_v37 = vpop.f32.mrf.mxu2 }
 0x31d   : > { %v2298_v32 = vadd.f32 %v2297_v37, %v2269_v50  ;;  %v502_v37 = vld [vmem:[%s9850_s7 + $0x30] sm:$0x3] }
 0x31e   : > { %v2289_v44 = vpop.f32.mrf.mxu0 }
 0x31f   : > { %v2290_v49 = vadd.f32 %v2289_v44, %v2261_v13  ;;  %v2304_v52 = vpack.c.bf16 %v2298_v32, %v2298_v32  ;;  %v6717_v44 = vld [vmem:[%s9849_s6] ss:$0 sm:$0xff] }
 0x321   : > { %v2302_v35 = vpack.c.bf16 %v2290_v49, %v2288_v39 }
 0x323   : > { %5348 = vmatmul.msk.bf16.gmra.mxu3 %vm2320_vm13, %v2302_v35 }
 0x324   : > { %v2299_v54 = vpop.f32.mrf.mxu2 }
 0x333   : > { %5349 = vmatmul.msk.bf16.gmra.mxu3 %vm2320_vm13, %v2303_v6 }
 0x343   : > { %5350 = vmatmul.msk.bf16.gmra.mxu3 %vm2320_vm13, %v2304_v52 }
 0x396   : > { %v2342_v25 = vpop.f32.mrf.mxu3 }
 0x39e   : > { %v2344_v18 = vpop.f32.mrf.mxu3 }
 0x39f   : > { %v2345_v6 = vadd.f32 %v6717_v44, %v2344_v18 }
 0x3a6   : > { %v2347_v61 = vpop.f32.mrf.mxu3 }
 0x3a7   : > { %v2348_v29 = vadd.f32 %v6717_v44, %v2347_v61  ;;  %v498_v61 = vld [vmem:[%s9850_s7 + $0x10] sm:$0xff] }
 0x3ae   : > { %v2349_v62 = vpop.f32.mrf.mxu3 }
 0x3af   : > { %v2350_v63 = vadd.f32 %v6717_v44, %v2349_v62  ;;  %v499_v62 = vld [vmem:[%s9850_s7 + $0x18] sm:$0xff] }
 0x3b1   : > { %v2364_v32 = vmax.f32 %v2350_v63, 0.0 }
 0x3b3   : > { %v2371_v18 = vmul.f32 %v2364_v32, %v499_v62  ;;  %v5663_v32 = vld [vmem:[%s9847_s4 + $0x20] sm:$0xff] }
 0x3b6   : > { %v2352_v26 = vpop.f32.mrf.mxu3 }
 0x3b7   : > { %v2353_v53 = vadd.f32 %v6717_v44, %v2352_v26 }
 0x3b9   : > { %v2365_v50 = vmax.f32 %v2353_v53, 0.0  ;;  %v2362_v53 = vmax.f32 %v2345_v6, 0.0  ;;  %v5662_v6 = vld [vmem:[%s9847_s4 + $0x18] sm:$0xff] }
 0x3be   : > { %v2354_v51 = vpop.f32.mrf.mxu3 }
 0x3bf   : > { %v2355_v35 = vadd.f32 %v6717_v44, %v2354_v51 }
 0x3c1   : > { %v2366_v13 = vmax.f32 %v2355_v35, 0.0  ;;  %v2343_v35 = vadd.f32 %v6717_v44, %v2342_v25  ;;  %v496_v25 = vld [vmem:[%s9850_s7] sm:$0xff] }
 0x3c3   : > { %v2373_v52 = vmul.f32 %v2366_v13, %v501_v41  ;;  %v2361_v63 = vmax.f32 %v2343_v35, 0.0 }
 0x3c5   : > { %v2368_v41 = vmul.f32 %v2361_v63, %v496_v25 }
 0x3c6   : > { %v2357_v49 = vpop.f32.mrf.mxu3 }
 0x3c7   : > { %v2358_v54 = vadd.f32 %v6717_v44, %v2357_v49  ;;  %v2363_v49 = vmax.f32 %v2348_v29, 0.0 }
 0x3c9   : > { %v2367_v56 = vmax.f32 %v2358_v54, 0.0  ;;  %v2372_v54 = vmul.f32 %v2365_v50, %v500_v48  ;;  %v2370_v13 = vmul.f32 %v2363_v49, %v498_v61  ;;  %v5659_v50 = vld [vmem:[%s9847_s4] sm:$0xff]  ;;  %v5660_v48 = vld [vmem:[%s9847_s4 + $0x8] sm:$0xff] }
 0x3cb   : > { %v2374_v38 = vmul.f32 %v2367_v56, %v502_v37  ;;  %v2377_v37 = vpack.c.bf16 %v2373_v52, %v2372_v54  ;;  %v497_v56 = vld [vmem:[%s9850_s7 + $0x8] sm:$0xff]  ;;  %v2376_v44 = vpack.c.bf16 %v2371_v18, %v2370_v13  ;;  %v5666_v54 = vld [vmem:[%s9847_s4 + $0x38] sm:$0xff] }
 0x3cc   : > { %v5664_v52 = vld [vmem:[%s9847_s4 + $0x28] sm:$0xff] }
 0x3cd   : > { %v2378_v39 = vpack.c.bf16 %v2374_v38, %v2374_v38  ;;  %v2369_v38 = vmul.f32 %v2362_v53, %v497_v56 }
 0x3ce   : > { %v2359_v26 = vpop.f32.mrf.mxu3 }
 0x3cf   : > { %v2509_v51 = vsel %vm614_vm0, %v2378_v39, 0  ;;  %v2375_v29 = vpack.c.bf16 %v2369_v38, %v2368_v41  ;;  %v5661_v39 = vld [vmem:[%s9847_s4 + $0x10] sm:$0xff]  ;;  %v5670_v41 = vld [vmem:[%s9847_s4 + $0x58] sm:$0xff] }
 0x3d0   : > { %2515 = vmatpush.bf16.msrb.mxu3 %v2509_v51  ;;  %v5665_v26 = vld [vmem:[%s9847_s4 + $0x30] sm:$0xff] }
 0x3d1   : > { %v5669_v38 = vld [vmem:[%s9847_s4 + $0x50] sm:$0xff] }
 0x3d4   : > { %2516 = vmatpush.bf16.msrb.mxu3 %v2377_v37  ;;  %v5667_v37 = vld [vmem:[%s9847_s4 + $0x40] sm:$0xff] }
 0x3d8   : > { %2517 = vmatpush.bf16.msrb.mxu3 %v2376_v44 }
 0x3dc   : > { %2518 = vmatpush.bf16.msrb.mxu3 %v2375_v29 }
 0x3df   : > { %5415 = vmatmul.msk.bf16.vlgmr.msrb.gmra.mxu3 %vm2459_vm14, %v5659_v50 }
 0x3ef   : > { %5416 = vmatmul.msk.bf16.gmra.mxu3 %vm2459_vm14, %v5660_v48 }
 0x3ff   : > { %5417 = vmatmul.msk.bf16.gmra.mxu3 %vm2459_vm14, %v5661_v39 }
 0x40f   : > { %5418 = vmatmul.msk.bf16.gmra.mxu3 %vm2459_vm14, %v5662_v6 }
 0x41f   : > { %5419 = vmatmul.msk.bf16.gmra.mxu3 %vm2459_vm14, %v5663_v32 }
 0x42f   : > { %5420 = vmatmul.msk.bf16.gmra.mxu3 %vm2459_vm14, %v5664_v52 }
 0x43f   : > { %5421 = vmatmul.msk.bf16.gmra.mxu3 %vm2459_vm14, %v5665_v26 }
 0x44f   : > { %5422 = vmatmul.msk.bf16.gmra.mxu3 %vm2459_vm14, %v5666_v54 }
 0x45f   : > { %5423 = vmatmul.msk.bf16.gmra.mxu3 %vm2459_vm14, %v5667_v37 }
 0x462   : > { %v2520_v51 = vpop.f32.mrf.mxu3 }
 0x46a   : > { %v2522_v62 = vpop.f32.mrf.mxu3 }
 0x46b   : > { %v6391_v35 = vpack.i.bf16 %v2522_v62, %v2520_v51 }
 0x46d   : > { %6392 = vrot.lane.b32.xlu2 %v6391_v35, %s6868_s23 }
 0x46f   : > { %5424 = vmatmul.msk.bf16.gmra.mxu3 %vm2459_vm14, %v5668_v15 }
 0x472   : > { %v2525_v49 = vpop.f32.mrf.mxu3 }
 0x47a   : > { %v2527_v61 = vpop.f32.mrf.mxu3 }
 0x47b   : > { %v6396_v53 = vpack.i.bf16 %v2527_v61, %v2525_v49 }
 0x47d   : > { %6397 = vrot.lane.b32.xlu0 %v6396_v53, %s6868_s23  ;;  %v5671_v53 = vld [vmem:[%s9847_s4 + $0x60] sm:$0xff] }
 0x47f   : > { %5425 = vmatmul.msk.bf16.gmra.mxu3 %vm2459_vm14, %v5669_v38  ;;  %v9919_v38 = vmax.f32 %v8028_v42, 0.0 }
 0x482   : > { %v2530_v18 = vpop.f32.mrf.mxu3 }
 0x48a   : > { %v2532_v56 = vpop.f32.mrf.mxu3 }
 0x48b   : > { %v6406_v63 = vpack.i.bf16 %v2532_v56, %v2530_v18  ;;  %v5672_v56 = vld [vmem:[%s9847_s4 + $0x68] sm:$0xff] }
 0x48d   : > { %6407 = vrot.lane.b32.xlu2 %v6406_v63, %s6868_s23 }
 0x48f   : > { %5426 = vmatmul.msk.bf16.gmra.mxu3 %vm2459_vm14, %v5670_v41 }
 0x492   : > { %v2535_v13 = vpop.f32.mrf.mxu3 }
 0x49a   : > { %v2537_v25 = vpop.f32.mrf.mxu3 }
 0x49b   : > { %v6416_v44 = vpack.i.bf16 %v2537_v25, %v2535_v13 }
 0x49d   : > { %6417 = vrot.lane.b32.xlu1 %v6416_v44, %s6868_s23 }
 0x49f   : > { %5427 = vmatmul.msk.bf16.gmra.mxu3 %vm2459_vm14, %v5671_v53 }
 0x4a2   : > { %v2540_v29 = vpop.f32.mrf.mxu3 }
 0x4aa   : > { %v2542_v57 = vpop.f32.mrf.mxu3 }
 0x4ab   : > { %v6426_v18 = vpack.i.bf16 %v2542_v57, %v2540_v29 }
 0x4af   : > { %5428 = vmatmul.msk.bf16.gmra.mxu3 %vm2459_vm14, %v5672_v56 }
 0x4b2   : > { %v2545_v37 = vpop.f32.mrf.mxu3 }
 0x4ba   : > { %v2547_v63 = vpop.f32.mrf.mxu3 }
 0x4c7   : > { %v6393_v50 = vpop.permute.xlu2 %6392 }
 0x4c8   : > { %v6395_v48 = vunpack.i.h.bf16 %v6393_v50  ;;  %v6394_v39 = vunpack.i.l.bf16 %v6393_v50 }
 0x4ca   : > { %v2729_v6 = vsel %vm2320_vm13, %v2161_v60, %v6395_v48  ;;  %v2728_v32 = vsel %vm2320_vm13, %v2160_v27, %v6394_v39  ;;  %v2550_v48 = vpop.f32.mrf.mxu3 }
 0x4cb   : > { %v2793_v52 = vrot.slane %v2729_v6, 7  ;;  %v2792_v26 = vrot.slane %v2728_v32, 7 }
 0x4cd   : > { %v8325_v51 = vsel %vm614_vm0, %v2793_v52, 0.0  ;;  %v8328_v62 = vsel %vm614_vm0, %v2792_v26, %v2793_v52  ;;  %v8331_v35 = vsel %vm614_vm0, 0.0, %v2792_v26 }
 0x4ce   : > { %v2950_v49 = vrot.slane %v8331_v35, 1  ;;  %v2951_v40 = vrot.slane %v8328_v62, 1  ;;  %v2953_v60 = vrot.slane %v8325_v51, 1 }
 0x4d0   : > { %v8337_v27 = vsel %vm780_vm1, %v2950_v49, %v2951_v40  ;;  %v8340_v54 = vsel %vm780_vm1, %v2951_v40, %v2953_v60 }
 0x4d1   : > { %v6411_v61 = vpack.i.bf16 %v8340_v54, %v8337_v27 }
 0x4d3   : > { %6412 = vrot.lane.b32.xlu0 %v6411_v61, %s6869_s26  ;;  %v9920_v61 = vmax.f32 %v8033_v21, 0.0 }
 0x4db   : > { %6427 = vrot.lane.b32.xlu0 %v6426_v18, %s6868_s23  ;;  %v9921_v18 = vmax.f32 %v8042_v3, 0.0 }
 0x4e7   : > { %v6408_v15 = vpop.permute.xlu2 %6407 }
 0x4e8   : > { %v6410_v13 = vunpack.i.h.bf16 %v6408_v15  ;;  %v6409_v25 = vunpack.i.l.bf16 %v6408_v15  ;;  %v5673_v15 = vld [vmem:[%s9847_s4 + $0x70] sm:$0xff] }
 0x4e9   : > { %5429 = vmatmul.msk.bf16.gmra.mxu3 %vm2459_vm14, %v5673_v15  ;;  %v5706_v15 = vld [vmem:[%s9851_s8 + $0xe8] sm:$0xff] }
 0x4ea   : > { %v2733_v44 = vsel %vm2320_vm13, %v2165_v33, %v6410_v13  ;;  %v2732_v41 = vsel %vm2320_vm13, %v9919_v38, %v6409_v25  ;;  %v2552_v38 = vpop.f32.mrf.mxu3 }
 0x4eb   : > { %v2799_v29 = vrot.slane %v2733_v44, 7  ;;  %v2798_v50 = vrot.slane %v2732_v41, 7 }
 0x4ed   : > { %v8361_v39 = vsel %vm614_vm0, %v2799_v29, 0.0  ;;  %v8364_v6 = vsel %vm614_vm0, %v2798_v50, %v2799_v29  ;;  %v8367_v32 = vsel %vm614_vm0, 0.0, %v2798_v50 }
 0x4ee   : > { %v2960_v16 = vrot.slane %v8367_v32, 1  ;;  %v2961_v33 = vrot.slane %v8364_v6, 1  ;;  %v2963_v42 = vrot.slane %v8361_v39, 1 }
 0x4ef   : > { %v6398_v52 = vpop.permute.xlu0 %6397 }
 0x4f0   : > { %v6400_v26 = vunpack.i.h.bf16 %v6398_v52  ;;  %v6399_v49 = vunpack.i.l.bf16 %v6398_v52  ;;  %v8373_v40 = vsel %vm780_vm1, %v2960_v16, %v2961_v33  ;;  %v8376_v60 = vsel %vm780_vm1, %v2961_v33, %v2963_v42 }
 0x4f1   : > { %v6431_v57 = vpack.i.bf16 %v8376_v60, %v8373_v40  ;;  %v6446_v42 = vpack.i.bf16 %v2552_v38, %v2550_v48  ;;  %v5682_v48 = vld [vmem:[%s9851_s8 + $0x28] sm:$0xff] }
 0x4f2   : > { %v2731_v53 = vsel %vm2320_vm13, %v9920_v61, %v6400_v26  ;;  %v2730_v56 = vsel %vm2320_vm13, %v9921_v18, %v6399_v49  ;;  %v5684_v26 = vld [vmem:[%s9851_s8 + $0x38] sm:$0xff]  ;;  %v5683_v49 = vld [vmem:[%s9851_s8 + $0x30] sm:$0xff]  ;;  %v5681_v61 = vld [vmem:[%s9851_s8 + $0x20] sm:$0xff] }
 0x4f3   : > { %v2796_v13 = vrot.slane %v2731_v53, 7  ;;  %v2795_v25 = vrot.slane %v2730_v56, 7  ;;  %6432 = vrot.lane.b32.xlu1 %v6431_v57, %s6869_s26  ;;  %3903 = vmatpush.bf16.msrb.mxu1 %v5684_v26  ;;  %v6436_v57 = vpack.i.bf16 %v2547_v63, %v2545_v37  ;;  %v6403_v53 = vpop.permute.xlu1 %6402  ;;  %v5708_v18 = vld [vmem:[%s9851_s8 + $0xf8] sm:$0xff]  ;;  %v2555_v56 = vpop.f32.mrf.mxu3  ;;  %v5707_v37 = vld [vmem:[%s9851_s8 + $0xf0] sm:$0xff]  ;;  %v9922_v26 = vmax.f32 %v8004_v28, 0.0 }
 0x4f4   : > { %4170 = vmatpush.bf16.msra.mxu3 %v5708_v18  ;;  %v5680_v63 = vld [vmem:[%s9851_s8 + $0x18] sm:$0xff]  ;;  %v6405_v38 = vunpack.i.h.bf16 %v6403_v53 }
 0x4f5   : > { %v8392_v44 = vsel %vm614_vm0, %v2796_v13, 0.0  ;;  %v8395_v21 = vsel %vm614_vm0, %v2795_v25, %v2796_v13  ;;  %v8398_v3 = vsel %vm614_vm0, 0.0, %v2795_v25  ;;  %v5679_v13 = vld [vmem:[%s9851_s8 + $0x10] sm:$0xff] }
 0x4f6   : > { %v2955_v41 = vrot.slane %v8398_v3, 1  ;;  %v2956_v29 = vrot.slane %v8395_v21, 1  ;;  %v2958_v50 = vrot.slane %v8392_v44, 1 }
 0x4f7   : > { %3904 = vmatpush.bf16.msrb.mxu1 %v5683_v49 }
 0x4f8   : > { %v8404_v16 = vsel %vm780_vm1, %v2955_v41, %v2956_v29  ;;  %v8407_v33 = vsel %vm780_vm1, %v2956_v29, %v2958_v50  ;;  %4171 = vmatpush.bf16.msra.mxu3 %v5707_v37  ;;  %v6404_v41 = vunpack.i.l.bf16 %v6403_v53  ;;  %v5677_v53 = vld [vmem:[%s9851_s8] sm:$0xff] }
 0x4f9   : > { %v6421_v52 = vpack.i.bf16 %v8407_v33, %v8404_v16 }
 0x4fa   : > { %v3473_v37 = vsel %vm3472_vm15, %v6949_v2, %v6404_v41 }
 0x4fb   : > { %6422 = vrot.lane.b32.xlu2 %v6421_v52, %s6869_s26  ;;  %6447 = vrot.lane.b32.xlu1 %v6446_v42, %s6868_s23  ;;  %v5678_v42 = vld [vmem:[%s9851_s8 + $0x8] sm:$0xff]  ;;  %v2557_v52 = vpop.f32.mrf.mxu3 }
 0x4fc   : > { %3905 = vmatpush.bf16.msrb.mxu1 %v5682_v48  ;;  %4172 = vmatpush.bf16.msra.mxu3 %v5706_v15 }
 0x500   : > { %3906 = vmatpush.bf16.msrb.mxu1 %v5681_v61 }
 0x503   : > { %6437 = vrot.lane.b32.xlu2 %v6436_v57, %s6868_s23  ;;  %v9923_v57 = vmax.f32 %v8013_v7, 0.0 }
 0x504   : > { %3907 = vmatpush.bf16.msrb.mxu1 %v5680_v63  ;;  %v3474_v63 = vsel %vm3472_vm15, %v6943_v1, %v6405_v38  ;;  %v8477_v38 = vpop.f32.mrf.mxu3 }
 0x508   : > { %3908 = vmatpush.bf16.msrb.mxu1 %v5679_v13 }
 0x50c   : > { %3909 = vmatpush.bf16.msrb.mxu1 %v5678_v42  ;;  %v6456_v42 = vpack.i.bf16 %v2557_v52, %v2555_v56  ;;  %v5703_v56 = vld [vmem:[%s9851_s8 + $0xd0] sm:$0xff]  ;;  %v5702_v52 = vld [vmem:[%s9851_s8 + $0xc8] sm:$0xff] }
 0x50f   : > { %v6418_v25 = vpop.permute.xlu1 %6417 }
 0x510   : > { %v6420_v29 = vunpack.i.h.bf16 %v6418_v25  ;;  %v6419_v50 = vunpack.i.l.bf16 %v6418_v25  ;;  %3910 = vmatpush.bf16.msrb.mxu1 %v5677_v53 }
 0x512   : > { %v2735_v49 = vsel %vm2320_vm13, %v9922_v26, %v6420_v29  ;;  %v2734_v48 = vsel %vm2320_vm13, %v9923_v57, %v6419_v50  ;;  %v8469_v50 = vpack.c.bf16 %v3474_v63, %v3473_v37  ;;  %v2562_v26 = vpop.f32.mrf.mxu3  ;;  %v5674_v57 = vld [vmem:[%s9847_s4 + $0x78] sm:$0xff] }
 0x513   : > { %v2802_v61 = vrot.slane %v2735_v49, 7  ;;  %v2801_v18 = vrot.slane %v2734_v48, 7  ;;  %v5705_v49 = vld [vmem:[%s9851_s8 + $0xe0] sm:$0xff]  ;;  %5430 = vmatmul.msk.bf16.gmra.mxu3 %vm2459_vm14, %v5674_v57  ;;  %v5704_v48 = vld [vmem:[%s9851_s8 + $0xd8] sm:$0xff] }
 0x514   : > { %9924 = vst [vmem:[#allocation6_spill] sm:$0xff] %v8469_v50  ;;  %3911 = vmatmul.bf16.vlgmr.msrb.gmra.mxu1 %v8469_v50  ;;  %4173 = vmatpush.bf16.msra.mxu3 %v5705_v49  ;;  %v9928_v50 = vmax.f32 %v7995_v55, 0.0 }
 0x515   : > { %v8458_v28 = vsel %vm614_vm0, %v2802_v61, 0.0  ;;  %v8461_v7 = vsel %vm614_vm0, %v2801_v18, %v2802_v61  ;;  %v8464_v15 = vsel %vm614_vm0, 0.0, %v2801_v18  ;;  %v5701_v18 = vld [vmem:[%s9851_s8 + $0xc0] sm:$0xff] }
 0x516   : > { %v2965_v13 = vrot.slane %v8464_v15, 1  ;;  %v2966_v25 = vrot.slane %v8461_v7, 1  ;;  %v2968_v29 = vrot.slane %v8458_v28, 1 }
 0x518   : > { %v8472_v2 = vsel %vm780_vm1, %v2965_v13, %v2966_v25  ;;  %v8475_v1 = vsel %vm780_vm1, %v2966_v25, %v2968_v29  ;;  %4174 = vmatpush.bf16.msra.mxu3 %v5704_v48 }
 0x519   : > { %9925 = vst [vmem:[#allocation7_spill] sm:$0xff] %v8472_v2  ;;  %v6441_v41 = vpack.i.bf16 %v8475_v1, %v8472_v2 }
 0x51a   : > { %9926 = vst [vmem:[#allocation8_spill] sm:$0xff] %v8475_v1  ;;  %v8494_v61 = vpop.f32.mrf.mxu3 }
 0x51b   : > { %6442 = vrot.lane.b32.xlu0 %v6441_v41, %s6869_s26 }
 0x51c   : > { %4175 = vmatpush.bf16.msra.mxu3 %v5703_v56 }
 0x520   : > { %4176 = vmatpush.bf16.msra.mxu3 %v5702_v52  ;;  %v9927_v52 = vmax.f32 %v7978_v22, 0.0 }
 0x522   : > { %v8505_v53 = vpop.f32.mrf.mxu3 }
 0x523   : > { %6457 = vrot.lane.b32.xlu0 %v6456_v42, %s6868_s23 }
 0x524   : > { %4177 = vmatpush.bf16.msra.mxu3 %v5701_v18 }
 0x52a   : > { %v8507_v37 = vpop.f32.mrf.mxu3 }
 0x532   : > { %v8513_v49 = vpop.f32.mrf.mxu3 }
 0x545   : > { %v6413_v63 = vpop.permute.xlu0 %6412 }
 0x546   : > { %v6415_v13 = vunpack.i.h.bf16 %v6413_v63  ;;  %v6414_v25 = vunpack.i.l.bf16 %v6413_v63 }
 0x548   : > { %v3475_v29 = vsel %vm3472_vm15, %v8331_v35, %v6414_v25  ;;  %v3476_v41 = vsel %vm3472_vm15, %v8328_v62, %v6415_v13 }
 0x549   : > { %v3576_v42 = vpack.c.bf16 %v3476_v41, %v3475_v29 }
 0x54b   : > { %3916 = vmatmul.bf16.gmra.mxu1 %v3576_v42 }
 0x54d   : > { %v6428_v57 = vpop.permute.xlu0 %6427 }
 0x54e   : > { %v6430_v48 = vunpack.i.h.bf16 %v6428_v57  ;;  %v6429_v56 = vunpack.i.l.bf16 %v6428_v57  ;;  %v8533_v57 = vpop.f32.mrf.mxu3 }
 0x550   : > { %v2737_v18 = vsel %vm2320_vm13, %v9927_v52, %v6430_v48  ;;  %v2736_v63 = vsel %vm2320_vm13, %v9928_v50, %v6429_v56 }
 0x551   : > { %v2805_v1 = vrot.slane %v2737_v18, 7  ;;  %v2804_v25 = vrot.slane %v2736_v63, 7 }
 0x553   : > { %v8522_v2 = vsel %vm614_vm0, %v2805_v1, 0.0  ;;  %v8525_v13 = vsel %vm614_vm0, %v2804_v25, %v2805_v1  ;;  %v8528_v29 = vsel %vm614_vm0, 0.0, %v2804_v25 }
 0x554   : > { %v2970_v41 = vrot.slane %v8528_v29, 1  ;;  %v2971_v22 = vrot.slane %v8525_v13, 1  ;;  %v2973_v55 = vrot.slane %v8522_v2, 1 }
 0x555   : > { %v6423_v42 = vpop.permute.xlu2 %6422 }
 0x556   : > { %v6425_v50 = vunpack.i.h.bf16 %v6423_v42  ;;  %v6424_v48 = vunpack.i.l.bf16 %v6423_v42  ;;  %v8536_v56 = vsel %vm780_vm1, %v2970_v41, %v2971_v22  ;;  %v8539_v1 = vsel %vm780_vm1, %v2971_v22, %v2973_v55  ;;  %v2577_v34 = vpop.f32.mrf.mxu3 }
 0x557   : > { %9929 = vst [vmem:[#allocation9_spill] sm:$0xff] %v8536_v56  ;;  %v6451_v52 = vpack.i.bf16 %v8539_v1, %v8536_v56  ;;  %v6466_v22 = vpack.i.bf16 %v2562_v26, %v8477_v38  ;;  %v9931_v55 = vmax.f32 %v7960_v20, 0.0 }
 0x558   : > { %9930 = vst [vmem:[#allocation10_spill] sm:$0xff] %v8539_v1  ;;  %v3477_v18 = vsel %vm3472_vm15, %v8398_v3, %v6424_v48  ;;  %v3478_v63 = vsel %vm3472_vm15, %v8395_v21, %v6425_v50  ;;  %v9932_v48 = vmax.f32 %v7982_v58, 0.0 }
 0x559   : > { %v3574_v25 = vpack.c.bf16 %v3478_v63, %v3477_v18  ;;  %6452 = vrot.lane.b32.xlu2 %v6451_v52, %s6869_s26 }
 0x55b   : > { %3921 = vmatmul.bf16.gmra.mxu1 %v3574_v25  ;;  %4178 = vmatmul.bf16.vlgmr.msra.gmra.mxu3 %v3574_v25 }
 0x55d   : > { %v6438_v42 = vpop.permute.xlu2 %6437 }
 0x55e   : > { %v6440_v41 = vunpack.i.h.bf16 %v6438_v42  ;;  %v6439_v43 = vunpack.i.l.bf16 %v6438_v42 }
 0x560   : > { %v2739_v1 = vsel %vm2320_vm13, %v9931_v55, %v6440_v41  ;;  %v2738_v56 = vsel %vm2320_vm13, %v9932_v48, %v6439_v43 }
 0x561   : > { %v2808_v50 = vrot.slane %v2739_v1, 7  ;;  %v2807_v18 = vrot.slane %v2738_v56, 7  ;;  %6467 = vrot.lane.b32.xlu2 %v6466_v22, %s6868_s23 }
 0x563   : > { %v8557_v52 = vsel %vm614_vm0, %v2808_v50, 0.0  ;;  %v8560_v63 = vsel %vm614_vm0, %v2807_v18, %v2808_v50  ;;  %v8563_v38 = vsel %vm614_vm0, 0.0, %v2807_v18  ;;  %v2580_v50 = vpop.f32.mrf.mxu3 }
 0x564   : > { %v2975_v20 = vrot.slane %v8563_v38, 1  ;;  %v2976_v26 = vrot.slane %v8560_v63, 1  ;;  %v2978_v43 = vrot.slane %v8557_v52, 1 }
 0x565   : > { %v6433_v58 = vpop.permute.xlu1 %6432 }
 0x566   : > { %v6435_v1 = vunpack.i.h.bf16 %v6433_v58  ;;  %v6434_v56 = vunpack.i.l.bf16 %v6433_v58  ;;  %v8569_v25 = vsel %vm780_vm1, %v2975_v20, %v2976_v26  ;;  %v8572_v42 = vsel %vm780_vm1, %v2976_v26, %v2978_v43 }
 0x567   : > { %9933 = vst [vmem:[#allocation11_spill] sm:$0xff] %v8569_v25  ;;  %v6461_v41 = vpack.i.bf16 %v8572_v42, %v8569_v25  ;;  %v6476_v26 = vpack.i.bf16 %v8505_v53, %v8494_v61  ;;  %v9935_v43 = vmax.f32 %v7949_v11, 0.0 }
 0x568   : > { %9934 = vst [vmem:[#allocation12_spill] sm:$0xff] %v8572_v42  ;;  %v3479_v22 = vsel %vm3472_vm15, %v8367_v32, %v6434_v56  ;;  %v3480_v55 = vsel %vm3472_vm15, %v8364_v6, %v6435_v1  ;;  %v9936_v56 = vmax.f32 %v7943_v9, 0.0 }
 0x569   : > { %v3579_v48 = vpack.c.bf16 %v3480_v55, %v3479_v22  ;;  %6462 = vrot.lane.b32.xlu1 %v6461_v41, %s6869_s26 }
 0x56b   : > { %3926 = vmatmul.bf16.gmra.mxu1 %v3579_v48  ;;  %4183 = vmatmul.bf16.gmra.mxu3 %v3579_v48  ;;  %v2582_v11 = vpop.f32.mrf.mxu3 }
 0x56d   : > { %v6448_v18 = vpop.permute.xlu1 %6447 }
 0x56e   : > { %v6450_v20 = vunpack.i.h.bf16 %v6448_v18  ;;  %v6449_v58 = vunpack.i.l.bf16 %v6448_v18 }
 0x570   : > { %v2741_v42 = vsel %vm2320_vm13, %v9935_v43, %v6450_v20  ;;  %v2740_v1 = vsel %vm2320_vm13, %v9936_v56, %v6449_v58  ;;  %v6486_v56 = vpack.i.bf16 %v8513_v49, %v8507_v37  ;;  %v6516_v49 = vpack.i.bf16 %v2582_v11, %v2580_v50 }
 0x571   : > { %v2811_v22 = vrot.slane %v2741_v42, 7  ;;  %v2810_v55 = vrot.slane %v2740_v1, 7  ;;  %6477 = vrot.lane.b32.xlu1 %v6476_v26, %s6868_s23  ;;  %v6491_v26 = vpack.i.bf16 %v8328_v62, %v8331_v35  ;;  %v6506_v1 = vpack.i.bf16 %v8395_v21, %v8398_v3 }
 0x573   : > { %v8591_v41 = vsel %vm614_vm0, %v2811_v22, 0.0  ;;  %v8594_v48 = vsel %vm614_vm0, %v2810_v55, %v2811_v22  ;;  %v8597_v61 = vsel %vm614_vm0, 0.0, %v2810_v55  ;;  %v2585_v43 = vpop.f32.mrf.mxu3  ;;  %v6501_v55 = vpack.i.bf16 %v2577_v34, %v8533_v57 }
 0x574   : > { %v2980_v53 = vrot.slane %v8597_v61, 1  ;;  %v2981_v9 = vrot.slane %v8594_v48, 1  ;;  %v2983_v18 = vrot.slane %v8591_v41, 1 }
 0x576   : > { %v8603_v42 = vsel %vm780_vm1, %v2980_v53, %v2981_v9  ;;  %v8606_v20 = vsel %vm780_vm1, %v2981_v9, %v2983_v18  ;;  %v6521_v53 = vpack.i.bf16 %v8364_v6, %v8367_v32 }
 0x577   : > { %9937 = vst [vmem:[#allocation13_spill] sm:$0xff] %v8603_v42  ;;  %v6471_v58 = vpack.i.bf16 %v8606_v20, %v8603_v42 }
 0x578   : > { %9938 = vst [vmem:[#allocation14_spill] sm:$0xff] %v8606_v20 }
 0x579   : > { %6472 = vrot.lane.b32.xlu0 %v6471_v58, %s6869_s26  ;;  %6492 = vrot.lane.b32.xlu1 %v6491_v26, %s6869_s26  ;;  %v6536_v58 = vpack.i.bf16 %v8461_v7, %v8464_v15 }
 0x57b   : > { %v2587_v22 = vpop.f32.mrf.mxu3 }
 0x57c   : > { %v6531_v11 = vpack.i.bf16 %v2587_v22, %v2585_v43 }
 0x581   : > { %6507 = vrot.lane.b32.xlu1 %v6506_v1, %s6869_s26  ;;  %6487 = vrot.lane.b32.xlu0 %v6486_v56, %s6868_s23 }
 0x583   : > { %v2590_v57 = vpop.f32.mrf.mxu3 }
 0x589   : > { %6522 = vrot.lane.b32.xlu1 %v6521_v53, %s6869_s26  ;;  %6502 = vrot.lane.b32.xlu0 %v6501_v55, %s6868_s23  ;;  %v6551_v53 = vpack.i.bf16 %v8525_v13, %v8528_v29 }
 0x58d   : > { %v6443_v9 = vpop.permute.xlu0 %6442 }
 0x58e   : > { %v6445_v18 = vunpack.i.h.bf16 %v6443_v9  ;;  %v6444_v37 = vunpack.i.l.bf16 %v6443_v9  ;;  %v9939_v9 = vmax.f32 %v7956_v45, 0.0 }
 0x590   : > { %v3481_v26 = vsel %vm3472_vm15, %v8464_v15, %v6444_v37  ;;  %v3482_v34 = vsel %vm3472_vm15, %v8461_v7, %v6445_v18  ;;  %v9940_v18 = vmax.f32 %v7946_v59, 0.0 }
 0x591   : > { %6537 = vrot.lane.b32.xlu1 %v6536_v58, %s6869_s26  ;;  %6517 = vrot.lane.b32.xlu0 %v6516_v49, %s6868_s23  ;;  %v3583_v56 = vpack.c.bf16 %v3482_v34, %v3481_v26  ;;  %v2592_v26 = vpop.f32.mrf.mxu3 }
 0x593   : > { %3931 = vmatmul.bf16.gmra.mxu1 %v3583_v56  ;;  %4188 = vmatmul.bf16.gmra.mxu3 %v3583_v56  ;;  %v6546_v56 = vpack.i.bf16 %v2592_v26, %v2590_v57  ;;  %v5692_v57 = vld [vmem:[%s9851_s8 + $0x78] sm:$0xff] }
 0x594   : > { %3992 = vmatpush.bf16.msrb.mxu2 %v5692_v57 }
 0x595   : > { %v6458_v1 = vpop.permute.xlu0 %6457 }
 0x596   : > { %v6460_v55 = vunpack.i.h.bf16 %v6458_v1  ;;  %v6459_v50 = vunpack.i.l.bf16 %v6458_v1 }
 0x598   : > { %v2743_v37 = vsel %vm2320_vm13, %v9939_v9, %v6460_v55  ;;  %v2742_v58 = vsel %vm2320_vm13, %v9940_v18, %v6459_v50 }
 0x599   : > { %v2814_v20 = vrot.slane %v2743_v37, 7  ;;  %v2813_v49 = vrot.slane %v2742_v58, 7  ;;  %6552 = vrot.lane.b32.xlu1 %v6551_v53, %s6869_s26  ;;  %6532 = vrot.lane.b32.xlu0 %v6531_v11, %s6868_s23  ;;  %v6561_v11 = vpack.i.bf16 %v8560_v63, %v8563_v38  ;;  %v5691_v53 = vld [vmem:[%s9851_s8 + $0x70] sm:$0xff] }
 0x59a   : > { %3993 = vmatpush.bf16.msrb.mxu2 %v5691_v53  ;;  %v9944_v53 = vmax.f32 %v8195_v10, 0.0 }
 0x59b   : > { %v8644_v43 = vsel %vm614_vm0, %v2814_v20, 0.0  ;;  %v8647_v22 = vsel %vm614_vm0, %v2813_v49, %v2814_v20  ;;  %v8650_v45 = vsel %vm614_vm0, 0.0, %v2813_v49 }
 0x59c   : > { %v2985_v59 = vrot.slane %v8650_v45, 1  ;;  %v2986_v34 = vrot.slane %v8647_v22, 1  ;;  %v2988_v1 = vrot.slane %v8644_v43, 1 }
 0x59e   : > { %v8656_v55 = vsel %vm780_vm1, %v2985_v59, %v2986_v34  ;;  %v8659_v50 = vsel %vm780_vm1, %v2986_v34, %v2988_v1  ;;  %v5690_v59 = vld [vmem:[%s9851_s8 + $0x68] sm:$0xff] }
 0x59f   : > { %9941 = vst [vmem:[#allocation15_spill] sm:$0xff] %v8656_v55  ;;  %v6481_v20 = vpack.i.bf16 %v8659_v50, %v8656_v55  ;;  %3994 = vmatpush.bf16.msrb.mxu2 %v5690_v59 }
 0x5a0   : > { %9942 = vst [vmem:[#allocation16_spill] sm:$0xff] %v8659_v50 }
 0x5a1   : > { %6547 = vrot.lane.b32.xlu0 %v6546_v56, %s6868_s23  ;;  %6482 = vrot.lane.b32.xlu2 %v6481_v20, %s6869_s26  ;;  %v5689_v20 = vld [vmem:[%s9851_s8 + $0x60] sm:$0xff] }
 0x5a3   : > { %3995 = vmatpush.bf16.msrb.mxu2 %v5689_v20  ;;  %v5687_v20 = vld [vmem:[%s9851_s8 + $0x50] sm:$0xff] }
 0x5a9   : > { %6562 = vrot.lane.b32.xlu0 %v6561_v11, %s6869_s26  ;;  %v9943_v11 = vmax.f32 %v8186_v36, 0.0  ;;  %v5688_v36 = vld [vmem:[%s9851_s8 + $0x58] sm:$0xff] }
 0x5aa   : > { %3996 = vmatpush.bf16.msrb.mxu2 %v5688_v36 }
 0x5ae   : > { %3997 = vmatpush.bf16.msrb.mxu2 %v5687_v20 }
 0x5b3   : > { %v6453_v9 = vpop.permute.xlu2 %6452 }
 0x5b4   : > { %v6455_v37 = vunpack.i.h.bf16 %v6453_v9  ;;  %v6454_v18 = vunpack.i.l.bf16 %v6453_v9 }
 0x5b6   : > { %v3483_v58 = vsel %vm3472_vm15, %v8528_v29, %v6454_v18  ;;  %v3484_v49 = vsel %vm3472_vm15, %v8525_v13, %v6455_v37 }
 0x5b7   : > { %v3587_v26 = vpack.c.bf16 %v3484_v49, %v3483_v58 }
 0x5b9   : > { %3936 = vmatmul.bf16.gmra.mxu1 %v3587_v26  ;;  %4193 = vmatmul.bf16.gmra.mxu3 %v3587_v26 }
 0x5bb   : > { %v6468_v34 = vpop.permute.xlu2 %6467 }
 0x5bc   : > { %v6470_v56 = vunpack.i.h.bf16 %v6468_v34  ;;  %v6469_v1 = vunpack.i.l.bf16 %v6468_v34 }
 0x5be   : > { %v2745_v57 = vsel %vm2320_vm13, %v9943_v11, %v6470_v56  ;;  %v2744_v9 = vsel %vm2320_vm13, %v9944_v53, %v6469_v1  ;;  %v5685_v53 = vld [vmem:[%s9851_s8 + $0x40] sm:$0xff] }
 0x5bf   : > { %v2817_v37 = vrot.slane %v2745_v57, 7  ;;  %v2816_v18 = vrot.slane %v2744_v9, 7  ;;  %v5686_v57 = vld [vmem:[%s9851_s8 + $0x48] sm:$0xff] }
 0x5c0   : > { %3998 = vmatpush.bf16.msrb.mxu2 %v5686_v57  ;;  %v9947_v57 = vmax.f32 %v8167_v47, 0.0 }
 0x5c1   : > { %v8691_v58 = vsel %vm614_vm0, %v2817_v37, 0.0  ;;  %v8694_v49 = vsel %vm614_vm0, %v2816_v18, %v2817_v37  ;;  %v8697_v26 = vsel %vm614_vm0, 0.0, %v2816_v18 }
 0x5c2   : > { %v2993_v10 = vrot.slane %v8691_v58, 1  ;;  %v2990_v59 = vrot.slane %v8697_v26, 1  ;;  %v2991_v34 = vrot.slane %v8694_v49, 1 }
 0x5c4   : > { %v8706_v56 = vsel %vm780_vm1, %v2990_v59, %v2991_v34  ;;  %v8709_v1 = vsel %vm780_vm1, %v2991_v34, %v2993_v10  ;;  %3999 = vmatpush.bf16.msrb.mxu2 %v5685_v53  ;;  %v9948_v53 = vmax.f32 %v8178_v17, 0.0 }
 0x5c5   : > { %9945 = vst [vmem:[#allocation17_spill] sm:$0xff] %v8706_v56  ;;  %v6496_v11 = vpack.i.bf16 %v8709_v1, %v8706_v56 }
 0x5c6   : > { %9946 = vst [vmem:[#allocation18_spill] sm:$0xff] %v8709_v1 }
 0x5c7   : > { %6497 = vrot.lane.b32.xlu2 %v6496_v11, %s6869_s26 }
 0x5db   : > { %v6463_v9 = vpop.permute.xlu1 %6462 }
 0x5dc   : > { %v6465_v37 = vunpack.i.h.bf16 %v6463_v9  ;;  %v6464_v18 = vunpack.i.l.bf16 %v6463_v9 }
 0x5de   : > { %v3485_v36 = vsel %vm3472_vm15, %v8563_v38, %v6464_v18  ;;  %v3486_v10 = vsel %vm3472_vm15, %v8560_v63, %v6465_v37 }
 0x5df   : > { %v3591_v59 = vpack.c.bf16 %v3486_v10, %v3485_v36 }
 0x5e1   : > { %3941 = vmatmul.bf16.gmra.mxu1 %v3591_v59  ;;  %4198 = vmatmul.bf16.gmra.mxu3 %v3591_v59 }
 0x5e3   : > { %v6478_v34 = vpop.permute.xlu1 %6477 }
 0x5e4   : > { %v6480_v20 = vunpack.i.h.bf16 %v6478_v34  ;;  %v6479_v11 = vunpack.i.l.bf16 %v6478_v34 }
 0x5e6   : > { %v2747_v1 = vsel %vm2320_vm13, %v9947_v57, %v6480_v20  ;;  %v2746_v9 = vsel %vm2320_vm13, %v9948_v53, %v6479_v11 }
 0x5e7   : > { %v2820_v56 = vrot.slane %v2747_v1, 7  ;;  %v2819_v50 = vrot.slane %v2746_v9, 7 }
 0x5e9   : > { %v8734_v18 = vsel %vm614_vm0, %v2820_v56, 0.0  ;;  %v8737_v37 = vsel %vm614_vm0, %v2819_v50, %v2820_v56  ;;  %v8740_v36 = vsel %vm614_vm0, 0.0, %v2819_v50 }
 0x5ea   : > { %v2998_v10 = vrot.slane %v8734_v18, 1  ;;  %v2995_v47 = vrot.slane %v8740_v36, 1  ;;  %v2996_v17 = vrot.slane %v8737_v37, 1 }
 0x5eb   : > { %v6473_v59 = vpop.permute.xlu0 %6472  ;;  %v6493_v34 = vpop.permute.xlu1 %6492 }
 0x5ec   : > { %v6475_v20 = vunpack.i.h.bf16 %v6473_v59  ;;  %v6474_v1 = vunpack.i.l.bf16 %v6473_v59  ;;  %v6495_v11 = vunpack.i.h.bf16 %v6493_v34  ;;  %v6494_v57 = vunpack.i.l.bf16 %v6493_v34  ;;  %v5712_v34 = vld [vmem:[%s9851_s8 + $0x118] sm:$0xff] }
 0x5ed   : > { %v8746_v53 = vsel %vm780_vm1, %v2995_v47, %v2996_v17  ;;  %v8749_v56 = vsel %vm780_vm1, %v2996_v17, %v2998_v10  ;;  %4263 = vmatpush.bf16.msra.mxu1 %v5712_v34 }
 0x5ee   : > { %9949 = vst [vmem:[#allocation19_spill] sm:$0xff] %v8746_v53  ;;  %v6511_v50 = vpack.i.bf16 %v8749_v56, %v8746_v53  ;;  %v3487_v9 = vsel %vm3472_vm15, %v8597_v61, %v6474_v1  ;;  %v3488_v55 = vsel %vm3472_vm15, %v8594_v48, %v6475_v20  ;;  %v3505_v59 = vsel %vm3472_vm15, %v6972_v19, %v6494_v57 }
 0x5ef   : > { %9950 = vst [vmem:[#allocation20_spill] sm:$0xff] %v8749_v56  ;;  %v3595_v42 = vpack.c.bf16 %v3488_v55, %v3487_v9  ;;  %v3506_v47 = vsel %vm3472_vm15, %v6983_v24, %v6495_v11  ;;  %v9951_v55 = vmax.f32 %v8155_v30, 0.0  ;;  %v9952_v11 = vmax.f32 %v8163_v0, 0.0 }
 0x5f0   : > { %6512 = vrot.lane.b32.xlu2 %v6511_v50, %s6869_s26  ;;  %v3572_v10 = vpack.c.bf16 %v3506_v47, %v3505_v59  ;;  %v3026_v47 = vrot.slane %v8328_v62, 2 }
 0x5f1   : > { %3946 = vmatmul.bf16.gmra.mxu1 %v3595_v42  ;;  %4203 = vmatmul.bf16.gmra.mxu3 %v3595_v42  ;;  %v3025_v42 = vrot.slane %v8331_v35, 2 }
 0x5f2   : > { %4000 = vmatmul.bf16.vlgmr.msrb.gmra.mxu2 %v3572_v10  ;;  %v3028_v10 = vrot.slane %v8325_v51, 2 }
 0x5f3   : > { %v6488_v17 = vpop.permute.xlu0 %6487  ;;  %v6508_v56 = vpop.permute.xlu1 %6507  ;;  %v8787_v51 = vsel %vm861_vm2, %v3025_v42, %v3026_v47 }
 0x5f4   : > { %v6490_v1 = vunpack.i.h.bf16 %v6488_v17  ;;  %v6489_v20 = vunpack.i.l.bf16 %v6488_v17  ;;  %v6510_v24 = vunpack.i.h.bf16 %v6508_v56  ;;  %v6509_v17 = vunpack.i.l.bf16 %v6508_v56 }
 0x5f5   : > { %v8790_v56 = vsel %vm861_vm2, %v3026_v47, %v3028_v10  ;;  %v9956_v47 = vmax.f32 %v8143_v46, 0.0 }
 0x5f6   : > { %v2749_v57 = vsel %vm2320_vm13, %v9951_v55, %v6490_v1  ;;  %v2748_v50 = vsel %vm2320_vm13, %v9952_v11, %v6489_v20 }
 0x5f7   : > { %v2823_v9 = vrot.slane %v2749_v57, 7  ;;  %v2822_v59 = vrot.slane %v2748_v50, 7  ;;  %v3507_v50 = vsel %vm3472_vm15, %v8787_v51, %v6509_v17 }
 0x5f9   : > { %v8775_v34 = vsel %vm614_vm0, %v2823_v9, 0.0  ;;  %v8778_v30 = vsel %vm614_vm0, %v2822_v59, %v2823_v9  ;;  %v8781_v0 = vsel %vm614_vm0, 0.0, %v2822_v59  ;;  %v3508_v9 = vsel %vm3472_vm15, %v8790_v56, %v6510_v24 }
 0x5fa   : > { %9953 = vst [vmem:[#allocation21_spill] sm:$0xff] %v8775_v34  ;;  %v3003_v1 = vrot.slane %v8775_v34, 1  ;;  %v3000_v35 = vrot.slane %v8781_v0, 1  ;;  %v3001_v62 = vrot.slane %v8778_v30, 1 }
 0x5fb   : > { %v6503_v20 = vpop.permute.xlu0 %6502  ;;  %v6483_v55 = vpop.permute.xlu2 %6482 }
 0x5fc   : > { %v6505_v57 = vunpack.i.h.bf16 %v6503_v20  ;;  %v6504_v11 = vunpack.i.l.bf16 %v6503_v20  ;;  %v6485_v59 = vunpack.i.h.bf16 %v6483_v55  ;;  %v6484_v19 = vunpack.i.l.bf16 %v6483_v55 }
 0x5fd   : > { %v8797_v53 = vsel %vm780_vm1, %v3000_v35, %v3001_v62  ;;  %v8800_v42 = vsel %vm780_vm1, %v3001_v62, %v3003_v1  ;;  %v9957_v20 = vmax.f32 %v8151_v31, 0.0  ;;  %v3577_v62 = vpack.c.bf16 %v3508_v9, %v3507_v50 }
 0x5fe   : > { %9954 = vst [vmem:[#allocation22_spill] sm:$0xff] %v8797_v53  ;;  %v2751_v10 = vsel %vm2320_vm13, %v9956_v47, %v6505_v57  ;;  %v6526_v17 = vpack.i.bf16 %v8800_v42, %v8797_v53  ;;  %v3489_v35 = vsel %vm3472_vm15, %v8650_v45, %v6484_v19  ;;  %v3490_v1 = vsel %vm3472_vm15, %v8647_v22, %v6485_v59  ;;  %v6523_v47 = vpop.permute.xlu1 %6522 }
 0x5ff   : > { %9955 = vst [vmem:[#allocation23_spill] sm:$0xff] %v8800_v42  ;;  %v2750_v25 = vsel %vm2320_vm13, %v9957_v20, %v6504_v11  ;;  %v2826_v24 = vrot.slane %v2751_v10, 7  ;;  %v3599_v46 = vpack.c.bf16 %v3490_v1, %v3489_v35 }
 0x600   : > { %v2825_v34 = vrot.slane %v2750_v25, 7  ;;  %6527 = vrot.lane.b32.xlu2 %v6526_v17, %s6869_s26 }
 0x601   : > { %v8816_v55 = vsel %vm614_vm0, %v2826_v24, 0.0  ;;  %3951 = vmatmul.bf16.gmra.mxu1 %v3599_v46  ;;  %4208 = vmatmul.bf16.gmra.mxu3 %v3599_v46 }
 0x602   : > { %v8819_v31 = vsel %vm614_vm0, %v2825_v34, %v2826_v24  ;;  %v8822_v57 = vsel %vm614_vm0, 0.0, %v2825_v34  ;;  %v3008_v25 = vrot.slane %v8816_v55, 1  ;;  %4005 = vmatmul.bf16.gmra.mxu2 %v3577_v62  ;;  %v9960_v34 = vmax.f32 %v8131_v23, 0.0 }
 0x603   : > { %v3005_v19 = vrot.slane %v8822_v57, 1  ;;  %v6518_v11 = vpop.permute.xlu0 %6517  ;;  %v3006_v59 = vrot.slane %v8819_v31, 1  ;;  %v9961_v24 = vmax.f32 %v8139_v14, 0.0  ;;  %v3033_v23 = vrot.slane %v8392_v44, 2 }
 0x604   : > { %v6520_v50 = vunpack.i.h.bf16 %v6518_v11  ;;  %v6519_v9 = vunpack.i.l.bf16 %v6518_v11  ;;  %v6525_v11 = vunpack.i.h.bf16 %v6523_v47 }
 0x605   : > { %v8828_v10 = vsel %vm780_vm1, %v3005_v19, %v3006_v59  ;;  %v8831_v20 = vsel %vm780_vm1, %v3006_v59, %v3008_v25  ;;  %v3030_v19 = vrot.slane %v8398_v3, 2  ;;  %v3031_v25 = vrot.slane %v8395_v21, 2 }
 0x606   : > { %9958 = vst [vmem:[#allocation24_spill] sm:$0xff] %v8828_v10  ;;  %v2753_v17 = vsel %vm2320_vm13, %v9960_v34, %v6520_v50  ;;  %v2752_v35 = vsel %vm2320_vm13, %v9961_v24, %v6519_v9  ;;  %v6541_v1 = vpack.i.bf16 %v8831_v20, %v8828_v10  ;;  %v6524_v59 = vunpack.i.l.bf16 %v6523_v47 }
 0x607   : > { %9959 = vst [vmem:[#allocation25_spill] sm:$0xff] %v8831_v20  ;;  %v2829_v46 = vrot.slane %v2753_v17, 7  ;;  %v2828_v62 = vrot.slane %v2752_v35, 7  ;;  %v8858_v44 = vsel %vm861_vm2, %v3030_v19, %v3031_v25  ;;  %v8861_v47 = vsel %vm861_vm2, %v3031_v25, %v3033_v23 }
 0x608   : > { %6542 = vrot.lane.b32.xlu2 %v6541_v1, %s6869_s26  ;;  %v3510_v20 = vsel %vm3472_vm15, %v8861_v47, %v6525_v11  ;;  %v9965_v10 = vmax.f32 %v8127_v12, 0.0 }
 0x609   : > { %v8846_v50 = vsel %vm614_vm0, %v2829_v46, 0.0  ;;  %v8849_v14 = vsel %vm614_vm0, %v2828_v62, %v2829_v46  ;;  %v8852_v9 = vsel %vm614_vm0, 0.0, %v2828_v62  ;;  %v3509_v62 = vsel %vm3472_vm15, %v8858_v44, %v6524_v59 }
 0x60a   : > { %v3013_v34 = vrot.slane %v8846_v50, 1  ;;  %v3010_v17 = vrot.slane %v8852_v9, 1  ;;  %v3011_v3 = vrot.slane %v8849_v14, 1  ;;  %v3581_v59 = vpack.c.bf16 %v3510_v20, %v3509_v62  ;;  %v6538_v20 = vpop.permute.xlu1 %6537 }
 0x60b   : > { %v6533_v24 = vpop.permute.xlu0 %6532  ;;  %v6540_v53 = vunpack.i.h.bf16 %v6538_v20 }
 0x60c   : > { %v6535_v21 = vunpack.i.h.bf16 %v6533_v24  ;;  %v6534_v35 = vunpack.i.l.bf16 %v6533_v24  ;;  %v8864_v1 = vsel %vm780_vm1, %v3010_v17, %v3011_v3  ;;  %v8867_v46 = vsel %vm780_vm1, %v3011_v3, %v3013_v34  ;;  %v8881_v17 = vpop.f32.mrf.mxu1 }
 0x60d   : > { %9962 = vst [vmem:[#allocation26_spill] sm:$0xff] %v8864_v1  ;;  %v9964_v24 = vmax.f32 %v8119_v8, 0.0  ;;  %v6556_v23 = vpack.i.bf16 %v8867_v46, %v8864_v1  ;;  %v6571_v1 = vpack.i.bf16 %v8594_v48, %v8597_v61 }
 0x60e   : > { %9963 = vst [vmem:[#allocation27_spill] sm:$0xff] %v8867_v46  ;;  %v2754_v25 = vsel %vm2320_vm13, %v9965_v10, %v6534_v35  ;;  %v9969_v46 = vmax.f32 %v8114_v4, 0.0  ;;  %v3038_v4 = vrot.slane %v8361_v39, 2 }
 0x60f   : > { %v2755_v19 = vsel %vm2320_vm13, %v9964_v24, %v6535_v21  ;;  %v2831_v3 = vrot.slane %v2754_v25, 7 }
 0x610   : > { %v2832_v34 = vrot.slane %v2755_v19, 7  ;;  %6557 = vrot.lane.b32.xlu2 %v6556_v23, %s6869_s26 }
 0x611   : > { %v8891_v12 = vsel %vm614_vm0, 0.0, %v2831_v3 }
 0x612   : > { %v8885_v11 = vsel %vm614_vm0, %v2832_v34, 0.0  ;;  %v8888_v8 = vsel %vm614_vm0, %v2831_v3, %v2832_v34  ;;  %v3015_v21 = vrot.slane %v8891_v12, 1  ;;  %4010 = vmatmul.bf16.gmra.mxu2 %v3581_v59  ;;  %v9968_v34 = vmax.f32 %v8108_v5, 0.0 }
 0x613   : > { %v3018_v10 = vrot.slane %v8885_v11, 1  ;;  %v6548_v35 = vpop.permute.xlu0 %6547  ;;  %v3016_v24 = vrot.slane %v8888_v8, 1  ;;  %v3035_v5 = vrot.slane %v8367_v32, 2 }
 0x614   : > { %v6550_v19 = vunpack.i.h.bf16 %v6548_v35  ;;  %v6549_v25 = vunpack.i.l.bf16 %v6548_v35 }
 0x615   : > { %v8897_v62 = vsel %vm780_vm1, %v3015_v21, %v3016_v24  ;;  %v8900_v23 = vsel %vm780_vm1, %v3016_v24, %v3018_v10  ;;  %v3036_v10 = vrot.slane %v8364_v6, 2  ;;  %v6539_v24 = vunpack.i.l.bf16 %v6538_v20 }
 0x616   : > { %9966 = vst [vmem:[#allocation28_spill] sm:$0xff] %v8897_v62  ;;  %v2757_v3 = vsel %vm2320_vm13, %v9968_v34, %v6550_v19  ;;  %v2756_v59 = vsel %vm2320_vm13, %v9969_v46, %v6549_v25  ;;  %v6566_v35 = vpack.i.bf16 %v8900_v23, %v8897_v62  ;;  %v8917_v46 = vpop.f32.mrf.mxu1 }
 0x617   : > { %9967 = vst [vmem:[#allocation29_spill] sm:$0xff] %v8900_v23  ;;  %v2835_v42 = vrot.slane %v2757_v3, 7  ;;  %v2834_v21 = vrot.slane %v2756_v59, 7  ;;  %v8932_v39 = vsel %vm861_vm2, %v3035_v5, %v3036_v10  ;;  %v8935_v20 = vsel %vm861_vm2, %v3036_v10, %v3038_v4 }
 0x618   : > { %6572 = vrot.lane.b32.xlu2 %v6571_v1, %s6869_s26  ;;  %6567 = vrot.lane.b32.xlu1 %v6566_v35, %s6869_s26  ;;  %v3511_v59 = vsel %vm3472_vm15, %v8932_v39, %v6539_v24  ;;  %v3512_v35 = vsel %vm3472_vm15, %v8935_v20, %v6540_v53  ;;  %v6581_v5 = vpack.i.bf16 %v8647_v22, %v8650_v45 }
 0x619   : > { %v8920_v19 = vsel %vm614_vm0, %v2835_v42, 0.0  ;;  %v8923_v25 = vsel %vm614_vm0, %v2834_v21, %v2835_v42  ;;  %v8926_v34 = vsel %vm614_vm0, 0.0, %v2834_v21  ;;  %v6586_v21 = vpack.i.bf16 %v8790_v56, %v8787_v51 }
 0x61a   : > { %v3023_v1 = vrot.slane %v8920_v19, 1  ;;  %v3020_v32 = vrot.slane %v8926_v34, 1  ;;  %v3021_v6 = vrot.slane %v8923_v25, 1  ;;  %v3585_v4 = vpack.c.bf16 %v3512_v35, %v3511_v59 }
 0x61b   : > { %v3043_v59 = vrot.slane %v8458_v28, 2  ;;  %v3040_v35 = vrot.slane %v8464_v15, 2 }
 0x61c   : > { %v8938_v3 = vsel %vm780_vm1, %v3020_v32, %v3021_v6  ;;  %v8941_v42 = vsel %vm780_vm1, %v3021_v6, %v3023_v1  ;;  %v6553_v6 = vpop.permute.xlu1 %6552 }
 0x61d   : > { %9970 = vst [vmem:[#allocation30_spill] sm:$0xff] %v8938_v3  ;;  %v6576_v10 = vpack.i.bf16 %v8941_v42, %v8938_v3 }
 0x61e   : > { %9971 = vst [vmem:[#allocation31_spill] sm:$0xff] %v8941_v42  ;;  %v8956_v1 = vpop.f32.mrf.mxu1 }
 0x61f   : > { %6577 = vrot.lane.b32.xlu0 %v6576_v10, %s6869_s26  ;;  %v6601_v10 = vpack.i.bf16 %v8737_v37, %v8740_v36 }
 0x620   : > { %6587 = vrot.lane.b32.xlu2 %v6586_v21, %s6869_s26  ;;  %6582 = vrot.lane.b32.xlu1 %v6581_v5, %s6869_s26  ;;  %v6596_v21 = vpack.i.bf16 %v8861_v47, %v8858_v44 }
 0x621   : > { %v6498_v24 = vpop.permute.xlu2 %6497 }
 0x622   : > { %4015 = vmatmul.bf16.gmra.mxu2 %v3585_v4  ;;  %v6500_v53 = vunpack.i.h.bf16 %v6498_v24  ;;  %v6499_v32 = vunpack.i.l.bf16 %v6498_v24  ;;  %v3041_v4 = vrot.slane %v8461_v7, 2  ;;  %v6591_v24 = vpack.i.bf16 %v8694_v49, %v8697_v26  ;;  %v5711_v7 = vld [vmem:[%s9851_s8 + $0x110] sm:$0xff] }
 0x623   : > { %4264 = vmatpush.bf16.msra.mxu1 %v5711_v7  ;;  %v3053_v7 = vrot.slane %v8557_v52, 2 }
 0x624   : > { %v3491_v51 = vsel %vm3472_vm15, %v8697_v26, %v6499_v32  ;;  %v3492_v56 = vsel %vm3472_vm15, %v8694_v49, %v6500_v53  ;;  %v6555_v53 = vunpack.i.h.bf16 %v6553_v6  ;;  %v6554_v32 = vunpack.i.l.bf16 %v6553_v6 }
 0x625   : > { %v3603_v5 = vpack.c.bf16 %v3492_v56, %v3491_v51  ;;  %v8975_v28 = vsel %vm861_vm2, %v3040_v35, %v3041_v4  ;;  %v8978_v15 = vsel %vm861_vm2, %v3041_v4, %v3043_v59  ;;  %v3045_v59 = vrot.slane %v8528_v29, 2 }
 0x626   : > { %v8983_v51 = vpop.f32.mrf.mxu1  ;;  %v3513_v56 = vsel %vm3472_vm15, %v8975_v28, %v6554_v32  ;;  %v3514_v6 = vsel %vm3472_vm15, %v8978_v15, %v6555_v53  ;;  %v6611_v35 = vpack.i.bf16 %v8778_v30, %v8781_v0  ;;  %v6606_v4 = vpack.i.bf16 %v8935_v20, %v8932_v39  ;;  %v2595_v53 = vpop.f32.mrf.mxu3 }
 0x627   : > { %3956 = vmatmul.bf16.gmra.mxu1 %v3603_v5  ;;  %4213 = vmatmul.bf16.gmra.mxu3 %v3603_v5  ;;  %9972 = vst [vmem:[#allocation32_spill] sm:$0xff] %v8983_v51  ;;  %v3048_v5 = vrot.slane %v8522_v2, 2  ;;  %v6563_v32 = vpop.permute.xlu0 %6562 }
 0x628   : > { %6602 = vrot.lane.b32.xlu2 %v6601_v10, %s6869_s26  ;;  %6597 = vrot.lane.b32.xlu1 %v6596_v21, %s6869_s26  ;;  %v6616_v21 = vpack.i.bf16 %v8978_v15, %v8975_v28  ;;  %v3046_v10 = vrot.slane %v8525_v13, 2 }
 0x629   : > { %6592 = vrot.lane.b32.xlu0 %v6591_v24, %s6869_s26  ;;  %v3589_v24 = vpack.c.bf16 %v3514_v6, %v3513_v56  ;;  %v3050_v56 = vrot.slane %v8563_v38, 2 }
 0x62a   : > { %v9002_v2 = vsel %vm861_vm2, %v3045_v59, %v3046_v10  ;;  %v9005_v29 = vsel %vm861_vm2, %v3046_v10, %v3048_v5  ;;  %v3051_v59 = vrot.slane %v8560_v63, 2  ;;  %v6621_v5 = vpack.i.bf16 %v8819_v31, %v8822_v57 }
 0x62b   : > { %v6626_v13 = vpack.i.bf16 %v9005_v29, %v9002_v2  ;;  %v6564_v10 = vunpack.i.l.bf16 %v6563_v32 }
 0x62c   : > { %v9022_v52 = vsel %vm861_vm2, %v3050_v56, %v3051_v59  ;;  %v9025_v38 = vsel %vm861_vm2, %v3051_v59, %v3053_v7  ;;  %v6646_v56 = vpack.i.bf16 %v8888_v8, %v8891_v12  ;;  %v3056_v7 = vrot.slane %v8594_v48, 2 }
 0x62d   : > { %v3515_v63 = vsel %vm3472_vm15, %v9002_v2, %v6564_v10  ;;  %v3063_v59 = vrot.slane %v8644_v43, 2  ;;  %v3060_v10 = vrot.slane %v8650_v45, 2 }
 0x62e   : > { %v9011_v6 = vpop.f32.mrf.mxu1 }
 0x630   : > { %6617 = vrot.lane.b32.xlu2 %v6616_v21, %s6869_s26  ;;  %6612 = vrot.lane.b32.xlu1 %v6611_v35, %s6869_s26  ;;  %v6631_v21 = vpack.i.bf16 %v8849_v14, %v8852_v9  ;;  %v6565_v35 = vunpack.i.h.bf16 %v6563_v32  ;;  %v2597_v32 = vpop.f32.mrf.mxu3 }
 0x631   : > { %6607 = vrot.lane.b32.xlu0 %v6606_v4, %s6869_s26 }
 0x632   : > { %4020 = vmatmul.bf16.gmra.mxu2 %v3589_v24  ;;  %v3516_v4 = vsel %vm3472_vm15, %v9005_v29, %v6565_v35  ;;  %v3058_v24 = vrot.slane %v8591_v41, 2  ;;  %v3061_v35 = vrot.slane %v8647_v22, 2  ;;  %v5699_v22 = vld [vmem:[%s9851_s8 + $0xb0] sm:$0xff] }
 0x633   : > { %v3593_v42 = vpack.c.bf16 %v3516_v4, %v3515_v63  ;;  %v3068_v63 = vrot.slane %v8691_v58, 2  ;;  %v3065_v4 = vrot.slane %v8697_v26, 2  ;;  %v3066_v58 = vrot.slane %v8694_v49, 2 }
 0x634   : > { %v9053_v43 = vsel %vm861_vm2, %v3056_v7, %v3058_v24  ;;  %v9059_v45 = vsel %vm861_vm2, %v3060_v10, %v3061_v35 }
 0x636   : > { %v9041_v41 = vpop.f32.mrf.mxu1 }
 0x637   : > { %9973 = vst [vmem:[#allocation33_spill] sm:$0xff] %v9041_v41 }
 0x638   : > { %6632 = vrot.lane.b32.xlu2 %v6631_v21, %s6869_s26  ;;  %6627 = vrot.lane.b32.xlu1 %v6626_v13, %s6869_s26  ;;  %v6636_v13 = vpack.i.bf16 %v9025_v38, %v9022_v52  ;;  %v3055_v21 = vrot.slane %v8597_v61, 2  ;;  %v5700_v61 = vld [vmem:[%s9851_s8 + $0xb8] sm:$0xff] }
 0x639   : > { %6622 = vrot.lane.b32.xlu0 %v6621_v5, %s6869_s26  ;;  %v6641_v5 = vpack.i.bf16 %v2597_v32, %v2595_v53  ;;  %4081 = vmatpush.bf16.msrb.mxu0 %v5700_v61  ;;  %v9062_v53 = vsel %vm861_vm2, %v3061_v35, %v3063_v59  ;;  %v6656_v32 = vpack.i.bf16 %v8923_v25, %v8926_v34 }
 0x63a   : > { %v9050_v48 = vsel %vm861_vm2, %v3055_v21, %v3056_v7  ;;  %v6661_v24 = vpack.i.bf16 %v9062_v53, %v9059_v45  ;;  %v3073_v21 = vrot.slane %v8734_v18, 2  ;;  %v5697_v18 = vld [vmem:[%s9851_s8 + $0xa0] sm:$0xff]  ;;  %v9094_v61 = vsel %vm861_vm2, %v3065_v4, %v3066_v58 }
 0x63d   : > { %4082 = vmatpush.bf16.msrb.mxu0 %v5699_v22  ;;  %v9097_v22 = vsel %vm861_vm2, %v3066_v58, %v3068_v63  ;;  %v3088_v63 = vrot.slane %v8846_v50, 2 }
 0x63e   : > { %v9082_v7 = vpop.f32.mrf.mxu1  ;;  %v6671_v4 = vpack.i.bf16 %v9097_v22, %v9094_v61 }
 0x640   : > { %6647 = vrot.lane.b32.xlu2 %v6646_v56, %s6869_s26  ;;  %6642 = vrot.lane.b32.xlu1 %v6641_v5, %s6868_s23  ;;  %v3070_v5 = vrot.slane %v8740_v36, 2  ;;  %v3071_v56 = vrot.slane %v8737_v37, 2  ;;  %s413_s23 = scalar_lea.vmem %s9855_s12, %s5650_s25 }
 0x641   : > { %6637 = vrot.lane.b32.xlu0 %v6636_v13, %s6869_s26  ;;  %v5698_v13 = vld [vmem:[%s9851_s8 + $0xa8] sm:$0xff] }
 0x642   : > { %4025 = vmatmul.bf16.gmra.mxu2 %v3593_v42  ;;  %v6651_v42 = vpack.i.bf16 %v9053_v43, %v9050_v48  ;;  %4083 = vmatpush.bf16.msrb.mxu0 %v5698_v13  ;;  %v9088_v35 = vsel %vm861_vm2, %v3070_v5, %v3071_v56  ;;  %v9091_v49 = vsel %vm861_vm2, %v3071_v56, %v3073_v21  ;;  %v3083_v13 = vrot.slane %v8816_v55, 2  ;;  %v5696_v55 = vld [vmem:[%s9851_s8 + $0x98] sm:$0xff] }
 0x643   : > { %v3080_v5 = vrot.slane %v8822_v57, 2  ;;  %v6676_v21 = vpack.i.bf16 %v9091_v49, %v9088_v35  ;;  %v3085_v56 = vrot.slane %v8852_v9, 2 }
 0x646   : > { %4084 = vmatpush.bf16.msrb.mxu0 %v5697_v18  ;;  %v5695_v18 = vld [vmem:[%s9851_s8 + $0x90] sm:$0xff] }
 0x648   : > { %6662 = vrot.lane.b32.xlu2 %v6661_v24, %s6869_s26  ;;  %6657 = vrot.lane.b32.xlu1 %v6656_v32, %s6869_s26 }
 0x649   : > { %6652 = vrot.lane.b32.xlu0 %v6651_v42, %s6869_s26 }
 0x64a   : > { %v6513_v26 = vpop.permute.xlu2 %6512  ;;  %4085 = vmatpush.bf16.msrb.mxu0 %v5696_v55 }
 0x64b   : > { %v6515_v59 = vunpack.i.h.bf16 %v6513_v26  ;;  %v6514_v10 = vunpack.i.l.bf16 %v6513_v26 }
 0x64d   : > { %v3493_v42 = vsel %vm3472_vm15, %v8740_v36, %v6514_v10  ;;  %v3494_v24 = vsel %vm3472_vm15, %v8737_v37, %v6515_v59  ;;  %v3086_v37 = vrot.slane %v8849_v14, 2  ;;  %v3081_v36 = vrot.slane %v8819_v31, 2  ;;  %v9130_v10 = vpop.f32.mrf.mxu1 }
 0x64e   : > { %v3607_v32 = vpack.c.bf16 %v3494_v24, %v3493_v42  ;;  %9974 = vst [vmem:[#allocation34_spill] sm:$0xff] %v9130_v10  ;;  %4086 = vmatpush.bf16.msrb.mxu0 %v5695_v18 }
 0x64f   : > { %v9119_v58 = vsel %vm861_vm2, %v3085_v56, %v3086_v37  ;;  %v9122_v50 = vsel %vm861_vm2, %v3086_v37, %v3088_v63  ;;  %v9125_v26 = vsel %vm861_vm2, %v3080_v5, %v3081_v36  ;;  %v9128_v59 = vsel %vm861_vm2, %v3081_v36, %v3083_v13 }
 0x650   : > { %3961 = vmatmul.bf16.gmra.mxu1 %v3607_v32  ;;  %4218 = vmatmul.bf16.gmra.mxu3 %v3607_v32  ;;  %v6691_v42 = vpack.i.bf16 %v9122_v50, %v9119_v58  ;;  %v6686_v24 = vpack.i.bf16 %v9128_v59, %v9125_v26  ;;  %v3098_v32 = vrot.slane %v8920_v19, 2  ;;  %v3095_v5 = vrot.slane %v8926_v34, 2 }
 0x651   : > { %6677 = vrot.lane.b32.xlu2 %v6676_v21, %s6869_s26  ;;  %6672 = vrot.lane.b32.xlu1 %v6671_v4, %s6869_s26  ;;  %v3096_v13 = vrot.slane %v8923_v25, 2  ;;  %v5694_v21 = vld [vmem:[%s9851_s8 + $0x88] sm:$0xff] }
 0x652   : > { %4087 = vmatpush.bf16.msrb.mxu0 %v5694_v21 }
 0x653   : > { %v9148_v37 = vsel %vm861_vm2, %v3095_v5, %v3096_v13  ;;  %v9151_v19 = vsel %vm861_vm2, %v3096_v13, %v3098_v32 }
 0x654   : > { %v6706_v5 = vpack.i.bf16 %v9151_v19, %v9148_v37 }
 0x655   : > { %v9153_v36 = vpop.f32.mrf.mxu1 }
 0x659   : > { %6692 = vrot.lane.b32.xlu2 %v6691_v42, %s6869_s26  ;;  %6687 = vrot.lane.b32.xlu1 %v6686_v24, %s6869_s26  ;;  %v5693_v42 = vld [vmem:[%s9851_s8 + $0x80] sm:$0xff] }
 0x65a   : > { %v6528_v4 = vpop.permute.xlu2 %6527  ;;  %4088 = vmatpush.bf16.msrb.mxu0 %v5693_v42  ;;  %v5710_v42 = vld [vmem:[%s9851_s8 + $0x108] sm:$0xff] }
 0x65b   : > { %v6530_v63 = vunpack.i.h.bf16 %v6528_v4  ;;  %v6529_v56 = vunpack.i.l.bf16 %v6528_v4  ;;  %4265 = vmatpush.bf16.msra.mxu1 %v5710_v42 }
 0x65d   : > { %v3495_v55 = vsel %vm3472_vm15, %v8781_v0, %v6529_v56  ;;  %v3496_v18 = vsel %vm3472_vm15, %v8778_v30, %v6530_v63  ;;  %v9165_v13 = vpop.f32.mrf.mxu1 }
 0x65e   : > { %v3611_v24 = vpack.c.bf16 %v3496_v18, %v3495_v55  ;;  %9975 = vst [vmem:[#allocation35_spill] sm:$0xff] %v9165_v13 }
 0x660   : > { %3966 = vmatmul.bf16.gmra.mxu1 %v3611_v24  ;;  %4223 = vmatmul.bf16.gmra.mxu3 %v3611_v24 }
 0x661   : > { %6707 = vrot.lane.b32.xlu2 %v6706_v5, %s6869_s26  ;;  %v9179_v5 = vld [vmem:[%s9852_s9] ss:$0 sm:$0xff] }
 0x662   : > { %v6543_v32 = vpop.permute.xlu2 %6542 }
 0x663   : > { %v6545_v21 = vunpack.i.h.bf16 %v6543_v32  ;;  %v6544_v4 = vunpack.i.l.bf16 %v6543_v32 }
 0x665   : > { %v3497_v63 = vsel %vm3472_vm15, %v8822_v57, %v6544_v4  ;;  %v3498_v55 = vsel %vm3472_vm15, %v8819_v31, %v6545_v21  ;;  %v9174_v24 = vpop.f32.mrf.mxu1  ;;  %v3913_v31 = vadd.f32 %v9179_v5, %v8881_v17 }
 0x666   : > { %v3615_v18 = vpack.c.bf16 %v3498_v55, %v3497_v63 }
 0x66a   : > { %v6558_v56 = vpop.permute.xlu2 %6557 }
 0x66b   : > { %v6560_v23 = vunpack.i.h.bf16 %v6558_v56  ;;  %v6559_v62 = vunpack.i.l.bf16 %v6558_v56 }
 0x66d   : > { %v9192_v42 = vpop.f32.mrf.mxu1 }
 0x66e   : > { %9976 = vst [vmem:[#allocation36_spill] sm:$0xff] %v9192_v42 }
 0x670   : > { %3971 = vmatmul.bf16.gmra.mxu1 %v3615_v18  ;;  %4228 = vmatmul.bf16.gmra.mxu3 %v3615_v18  ;;  %v5714_v18 = vld [vmem:[%s9853_s10 + $0x8] sm:$0xff] }
 0x671   : > { %4465 = vmatpush.bf16.msra.mxu2 %v5714_v18  ;;  %v9206_v18 = vpop.f32.mrf.mxu3 }
 0x672   : > { %v6573_v32 = vpop.permute.xlu2 %6572 }
 0x673   : > { %v6575_v57 = vunpack.i.h.bf16 %v6573_v32  ;;  %v6574_v4 = vunpack.i.l.bf16 %v6573_v32 }
 0x675   : > { %v4001_v21 = vpop.f32.mrf.mxu2  ;;  %v3517_v63 = vsel %vm3472_vm15, %v9022_v52, %v6574_v4  ;;  %v3518_v55 = vsel %vm3472_vm15, %v9025_v38, %v6575_v57  ;;  %v3499_v4 = vsel %vm3472_vm15, %v8852_v9, %v6559_v62  ;;  %v3500_v57 = vsel %vm3472_vm15, %v8849_v14, %v6560_v23 }
 0x676   : > { %v9187_v3 = vadd.f32 %v4001_v21, %v3913_v31  ;;  %v3597_v13 = vpack.c.bf16 %v3518_v55, %v3517_v63  ;;  %v3619_v63 = vpack.c.bf16 %v3500_v57, %v3499_v4  ;;  %v9204_v55 = vpop.f32.mrf.mxu1  ;;  %v3918_v14 = vadd.f32 %v9179_v5, %v8956_v1  ;;  %v5709_v1 = vld [vmem:[%s9851_s8 + $0x100] sm:$0xff] }
 0x677   : > { %4266 = vmatpush.bf16.msra.mxu1 %v5709_v1 }
 0x678   : > { %4030 = vmatmul.bf16.gmra.mxu2 %v3597_v13 }
 0x67a   : > { %v6588_v17 = vpop.permute.xlu2 %6587 }
 0x67b   : > { %v6590_v32 = vunpack.i.h.bf16 %v6588_v17  ;;  %v6589_v10 = vunpack.i.l.bf16 %v6588_v17  ;;  %v9214_v17 = vpop.f32.mrf.mxu3 }
 0x67d   : > { %v3538_v56 = vsel %vm3472_vm15, %v8340_v54, %v6590_v32  ;;  %v3537_v13 = vsel %vm3472_vm15, %v8337_v27, %v6589_v10  ;;  %v9202_v31 = vpop.f32.mrf.mxu2 }
 0x67e   : > { %v3573_v21 = vpack.c.bf16 %v3538_v56, %v3537_v13  ;;  %v9212_v23 = vpop.f32.mrf.mxu1 }
 0x67f   : > { %9978 = vst [vmem:[#allocation38_spill] sm:$0xff] %v9212_v23 }
 0x680   : > { %3976 = vmatmul.bf16.gmra.mxu1 %v3619_v63  ;;  %4089 = vmatmul.bf16.vlgmr.msrb.gmra.mxu0 %v3573_v21 }
 0x681   : > { %4233 = vmatmul.bf16.gmra.mxu3 %v3619_v63 }
 0x683   : > { %v9235_v1 = vpop.f32.mrf.mxu3 }
 0x685   : > { %v4006_v9 = vpop.f32.mrf.mxu2 }
 0x686   : > { %v9210_v62 = vadd.f32 %v4006_v9, %v3918_v14  ;;  %v3923_v9 = vadd.f32 %v9179_v5, %v9011_v6 }
 0x688   : > { %9977 = vst [vmem:[#allocation37_spill] sm:$0xff] %v9210_v62 }
 0x68a   : > { %v6568_v54 = vpop.permute.xlu1 %6567 }
 0x68b   : > { %v6570_v27 = vunpack.i.h.bf16 %v6568_v54  ;;  %v6569_v10 = vunpack.i.l.bf16 %v6568_v54  ;;  %v9227_v54 = vpop.f32.mrf.mxu1 }
 0x68d   : > { %v9216_v32 = vpop.f32.mrf.mxu2  ;;  %v3501_v4 = vsel %vm3472_vm15, %v8891_v12, %v6569_v10  ;;  %v3502_v57 = vsel %vm3472_vm15, %v8888_v8, %v6570_v27 }
 0x68e   : > { %9979 = vst [vmem:[#allocation39_spill] sm:$0xff] %v9216_v32  ;;  %v3623_v56 = vpack.c.bf16 %v3502_v57, %v3501_v4 }
 0x690   : > { %3981 = vmatmul.bf16.gmra.mxu1 %v3623_v56 }
 0x691   : > { %4238 = vmatmul.bf16.gmra.mxu3 %v3623_v56  ;;  %v6578_v14 = vpop.permute.xlu0 %6577 }
 0x692   : > { %v6583_v13 = vpop.permute.xlu1 %6582  ;;  %v6580_v56 = vunpack.i.h.bf16 %v6578_v14 }
 0x693   : > { %v6585_v21 = vunpack.i.h.bf16 %v6583_v13  ;;  %v6584_v63 = vunpack.i.l.bf16 %v6583_v13  ;;  %v6579_v13 = vunpack.i.l.bf16 %v6578_v14 }
 0x694   : > { %v3504_v41 = vsel %vm3472_vm15, %v8923_v25, %v6580_v56 }
 0x695   : > { %v4011_v10 = vpop.f32.mrf.mxu2  ;;  %v3519_v27 = vsel %vm3472_vm15, %v9050_v48, %v6584_v63  ;;  %v3520_v23 = vsel %vm3472_vm15, %v9053_v43, %v6585_v21  ;;  %v3503_v6 = vsel %vm3472_vm15, %v8926_v34, %v6579_v13 }
 0x696   : > { %v9233_v4 = vadd.f32 %v4011_v10, %v3923_v9  ;;  %v3601_v57 = vpack.c.bf16 %v3520_v23, %v3519_v27  ;;  %v3627_v21 = vpack.c.bf16 %v3504_v41, %v3503_v6  ;;  %v9247_v9 = vpop.f32.mrf.mxu1 }
 0x697   : > { %9981 = vst [vmem:[#allocation41_spill] sm:$0xff] %v9247_v9 }
 0x698   : > { %9980 = vst [vmem:[#allocation40_spill] sm:$0xff] %v9233_v4  ;;  %4035 = vmatmul.bf16.gmra.mxu2 %v3601_v57  ;;  %v9249_v57 = vpop.f32.mrf.mxu3 }
 0x69a   : > { %v6598_v42 = vpop.permute.xlu1 %6597 }
 0x69b   : > { %v6600_v62 = vunpack.i.h.bf16 %v6598_v42  ;;  %v6599_v63 = vunpack.i.l.bf16 %v6598_v42  ;;  %v6593_v32 = vpop.permute.xlu0 %6592 }
 0x69c   : > { %v6595_v10 = vunpack.i.h.bf16 %v6593_v32  ;;  %v6594_v27 = vunpack.i.l.bf16 %v6593_v32 }
 0x69d   : > { %v9241_v51 = vpop.f32.mrf.mxu2  ;;  %v3539_v23 = vsel %vm3472_vm15, %v8404_v16, %v6599_v63  ;;  %v3540_v14 = vsel %vm3472_vm15, %v8407_v33, %v6600_v62  ;;  %v3928_v33 = vadd.f32 %v9179_v5, %v9082_v7 }
 0x69e   : > { %v3578_v34 = vpack.c.bf16 %v3540_v14, %v3539_v23  ;;  %v3521_v41 = vsel %vm3472_vm15, %v9059_v45, %v6594_v27  ;;  %v3522_v16 = vsel %vm3472_vm15, %v9062_v53, %v6595_v10  ;;  %v9261_v63 = vpop.f32.mrf.mxu1  ;;  %v3575_v27 = vpack.c.bf16 %v8861_v47, %v8858_v44 }
 0x69f   : > { %v3605_v56 = vpack.c.bf16 %v3522_v16, %v3521_v41 }
 0x6a0   : > { %3986 = vmatmul.bf16.gmra.mxu1 %v3627_v21  ;;  %4094 = vmatmul.bf16.gmra.mxu0 %v3578_v34 }
 0x6a1   : > { %4243 = vmatmul.bf16.gmra.mxu3 %v3627_v21  ;;  %v6603_v21 = vpop.permute.xlu2 %6602 }
 0x6a2   : > { %v9251_v25 = vpop.permute.xlu1 %6612  ;;  %v6605_v34 = vunpack.i.h.bf16 %v6603_v21  ;;  %v6604_v41 = vunpack.i.l.bf16 %v6603_v21 }
 0x6a3   : > { %v6608_v42 = vpop.permute.xlu0 %6607 }
 0x6a4   : > { %v6610_v13 = vunpack.i.h.bf16 %v6608_v42  ;;  %v6609_v6 = vunpack.i.l.bf16 %v6608_v42 }
 0x6a5   : > { %v4016_v62 = vpop.f32.mrf.mxu2 }
 0x6a6   : > { %v9259_v32 = vadd.f32 %v4016_v62, %v3928_v33  ;;  %v3541_v14 = vsel %vm3472_vm15, %v8373_v40, %v6609_v6  ;;  %v3542_v10 = vsel %vm3472_vm15, %v8376_v60, %v6610_v13  ;;  %v9274_v33 = vpop.f32.mrf.mxu1  ;;  %v3523_v40 = vsel %vm3472_vm15, %v9094_v61, %v6604_v41  ;;  %v9985_v6 = vld [vmem:[#allocation5_spill] sm:$0xff] }
 0x6a7   : > { %v3582_v16 = vpack.c.bf16 %v3542_v10, %v3541_v14  ;;  %9984 = vst [vmem:[#allocation44_spill] sm:$0xff] %v9274_v33  ;;  %v3524_v60 = vsel %vm3472_vm15, %v9097_v22, %v6605_v34  ;;  %v3933_v62 = vadd.f32 %v9179_v5, %v9153_v36  ;;  %v9986_v21 = vmax.f32 %v9985_v6, 0.0  ;;  %v9987_v10 = vld [vmem:[#allocation4_spill] sm:$0xff] }
 0x6a8   : > { %9982 = vst [vmem:[#allocation42_spill] sm:$0xff] %v9259_v32  ;;  %4040 = vmatmul.bf16.gmra.mxu2 %v3605_v56  ;;  %v3609_v41 = vpack.c.bf16 %v3524_v60, %v3523_v40  ;;  %v9990_v40 = vld [vmem:[#allocation21_spill] sm:$0xff] }
 0x6a9   : > { %v6618_v47 = vpop.permute.xlu2 %6617  ;;  %v3078_v60 = vrot.slane %v9990_v40, 2 }
 0x6aa   : > { %v9263_v23 = vpop.permute.xlu1 %6627  ;;  %v6620_v32 = vunpack.i.h.bf16 %v6618_v47 }
 0x6ad   : > { %v9269_v7 = vpop.f32.mrf.mxu2 }
 0x6ae   : > { %9983 = vst [vmem:[#allocation43_spill] sm:$0xff] %v9269_v7  ;;  %v6619_v7 = vunpack.i.l.bf16 %v6618_v47 }
 0x6b0   : > { %5575 = vmatmul.msk.bf16.vlgmr.msra.gmra.mxu1 %vm3472_vm15, %v3575_v27  ;;  %4099 = vmatmul.bf16.gmra.mxu0 %v3582_v16  ;;  %v9988_v27 = vmax.f32 %v9987_v10, 0.0  ;;  %v3075_v10 = vrot.slane %v8781_v0, 2  ;;  %v3580_v0 = vpack.c.bf16 %v8935_v20, %v8932_v39 }
 0x6b2   : > { %v6643_v42 = vpop.permute.xlu1 %6642 }
 0x6b3   : > { %v6645_v56 = vunpack.i.h.bf16 %v6643_v42  ;;  %v6644_v44 = vunpack.i.l.bf16 %v6643_v42 }
 0x6b5   : > { %v4021_v13 = vpop.f32.mrf.mxu2  ;;  %v2759_v14 = vsel %vm2320_vm13, %v9986_v21, %v6645_v56  ;;  %v2758_v16 = vsel %vm2320_vm13, %v9988_v27, %v6644_v44  ;;  %v9991_v27 = vld [vmem:[#allocation7_spill] sm:$0xff] }
 0x6b6   : > { %v9288_v33 = vadd.f32 %v4021_v13, %v3933_v62  ;;  %v2838_v9 = vrot.slane %v2759_v14, 7  ;;  %v2837_v34 = vrot.slane %v2758_v16, 7  ;;  %v9300_v13 = vpop.f32.mrf.mxu1  ;;  %v3543_v16 = vsel %vm3472_vm15, %v9991_v27, %v6619_v7 }
 0x6b8   : > { %9989 = vst [vmem:[#allocation5_spill] sm:$0xff] %v9288_v33  ;;  %4045 = vmatmul.bf16.gmra.mxu2 %v3609_v41  ;;  %v2919_v36 = vsel %vm614_vm0, %v2838_v9, 0.0  ;;  %v9292_v42 = vsel %vm614_vm0, %v2837_v34, %v2838_v9  ;;  %v9295_v6 = vsel %vm614_vm0, 0.0, %v2837_v34  ;;  %v9992_v41 = vld [vmem:[#allocation8_spill] sm:$0xff] }
 0x6b9   : > { %v3137_v56 = vrot.slane %v2919_v36, 1  ;;  %v3174_v21 = vrot.slane %v2919_v36, 2  ;;  %v3134_v44 = vrot.slane %v9295_v6, 1  ;;  %v3171_v62 = vrot.slane %v9295_v6, 2 }
 0x6ba   : > { %v6666_v47 = vpack.i.bf16 %v9292_v42, %v9295_v6  ;;  %v3135_v14 = vrot.slane %v9292_v42, 1  ;;  %v3172_v9 = vrot.slane %v9292_v42, 2  ;;  %v3544_v34 = vsel %vm3472_vm15, %v9992_v41, %v6620_v32 }
 0x6bb   : > { %v3076_v36 = vrot.slane %v8778_v30, 2  ;;  %v3586_v27 = vpack.c.bf16 %v3544_v34, %v3543_v16 }
 0x6bc   : > { %6667 = vrot.lane.b32.xlu0 %v6666_v47, %s6869_s26  ;;  %v9316_v33 = vsel %vm780_vm1, %v3134_v44, %v3135_v14  ;;  %v9319_v4 = vsel %vm780_vm1, %v3135_v14, %v3137_v56  ;;  %v9326_v32 = vsel %vm861_vm2, %v3171_v62, %v3172_v9  ;;  %v9329_v30 = vsel %vm861_vm2, %v3172_v9, %v3174_v21 }
 0x6bd   : > { %v9313_v40 = vpop.f32.mrf.mxu2  ;;  %v6701_v7 = vpack.i.bf16 %v9319_v4, %v9316_v33  ;;  %v6615_v47 = vunpack.i.h.bf16 %v9251_v25  ;;  %v6614_v44 = vunpack.i.l.bf16 %v9251_v25  ;;  %v9336_v39 = vsel %vm861_vm2, %v3075_v10, %v3076_v36 }
 0x6be   : > { %v9339_v20 = vsel %vm861_vm2, %v3076_v36, %v3078_v60  ;;  %v3093_v14 = vrot.slane %v8885_v11, 2  ;;  %v3090_v9 = vrot.slane %v8891_v12, 2  ;;  %v3938_v60 = vadd.f32 %v9179_v5, %v9174_v24  ;;  %v9354_v16 = vpop.f32.mrf.mxu1 }
 0x6bf   : > { %6702 = vrot.lane.b32.xlu1 %v6701_v7, %s6869_s26  ;;  %v6681_v21 = vpack.i.bf16 %v9339_v20, %v9336_v39  ;;  %v3525_v25 = vsel %vm3472_vm15, %v9088_v35, %v6614_v44  ;;  %v3526_v62 = vsel %vm3472_vm15, %v9091_v49, %v6615_v47  ;;  %v3091_v10 = vrot.slane %v8888_v8, 2  ;;  %9993 = vst [vmem:[#allocation4_spill] sm:$0xff] %v9354_v16  ;;  %v6623_v8 = vpop.permute.xlu0 %6622  ;;  %v9994_v47 = vld [vmem:[#allocation9_spill] sm:$0xff] }
 0x6c0   : > { %5576 = vmatmul.msk.bf16.gmra.mxu1 %vm3472_vm15, %v3580_v0  ;;  %4104 = vmatmul.bf16.gmra.mxu0 %v3586_v27  ;;  %v3613_v36 = vpack.c.bf16 %v3526_v62, %v3525_v25  ;;  %v6630_v0 = vunpack.i.h.bf16 %v9263_v23  ;;  %v6629_v7 = vunpack.i.l.bf16 %v9263_v23  ;;  %v9995_v27 = vld [vmem:[#allocation10_spill] sm:$0xff]  ;;  %v3584_v25 = vpack.c.bf16 %v8978_v15, %v8975_v28 }
 0x6c1   : > { %v9362_v11 = vsel %vm861_vm2, %v3090_v9, %v3091_v10  ;;  %v9365_v12 = vsel %vm861_vm2, %v3091_v10, %v3093_v14  ;;  %v6625_v62 = vunpack.i.h.bf16 %v6623_v8  ;;  %v6624_v14 = vunpack.i.l.bf16 %v6623_v8  ;;  %v6633_v8 = vpop.permute.xlu2 %6632 }
 0x6c2   : > { %v6696_v24 = vpack.i.bf16 %v9365_v12, %v9362_v11  ;;  %v3545_v44 = vsel %vm3472_vm15, %v9994_v47, %v6629_v7 }
 0x6c3   : > { %v3527_v10 = vsel %vm3472_vm15, %v9336_v39, %v6624_v14  ;;  %v6634_v14 = vunpack.i.l.bf16 %v6633_v8 }
 0x6c4   : > { %6682 = vrot.lane.b32.xlu0 %v6681_v21, %s6869_s26  ;;  %v3546_v21 = vsel %vm3472_vm15, %v9995_v27, %v6630_v0 }
 0x6c5   : > { %v4026_v41 = vpop.f32.mrf.mxu2  ;;  %v3590_v9 = vpack.c.bf16 %v3546_v21, %v3545_v44  ;;  %v9998_v44 = vld [vmem:[#allocation12_spill] sm:$0xff] }
 0x6c6   : > { %v9357_v34 = vadd.f32 %v4026_v41, %v3938_v60  ;;  %v6711_v60 = vpack.i.bf16 %v9329_v30, %v9326_v32  ;;  %v3528_v41 = vsel %vm3472_vm15, %v9339_v20, %v6625_v62  ;;  %v6635_v62 = vunpack.i.h.bf16 %v6633_v8 }
 0x6c7   : > { %v3617_v28 = vpack.c.bf16 %v3528_v41, %v3527_v10 }
 0x6c8   : > { %4050 = vmatmul.bf16.gmra.mxu2 %v3613_v36  ;;  %v6638_v36 = vpop.permute.xlu0 %6637  ;;  %v3530_v10 = vsel %vm3472_vm15, %v9128_v59, %v6635_v62 }
 0x6c9   : > { %v6640_v15 = vunpack.i.h.bf16 %v6638_v36  ;;  %v6639_v7 = vunpack.i.l.bf16 %v6638_v36 }
 0x6cb   : > { %v3548_v27 = vsel %vm3472_vm15, %v9998_v44, %v6640_v15 }
 0x6cc   : > { %6697 = vrot.lane.b32.xlu0 %v6696_v24, %s6869_s26  ;;  %v9997_v24 = vld [vmem:[#allocation11_spill] sm:$0xff] }
 0x6cd   : > { %v9374_v23 = vpop.f32.mrf.mxu1  ;;  %v3547_v47 = vsel %vm3472_vm15, %v9997_v24, %v6639_v7  ;;  %v10001_v24 = vld [vmem:[#allocation14_spill] sm:$0xff] }
 0x6d0   : > { %5577 = vmatmul.msk.bf16.gmra.mxu1 %vm3472_vm15, %v3584_v25  ;;  %4109 = vmatmul.bf16.gmra.mxu0 %v3590_v9  ;;  %v3588_v25 = vpack.c.bf16 %v9005_v29, %v9002_v2  ;;  %v3594_v9 = vpack.c.bf16 %v3548_v27, %v3547_v47  ;;  %v6653_v41 = vpop.permute.xlu0 %6652  ;;  %v6648_v2 = vpop.permute.xlu2 %6647  ;;  %v10000_v29 = vld [vmem:[#allocation13_spill] sm:$0xff]  ;;  %v3592_v27 = vpack.c.bf16 %v9025_v38, %v9022_v52  ;;  %v5713_v52 = vld [vmem:[%s9853_s10] sm:$0xff] }
 0x6d1   : > { %v6655_v15 = vunpack.i.h.bf16 %v6653_v41  ;;  %v6654_v7 = vunpack.i.l.bf16 %v6653_v41  ;;  %v6649_v62 = vunpack.i.l.bf16 %v6648_v2  ;;  %4466 = vmatpush.bf16.msra.mxu2 %v5713_v52 }
 0x6d3   : > { %v3549_v8 = vsel %vm3472_vm15, %v10000_v29, %v6654_v7  ;;  %v3550_v47 = vsel %vm3472_vm15, %v10001_v24, %v6655_v15  ;;  %v6658_v29 = vpop.permute.xlu1 %6657 }
 0x6d4   : > { %6712 = vrot.lane.b32.xlu0 %v6711_v60, %s6869_s26  ;;  %v3529_v60 = vsel %vm3472_vm15, %v9125_v26, %v6634_v14  ;;  %v3598_v14 = vpack.c.bf16 %v3550_v47, %v3549_v8  ;;  %v10003_v47 = vld [vmem:[#allocation15_spill] sm:$0xff] }
 0x6d5   : > { %v9386_v0 = vpop.f32.mrf.mxu1 }
 0x6d6   : > { %9996 = vst [vmem:[#allocation21_spill] sm:$0xff] %v9386_v0 }
 0x6d8   : > { %4055 = vmatmul.bf16.gmra.mxu2 %v3617_v28  ;;  %v3621_v28 = vpack.c.bf16 %v3530_v10, %v3529_v60  ;;  %v3531_v60 = vsel %vm3472_vm15, %v9119_v58, %v6649_v62  ;;  %v6663_v41 = vpop.permute.xlu2 %6662 }
 0x6d9   : > { %v6665_v38 = vunpack.i.h.bf16 %v6663_v41  ;;  %v6664_v7 = vunpack.i.l.bf16 %v6663_v41  ;;  %v6659_v41 = vunpack.i.l.bf16 %v6658_v29 }
 0x6dd   : > { %v9392_v21 = vpop.f32.mrf.mxu1 }
 0x6e0   : > { %5578 = vmatmul.msk.bf16.gmra.mxu1 %vm3472_vm15, %v3588_v25  ;;  %4114 = vmatmul.bf16.gmra.mxu0 %v3594_v9  ;;  %v6650_v25 = vunpack.i.h.bf16 %v6648_v2  ;;  %v9412_v9 = vpop.f32.mrf.mxu2  ;;  %v3943_v2 = vadd.f32 %v9179_v5, %v9204_v55  ;;  %v3533_v55 = vsel %vm3472_vm15, %v9362_v11, %v6659_v41 }
 0x6e2   : > { %v3532_v10 = vsel %vm3472_vm15, %v9122_v50, %v6650_v25  ;;  %v10004_v25 = vld [vmem:[#allocation16_spill] sm:$0xff] }
 0x6e3   : > { %v3625_v15 = vpack.c.bf16 %v3532_v10, %v3531_v60  ;;  %v3552_v62 = vsel %vm3472_vm15, %v10004_v25, %v6665_v38  ;;  %v3596_v60 = vpack.c.bf16 %v9053_v43, %v9050_v48  ;;  %v6660_v10 = vunpack.i.h.bf16 %v6658_v29  ;;  %v10006_v43 = vld [vmem:[#allocation17_spill] sm:$0xff] }
 0x6e5   : > { %v9401_v36 = vpop.f32.mrf.mxu1  ;;  %v3534_v52 = vsel %vm3472_vm15, %v9365_v12, %v6660_v10 }
 0x6e6   : > { %9999 = vst [vmem:[#allocation7_spill] sm:$0xff] %v9401_v36  ;;  %v3629_v38 = vpack.c.bf16 %v3534_v52, %v3533_v55 }
 0x6e8   : > { %4060 = vmatmul.bf16.gmra.mxu2 %v3621_v28 }
 0x6ed   : > { %v9407_v44 = vpop.f32.mrf.mxu1 }
 0x6f0   : > { %5579 = vmatmul.msk.bf16.gmra.mxu1 %vm3472_vm15, %v3592_v27  ;;  %4119 = vmatmul.bf16.gmra.mxu0 %v3598_v14  ;;  %v3551_v27 = vsel %vm3472_vm15, %v10003_v47, %v6664_v7  ;;  %v6673_v7 = vpop.permute.xlu1 %6672 }
 0x6f1   : > { %v6674_v47 = vunpack.i.l.bf16 %v6673_v7 }
 0x6f3   : > { %v3553_v29 = vsel %vm3472_vm15, %v10006_v43, %v6674_v47 }
 0x6f5   : > { %v9418_v28 = vpop.f32.mrf.mxu1 }
 0x6f6   : > { %10002 = vst [vmem:[#allocation8_spill] sm:$0xff] %v9418_v28 }
 0x6f8   : > { %4065 = vmatmul.bf16.gmra.mxu2 %v3625_v15  ;;  %v3602_v15 = vpack.c.bf16 %v3552_v62, %v3551_v27  ;;  %v10007_v27 = vld [vmem:[#allocation18_spill] sm:$0xff] }
 0x6fb   : > { %v4031_v8 = vpop.f32.mrf.mxu2 }
 0x6fc   : > { %v9425_v24 = vadd.f32 %v4031_v8, %v3943_v2  ;;  %v6675_v8 = vunpack.i.h.bf16 %v6673_v7 }
 0x6fd   : > { %v9431_v14 = vpop.f32.mrf.mxu1  ;;  %v4090_v48 = vpop.f32.mrf.mxu0 }
 0x6fe   : > { %v3554_v25 = vsel %vm3472_vm15, %v10007_v27, %v6675_v8  ;;  %v3948_v8 = vadd.f32 %v9179_v5, %v9227_v54  ;;  %v10009_v27 = vld [vmem:[#allocation19_spill] sm:$0xff] }
 0x6ff   : > { %v3606_v10 = vpack.c.bf16 %v3554_v25, %v3553_v29 }
 0x700   : > { %5580 = vmatmul.msk.bf16.gmra.mxu1 %vm3472_vm15, %v3596_v60  ;;  %4124 = vmatmul.bf16.gmra.mxu0 %v3602_v15  ;;  %v3600_v60 = vpack.c.bf16 %v9062_v53, %v9059_v45  ;;  %v6678_v15 = vpop.permute.xlu2 %6677  ;;  %v10010_v53 = vld [vmem:[#allocation20_spill] sm:$0xff] }
 0x701   : > { %v6680_v7 = vunpack.i.h.bf16 %v6678_v15 }
 0x703   : > { %v9451_v41 = vpop.f32.mrf.mxu2  ;;  %v3556_v29 = vsel %vm3472_vm15, %v10010_v53, %v6680_v7  ;;  %v3953_v7 = vadd.f32 %v9179_v5, %v9261_v63 }
 0x705   : > { %v9440_v2 = vpop.f32.mrf.mxu1  ;;  %v4092_v52 = vpop.f32.mrf.mxu0 }
 0x706   : > { %10005 = vst [vmem:[#allocation9_spill] sm:$0xff] %v9440_v2  ;;  %v3915_v2 = vadd.f32 %v9179_v5, %v8917_v46 }
 0x708   : > { %4070 = vmatmul.bf16.gmra.mxu2 %v3629_v38  ;;  %v6679_v38 = vunpack.i.l.bf16 %v6678_v15  ;;  %v9469_v15 = vpop.f32.mrf.mxu3  ;;  %v4004_v36 = vadd.f32 %v9202_v31, %v3915_v2 }
 0x70a   : > { %v3555_v45 = vsel %vm3472_vm15, %v10009_v27, %v6679_v38  ;;  %v9480_v27 = vpop.permute.xlu1 %6687 }
 0x70b   : > { %v3610_v56 = vpack.c.bf16 %v3556_v29, %v3555_v45 }
 0x70d   : > { %v9446_v62 = vpop.f32.mrf.mxu1 }
 0x710   : > { %5581 = vmatmul.msk.bf16.gmra.mxu1 %vm3472_vm15, %v3600_v60  ;;  %4129 = vmatmul.bf16.gmra.mxu0 %v3606_v10  ;;  %v3604_v10 = vpack.c.bf16 %v9097_v22, %v9094_v61 }
 0x715   : > { %v9453_v55 = vpop.f32.mrf.mxu1 }
 0x716   : > { %10008 = vst [vmem:[#allocation10_spill] sm:$0xff] %v9453_v55 }
 0x71b   : > { %v4036_v47 = vpop.f32.mrf.mxu2 }
 0x71c   : > { %v9457_v43 = vadd.f32 %v4036_v47, %v3948_v8  ;;  %v9476_v47 = vpop.f32.mrf.mxu3 }
 0x71d   : > { %v9463_v25 = vpop.f32.mrf.mxu1  ;;  %v9465_v60 = vpop.f32.mrf.mxu0 }
 0x720   : > { %5582 = vmatmul.msk.bf16.gmra.mxu1 %vm3472_vm15, %v3604_v10  ;;  %4134 = vmatmul.bf16.gmra.mxu0 %v3610_v56  ;;  %v3608_v56 = vpack.c.bf16 %v9091_v49, %v9088_v35 }
 0x723   : > { %v9472_v54 = vpop.f32.mrf.mxu2 }
 0x724   : > { %v9491_v63 = vpop.f32.mrf.mxu3 }
 0x725   : > { %v9474_v8 = vpop.f32.mrf.mxu1  ;;  %v4097_v38 = vpop.f32.mrf.mxu0 }
 0x726   : > { %10011 = vst [vmem:[#allocation11_spill] sm:$0xff] %v9474_v8 }
 0x72b   : > { %v4041_v53 = vpop.f32.mrf.mxu2 }
 0x72c   : > { %v9482_v61 = vadd.f32 %v4041_v53, %v3953_v7 }
 0x72d   : > { %v4268_v22 = vpop.f32.mrf.mxu1  ;;  %v9484_v45 = vpop.f32.mrf.mxu0 }
 0x72e   : > { %10012 = vst [vmem:[#allocation12_spill] sm:$0xff] %v9482_v61  ;;  %v6668_v29 = vpop.permute.xlu0 %6667 }
 0x72f   : > { %v6670_v10 = vunpack.i.h.bf16 %v6668_v29  ;;  %v6669_v55 = vunpack.i.l.bf16 %v6668_v29 }
 0x730   : > { %5583 = vmatmul.msk.bf16.gmra.mxu1 %vm3472_vm15, %v3608_v56  ;;  %v4093_v56 = vadd.f32 %v4092_v52, %v4004_v36  ;;  %v3958_v36 = vadd.f32 %v9179_v5, %v9300_v13  ;;  %v10013_v52 = vld [vmem:[#allocation22_spill] sm:$0xff]  ;;  %v3612_v13 = vpack.c.bf16 %v9339_v20, %v9336_v39 }
 0x731   : > { %v6703_v28 = vpop.permute.xlu1 %6702  ;;  %v3535_v7 = vsel %vm3472_vm15, %v9148_v37, %v6669_v55  ;;  %v3536_v53 = vsel %vm3472_vm15, %v9151_v19, %v6670_v10  ;;  %v4091_v10 = vadd.f32 %v4090_v48, %v9187_v3 }
 0x732   : > { %v6705_v35 = vunpack.i.h.bf16 %v6703_v28  ;;  %v6704_v49 = vunpack.i.l.bf16 %v6703_v28  ;;  %v3633_v29 = vpack.c.bf16 %v3536_v53, %v3535_v7  ;;  %v4182_v7 = vadd.f32 %v9214_v17, %v4093_v56  ;;  %v10014_v53 = vld [vmem:[#allocation23_spill] sm:$0xff] }
 0x733   : > { %v9498_v0 = vpop.f32.mrf.mxu2 }
 0x734   : > { %4075 = vmatmul.bf16.gmra.mxu2 %v3633_v29  ;;  %v3569_v46 = vsel %vm3472_vm15, %v9295_v6, %v6704_v49  ;;  %v3570_v8 = vsel %vm3472_vm15, %v9292_v42, %v6705_v35  ;;  %v9514_v35 = vpop.f32.mrf.mxu3 }
 0x735   : > { %v4270_v16 = vpop.f32.mrf.mxu1  ;;  %v9504_v55 = vpop.f32.mrf.mxu0  ;;  %v3631_v61 = vpack.c.bf16 %v3570_v8, %v3569_v46  ;;  %v4180_v8 = vadd.f32 %v9206_v18, %v4091_v10  ;;  %v10016_v10 = vld [vmem:[#allocation39_spill] sm:$0xff] }
 0x736   : > { %v6683_v31 = vpop.permute.xlu0 %6682  ;;  %v4271_v3 = vadd.f32 %v4270_v16, %v4182_v7 }
 0x737   : > { %v6685_v2 = vunpack.i.h.bf16 %v6683_v31  ;;  %v6684_v28 = vunpack.i.l.bf16 %v6683_v31  ;;  %4248 = vmatmul.bf16.gmra.mxu3 %v3631_v61  ;;  %v4269_v61 = vadd.f32 %v4268_v22, %v4180_v8  ;;  %v10015_v31 = vld [vmem:[#allocation32_spill] sm:$0xff]  ;;  %v10018_v8 = vld [vmem:[#allocation6_spill] sm:$0xff] }
 0x738   : > { %v4349_v46 = vmax.f32 %v4271_v3, 0.0  ;;  %v10019_v3 = vld [vmem:[#allocation24_spill] sm:$0xff] }
 0x739   : > { %v3557_v6 = vsel %vm3472_vm15, %v10013_v52, %v6684_v28  ;;  %v3558_v42 = vsel %vm3472_vm15, %v10014_v53, %v6685_v2  ;;  %v3920_v2 = vadd.f32 %v9179_v5, %v10015_v31  ;;  %v4348_v18 = vmax.f32 %v4269_v61, 0.0  ;;  %v10017_v53 = vld [vmem:[#allocation37_spill] sm:$0xff] }
 0x73a   : > { %v3614_v49 = vpack.c.bf16 %v3558_v42, %v3557_v6  ;;  %v6689_v52 = vunpack.i.l.bf16 %v9480_v27  ;;  %v4096_v42 = vadd.f32 %v9465_v60, %v10017_v53 }
 0x73b   : > { %v4046_v48 = vpop.f32.mrf.mxu2  ;;  %v4009_v28 = vadd.f32 %v10016_v10, %v3920_v2  ;;  %v4380_v7 = vpack.c.bf16 %v4349_v46, %v4348_v18 }
 0x73c   : > { %v9517_v29 = vadd.f32 %v4046_v48, %v3958_v36  ;;  %4139 = vmatmul.bf16.gmra.mxu0 %v3614_v49  ;;  %v9526_v16 = vpop.f32.mrf.mxu3  ;;  %v6690_v36 = vunpack.i.h.bf16 %v9480_v27  ;;  %v3559_v48 = vsel %vm3472_vm15, %v10019_v3, %v6689_v52  ;;  %v10020_v49 = vld [vmem:[#allocation25_spill] sm:$0xff]  ;;  %v4185_v27 = vadd.f32 %v9235_v1, %v4096_v42  ;;  %v6693_v52 = vpop.permute.xlu2 %6692 }
 0x73d   : > { %v4273_v17 = vpop.f32.mrf.mxu1  ;;  %v9519_v56 = vpop.f32.mrf.mxu0  ;;  %v4098_v6 = vadd.f32 %v4097_v38, %v4009_v28  ;;  %v3963_v38 = vadd.f32 %v9179_v5, %v9374_v23  ;;  %v10021_v23 = vld [vmem:[#allocation33_spill] sm:$0xff] }
 0x73e   : > { %v3560_v61 = vsel %vm3472_vm15, %v10020_v49, %v6690_v36  ;;  %v4274_v10 = vadd.f32 %v4273_v17, %v4185_v27  ;;  %v3925_v1 = vadd.f32 %v9179_v5, %v10021_v23  ;;  %v6695_v17 = vunpack.i.h.bf16 %v6693_v52  ;;  %v10022_v49 = vld [vmem:[#allocation40_spill] sm:$0xff] }
 0x73f   : > { %v3618_v2 = vpack.c.bf16 %v3560_v61, %v3559_v48  ;;  %v4101_v61 = vadd.f32 %v9484_v45, %v10022_v49 }
 0x740   : > { %5584 = vmatmul.msk.bf16.gmra.mxu1 %vm3472_vm15, %v3612_v13  ;;  %v4187_v13 = vadd.f32 %v9249_v57, %v4098_v6  ;;  %v3616_v57 = vpack.c.bf16 %v9128_v59, %v9125_v26  ;;  %v4350_v6 = vmax.f32 %v4274_v10, 0.0 }
 0x743   : > { %v9529_v22 = vpop.f32.mrf.mxu2 }
 0x744   : > { %5599 = vmatmul.msk.bf16.vlgmr.msra.gmra.mxu2 %vm2320_vm13, %v4380_v7  ;;  %v9547_v60 = vpop.f32.mrf.mxu3 }
 0x745   : > { %v4275_v39 = vpop.f32.mrf.mxu1  ;;  %v4107_v20 = vpop.f32.mrf.mxu0 }
 0x746   : > { %v4276_v46 = vadd.f32 %v4275_v39, %v4187_v13  ;;  %v4014_v39 = vadd.f32 %v9241_v51, %v3925_v1  ;;  %v10023_v13 = vld [vmem:[#allocation26_spill] sm:$0xff]  ;;  %v10024_v51 = vld [vmem:[#allocation27_spill] sm:$0xff] }
 0x747   : > { %4253 = vmatmul.bf16.gmra.mxu3 %v10018_v8  ;;  %v6694_v8 = vunpack.i.l.bf16 %v6693_v52  ;;  %v3562_v27 = vsel %vm3472_vm15, %v10024_v51, %v6695_v17  ;;  %v3620_v52 = vpack.c.bf16 %v9122_v50, %v9119_v58  ;;  %v10026_v17 = vld [vmem:[#allocation43_spill] sm:$0xff]  ;;  %v10028_v51 = vld [vmem:[#allocation28_spill] sm:$0xff] }
 0x748   : > { %v4351_v36 = vmax.f32 %v4276_v46, 0.0  ;;  %v4103_v3 = vadd.f32 %v9504_v55, %v4014_v39  ;;  %v3968_v55 = vadd.f32 %v9179_v5, %v9392_v21  ;;  %v6698_v39 = vpop.permute.xlu0 %6697 }
 0x749   : > { %v6699_v49 = vunpack.i.l.bf16 %v6698_v39 }
 0x74a   : > { %v4381_v53 = vpack.c.bf16 %v4351_v36, %v4350_v6  ;;  %v4192_v46 = vadd.f32 %v9476_v47, %v4103_v3  ;;  %v10025_v47 = vld [vmem:[#allocation34_spill] sm:$0xff] }
 0x74b   : > { %v4051_v31 = vpop.f32.mrf.mxu2  ;;  %v3930_v21 = vadd.f32 %v9179_v5, %v10025_v47 }
 0x74c   : > { %v9545_v18 = vadd.f32 %v4051_v31, %v3963_v38  ;;  %4144 = vmatmul.bf16.gmra.mxu0 %v3618_v2  ;;  %v9561_v48 = vpop.f32.mrf.mxu3  ;;  %v3561_v38 = vsel %vm3472_vm15, %v10023_v13, %v6694_v8  ;;  %v4190_v31 = vadd.f32 %v9469_v15, %v4101_v61  ;;  %v10027_v13 = vld [vmem:[#allocation42_spill] sm:$0xff] }
 0x74d   : > { %v4278_v28 = vpop.f32.mrf.mxu1  ;;  %v9549_v7 = vpop.f32.mrf.mxu0  ;;  %v4019_v8 = vadd.f32 %v10026_v17, %v3930_v21 }
 0x74e   : > { %v4279_v23 = vadd.f32 %v4278_v28, %v4190_v31 }
 0x74f   : > { %v4108_v61 = vadd.f32 %v4107_v20, %v4019_v8 }
 0x750   : > { %5585 = vmatmul.msk.bf16.gmra.mxu1 %vm3472_vm15, %v3616_v57  ;;  %v3622_v57 = vpack.c.bf16 %v3562_v27, %v3561_v38  ;;  %v4106_v38 = vadd.f32 %v9519_v56, %v10027_v13  ;;  %v3563_v27 = vsel %vm3472_vm15, %v10028_v51, %v6699_v49  ;;  %v10031_v13 = vld [vmem:[#allocation5_spill] sm:$0xff]  ;;  %v10032_v51 = vld [vmem:[#allocation30_spill] sm:$0xff] }
 0x751   : > { %v4197_v31 = vadd.f32 %v9514_v35, %v4108_v61  ;;  %v3624_v35 = vpack.c.bf16 %v9365_v12, %v9362_v11 }
 0x752   : > { %v4195_v20 = vadd.f32 %v9491_v63, %v4106_v38  ;;  %v6708_v63 = vpop.permute.xlu2 %6707  ;;  %v4111_v38 = vadd.f32 %v9549_v7, %v10031_v13  ;;  %v3983_v13 = vadd.f32 %v9179_v5, %v9446_v62 }
 0x753   : > { %v9557_v42 = vpop.f32.mrf.mxu2  ;;  %v6709_v49 = vunpack.i.l.bf16 %v6708_v63 }
 0x754   : > { %5600 = vmatmul.msk.bf16.gmra.mxu2 %vm2320_vm13, %v4381_v53  ;;  %v9582_v15 = vpop.f32.mrf.mxu3  ;;  %v4352_v53 = vmax.f32 %v4279_v23, 0.0 }
 0x755   : > { %v4280_v26 = vpop.f32.mrf.mxu1  ;;  %v4112_v59 = vpop.f32.mrf.mxu0 }
 0x756   : > { %v4281_v2 = vadd.f32 %v4280_v26, %v4192_v46  ;;  %v6700_v26 = vunpack.i.h.bf16 %v6698_v39  ;;  %v10029_v46 = vld [vmem:[#allocation29_spill] sm:$0xff] }
 0x758   : > { %v4353_v6 = vmax.f32 %v4281_v2, 0.0  ;;  %v3973_v2 = vadd.f32 %v9179_v5, %v9407_v44  ;;  %v10030_v44 = vld [vmem:[#allocation35_spill] sm:$0xff] }
 0x75a   : > { %v4382_v28 = vpack.c.bf16 %v4353_v6, %v4352_v53  ;;  %v3935_v53 = vadd.f32 %v9179_v5, %v10030_v44  ;;  %v6713_v44 = vpop.permute.xlu0 %6712 }
 0x75b   : > { %v4056_v10 = vpop.f32.mrf.mxu2 }
 0x75c   : > { %v9573_v36 = vadd.f32 %v4056_v10, %v3968_v55  ;;  %4149 = vmatmul.bf16.gmra.mxu0 %v3622_v57  ;;  %v3564_v55 = vsel %vm3472_vm15, %v10029_v46, %v6700_v26  ;;  %v9597_v10 = vpop.f32.mrf.mxu3  ;;  %v4024_v8 = vadd.f32 %v9313_v40, %v3935_v53  ;;  %v10033_v46 = vld [vmem:[#allocation31_spill] sm:$0xff] }
 0x75d   : > { %v4283_v45 = vpop.f32.mrf.mxu1  ;;  %v9575_v1 = vpop.f32.mrf.mxu0 }
 0x75e   : > { %v4284_v56 = vadd.f32 %v4283_v45, %v4195_v20  ;;  %v6710_v45 = vunpack.i.h.bf16 %v6708_v63 }
 0x760   : > { %5586 = vmatmul.msk.bf16.gmra.mxu1 %vm3472_vm15, %v3620_v52  ;;  %v3626_v52 = vpack.c.bf16 %v3564_v55, %v3563_v27  ;;  %v4354_v17 = vmax.f32 %v4284_v56, 0.0  ;;  %v3565_v27 = vsel %vm3472_vm15, %v10032_v51, %v6709_v49  ;;  %v3566_v40 = vsel %vm3472_vm15, %v10033_v46, %v6710_v45 }
 0x761   : > { %v4116_v49 = vadd.f32 %v9575_v1, %v9357_v34 }
 0x763   : > { %v9585_v3 = vpop.f32.mrf.mxu2 }
 0x764   : > { %5601 = vmatmul.msk.bf16.gmra.mxu2 %vm2320_vm13, %v4382_v28  ;;  %v4211_v61 = vpop.f32.mrf.mxu3 }
 0x765   : > { %v4285_v58 = vpop.f32.mrf.mxu1  ;;  %v4117_v50 = vpop.f32.mrf.mxu0 }
 0x766   : > { %v4286_v57 = vadd.f32 %v4285_v58, %v4197_v31  ;;  %v4113_v58 = vadd.f32 %v4112_v59, %v4024_v8  ;;  %v3978_v31 = vadd.f32 %v9179_v5, %v9431_v14  ;;  %v4200_v59 = vadd.f32 %v9526_v16, %v4111_v38  ;;  %v10034_v14 = vld [vmem:[#allocation36_spill] sm:$0xff] }
 0x767   : > { %v3940_v16 = vadd.f32 %v9179_v5, %v10034_v14  ;;  %v10038_v14 = vld [vmem:[#allocation3_spill] sm:$0xff] }
 0x768   : > { %v4355_v39 = vmax.f32 %v4286_v57, 0.0  ;;  %v4202_v55 = vadd.f32 %v9547_v60, %v4113_v58  ;;  %v3630_v57 = vpack.c.bf16 %v3566_v40, %v3565_v27 }
 0x769   : > { %v4029_v63 = vadd.f32 %v9412_v9, %v3940_v16 }
 0x76a   : > { %v4383_v28 = vpack.c.bf16 %v4355_v39, %v4354_v17 }
 0x76b   : > { %v4061_v23 = vpop.f32.mrf.mxu2  ;;  %v4118_v45 = vadd.f32 %v4117_v50, %v4029_v63  ;;  %v4205_v50 = vadd.f32 %v9561_v48, %v4116_v49 }
 0x76c   : > { %v9600_v6 = vadd.f32 %v4061_v23, %v3973_v2  ;;  %4154 = vmatmul.bf16.gmra.mxu0 %v3626_v52  ;;  %v9625_v52 = vpop.f32.mrf.mxu3 }
 0x76d   : > { %v4288_v47 = vpop.f32.mrf.mxu1  ;;  %v9602_v21 = vpop.f32.mrf.mxu0  ;;  %v4207_v9 = vadd.f32 %v9582_v15, %v4118_v45  ;;  %v10036_v15 = vld [vmem:[#allocation38_spill] sm:$0xff] }
 0x76e   : > { %v4289_v7 = vadd.f32 %v4288_v47, %v4200_v59  ;;  %v6715_v47 = vunpack.i.h.bf16 %v6713_v44  ;;  %v3945_v62 = vadd.f32 %v9179_v5, %v10036_v15 }
 0x770   : > { %5587 = vmatmul.msk.bf16.gmra.mxu1 %vm3472_vm15, %v3624_v35  ;;  %v3628_v35 = vpack.c.bf16 %v9151_v19, %v9148_v37  ;;  %v4356_v53 = vmax.f32 %v4289_v7, 0.0  ;;  %v4034_v48 = vadd.f32 %v9451_v41, %v3945_v62  ;;  %v4121_v7 = vadd.f32 %v9602_v21, %v9425_v24 }
 0x773   : > { %v9610_v26 = vpop.f32.mrf.mxu2 }
 0x774   : > { %5602 = vmatmul.msk.bf16.gmra.mxu2 %vm2320_vm13, %v4383_v28  ;;  %v6714_v28 = vunpack.i.l.bf16 %v6713_v44  ;;  %v4216_v19 = vpop.f32.mrf.mxu3 }
 0x775   : > { %v4290_v11 = vpop.f32.mrf.mxu1  ;;  %v4122_v12 = vpop.f32.mrf.mxu0 }
 0x776   : > { %v4291_v2 = vadd.f32 %v4290_v11, %v4202_v55  ;;  %v3567_v58 = vsel %vm3472_vm15, %v9316_v33, %v6714_v28  ;;  %v3568_v11 = vsel %vm3472_vm15, %v9319_v4, %v6715_v47  ;;  %v10035_v4 = vpack.c.bf16 %v9329_v30, %v9326_v32 }
 0x777   : > { %v3634_v46 = vpack.c.bf16 %v3568_v11, %v3567_v58  ;;  %v4210_v32 = vadd.f32 %v9597_v10, %v4121_v7 }
 0x778   : > { %v4357_v39 = vmax.f32 %v4291_v2, 0.0 }
 0x77a   : > { %v4384_v17 = vpack.c.bf16 %v4357_v39, %v4356_v53  ;;  %v10037_v39 = vld [vmem:[#allocation2_spill] sm:$0xff] }
 0x77b   : > { %v4066_v20 = vpop.f32.mrf.mxu2  ;;  %v3635_v16 = vpack.c.bf16 %v10038_v14, %v10037_v39  ;;  %v10043_v14 = vld [vmem:[#allocation4_spill] sm:$0xff] }
 0x77c   : > { %v9623_v23 = vadd.f32 %v4066_v20, %v3978_v31  ;;  %4159 = vmatmul.bf16.gmra.mxu0 %v3630_v57  ;;  %v4219_v33 = vpop.f32.mrf.mxu3  ;;  %v4123_v20 = vadd.f32 %v4122_v12, %v4034_v48  ;;  %v10039_v12 = vld [vmem:[#allocation41_spill] sm:$0xff] }
 0x77d   : > { %v4293_v56 = vpop.f32.mrf.mxu1  ;;  %v4125_v60 = vpop.f32.mrf.mxu0 }
 0x77e   : > { %v4294_v34 = vadd.f32 %v4293_v56, %v4205_v50  ;;  %v4126_v45 = vadd.f32 %v4125_v60, %v9457_v43 }
 0x780   : > { %5588 = vmatmul.msk.bf16.gmra.mxu1 %vm3472_vm15, %v3628_v35  ;;  %v4358_v31 = vmax.f32 %v4294_v34, 0.0  ;;  %v4212_v35 = vadd.f32 %v4211_v61, %v4123_v20  ;;  %v4215_v58 = vadd.f32 %v9625_v52, %v4126_v45 }
 0x783   : > { %v9633_v8 = vpop.f32.mrf.mxu2 }
 0x784   : > { %5603 = vmatmul.msk.bf16.gmra.mxu2 %vm2320_vm13, %v4384_v17  ;;  %v4221_v56 = vpop.f32.mrf.mxu3  ;;  %v3950_v17 = vadd.f32 %v9179_v5, %v10039_v12  ;;  %v9695_v12 = vld [vmem:[%s9854_s11] ss:$0 sm:$0xff] }
 0x785   : > { %v4295_v37 = vpop.f32.mrf.mxu1  ;;  %v4127_v38 = vpop.f32.mrf.mxu0 }
 0x786   : > { %v4296_v51 = vadd.f32 %v4295_v37, %v4207_v9  ;;  %v4039_v24 = vadd.f32 %v9472_v54, %v3950_v17  ;;  %v9673_v54 = vld [vmem:[%s9852_s9] ss:$0 sm:$0xff] }
 0x788   : > { %v4359_v55 = vmax.f32 %v4296_v51, 0.0  ;;  %v4128_v61 = vadd.f32 %v4127_v38, %v4039_v24  ;;  %v10040_v38 = vld [vmem:[#allocation44_spill] sm:$0xff] }
 0x78a   : > { %v4385_v59 = vpack.c.bf16 %v4359_v55, %v4358_v31  ;;  %v4217_v49 = vadd.f32 %v4216_v19, %v4128_v61  ;;  %v3988_v55 = vadd.f32 %v9673_v54, %v9463_v25 }
 0x78b   : > { %v4071_v27 = vpop.f32.mrf.mxu2 }
 0x78c   : > { %v9646_v40 = vadd.f32 %v4071_v27, %v3983_v13  ;;  %4164 = vmatmul.bf16.gmra.mxu0 %v3634_v46  ;;  %v4224_v28 = vpop.f32.mrf.mxu3  ;;  %v3955_v27 = vadd.f32 %v9673_v54, %v10040_v38 }
 0x78d   : > { %v4298_v1 = vpop.f32.mrf.mxu1  ;;  %v4130_v2 = vpop.f32.mrf.mxu0 }
 0x78e   : > { %v4299_v44 = vadd.f32 %v4298_v1, %v4210_v32  ;;  %v4044_v19 = vadd.f32 %v9498_v0, %v3955_v27 }
 0x790   : > { %5589 = vmatmul.msk.bf16.gmra.mxu1 %vm3472_vm15, %v10035_v4  ;;  %v4360_v47 = vmax.f32 %v4299_v44, 0.0  ;;  %v10041_v4 = vld [vmem:[#allocation12_spill] sm:$0xff] }
 0x791   : > { %v4131_v15 = vadd.f32 %v4130_v2, %v10041_v4 }
 0x793   : > { %v9668_v51 = vpop.f32.mrf.mxu2  ;;  %v4220_v20 = vadd.f32 %v4219_v33, %v4131_v15 }
 0x794   : > { %5604 = vmatmul.msk.bf16.gmra.mxu2 %vm2320_vm13, %v4385_v59  ;;  %v4226_v9 = vpop.f32.mrf.mxu3 }
 0x795   : > { %v4300_v57 = vpop.f32.mrf.mxu1  ;;  %v4132_v41 = vpop.f32.mrf.mxu0 }
 0x796   : > { %v4301_v30 = vadd.f32 %v4300_v57, %v4212_v35  ;;  %v4133_v46 = vadd.f32 %v4132_v41, %v4044_v19  ;;  %v10042_v35 = vld [vmem:[#allocation11_spill] sm:$0xff] }
 0x797   : > { %v3990_v32 = vadd.f32 %v9673_v54, %v10042_v35 }
 0x798   : > { %v4361_v63 = vmax.f32 %v4301_v30, 0.0  ;;  %v4222_v31 = vadd.f32 %v4221_v56, %v4133_v46 }
 0x79a   : > { %v4386_v21 = vpack.c.bf16 %v4361_v63, %v4360_v47 }
 0x79c   : > { %v4229_v1 = vpop.f32.mrf.mxu3 }
 0x79d   : > { %v4303_v53 = vpop.f32.mrf.mxu1  ;;  %v4135_v37 = vpop.f32.mrf.mxu0 }
 0x79e   : > { %v4304_v13 = vadd.f32 %v4303_v53, %v4215_v58  ;;  %v4136_v17 = vadd.f32 %v4135_v37, %v9517_v29  ;;  %v10044_v58 = vld [vmem:[#allocation21_spill] sm:$0xff] }
 0x7a0   : > { %5590 = vmatmul.msk.bf16.gmra.mxu1 %vm3472_vm15, %v3635_v16  ;;  %v4362_v43 = vmax.f32 %v4304_v13, 0.0  ;;  %v3960_v16 = vadd.f32 %v9673_v54, %v10043_v14  ;;  %v4225_v45 = vadd.f32 %v4224_v28, %v4136_v17 }
 0x7a2   : > { %v4049_v53 = vadd.f32 %v9529_v22, %v3960_v16 }
 0x7a4   : > { %5605 = vmatmul.msk.bf16.gmra.mxu2 %vm2320_vm13, %v4386_v21  ;;  %v4231_v25 = vpop.f32.mrf.mxu3 }
 0x7a5   : > { %v4305_v10 = vpop.f32.mrf.mxu1  ;;  %v4137_v60 = vpop.f32.mrf.mxu0 }
 0x7a6   : > { %v4306_v11 = vadd.f32 %v4305_v10, %v4217_v49  ;;  %v4138_v33 = vadd.f32 %v4137_v60, %v4049_v53 }
 0x7a8   : > { %v4363_v5 = vmax.f32 %v4306_v11, 0.0  ;;  %v4227_v24 = vadd.f32 %v4226_v9, %v4138_v33  ;;  %v3965_v11 = vadd.f32 %v9673_v54, %v10044_v58 }
 0x7aa   : > { %v4387_v52 = vpack.c.bf16 %v4363_v5, %v4362_v43  ;;  %v4054_v5 = vadd.f32 %v9557_v42, %v3965_v11 }
 0x7ac   : > { %v4234_v10 = vpop.f32.mrf.mxu3 }
 0x7ad   : > { %v4308_v50 = vpop.f32.mrf.mxu1 }
 0x7ae   : > { %v4309_v7 = vadd.f32 %v4308_v50, %v4220_v20 }
 0x7b0   : > { %v4364_v44 = vmax.f32 %v4309_v7, 0.0 }
 0x7b4   : > { %5606 = vmatmul.msk.bf16.gmra.mxu2 %vm2320_vm13, %v4387_v52  ;;  %v4236_v15 = vpop.f32.mrf.mxu3 }
 0x7b5   : > { %v4310_v34 = vpop.f32.mrf.mxu1 }
 0x7b6   : > { %v4311_v57 = vadd.f32 %v4310_v34, %v4222_v31 }
 0x7b7   : > { %v4076_v62 = vpop.f32.mrf.mxu2 }
 0x7b8   : > { %v9682_v48 = vadd.f32 %v4076_v62, %v3988_v55  ;;  %v4365_v30 = vmax.f32 %v4311_v57, 0.0 }
 0x7b9   : > { %v4140_v59 = vpop.f32.mrf.mxu0 }
 0x7ba   : > { %v4388_v41 = vpack.c.bf16 %v4365_v30, %v4364_v44  ;;  %v4141_v38 = vadd.f32 %v4140_v59, %v9545_v18 }
 0x7bc   : > { %v4230_v60 = vadd.f32 %v4229_v1, %v4141_v38 }
 0x7bd   : > { %v4313_v0 = vpop.f32.mrf.mxu1 }
 0x7be   : > { %v4314_v13 = vadd.f32 %v4313_v0, %v4225_v45 }
 0x7bf   : > { %v4078_v39 = vpop.f32.mrf.mxu2 }
 0x7c0   : > { %v9688_v2 = vadd.f32 %v4078_v39, %v3990_v32  ;;  %v4366_v27 = vmax.f32 %v4314_v13, 0.0  ;;  %v10045_v32 = vld [vmem:[#allocation7_spill] sm:$0xff] }
 0x7c1   : > { %v4142_v56 = vpop.f32.mrf.mxu0  ;;  %v3970_v30 = vadd.f32 %v9673_v54, %v10045_v32 }
 0x7c2   : > { %v4143_v37 = vadd.f32 %v4142_v56, %v4054_v5  ;;  %v9715_v56 = vpop.f32.mrf.mxu3 }
 0x7c4   : > { %5607 = vmatmul.msk.bf16.gmra.mxu2 %vm2320_vm13, %v4388_v41  ;;  %v4232_v4 = vadd.f32 %v4231_v25, %v4143_v37  ;;  %v4059_v25 = vadd.f32 %v9585_v3, %v3970_v30 }
 0x7c5   : > { %v4315_v63 = vpop.f32.mrf.mxu1 }
 0x7c6   : > { %v4316_v22 = vadd.f32 %v4315_v63, %v4227_v24 }
 0x7c7   : > { %v4468_v47 = vpop.f32.mrf.mxu2 }
 0x7c8   : > { %v4469_v21 = vadd.f32 %v9695_v12, %v4468_v47  ;;  %v4367_v29 = vmax.f32 %v4316_v22, 0.0 }
 0x7c9   : > { %v4145_v61 = vpop.f32.mrf.mxu0 }
 0x7ca   : > { %v5615_v49 = vmul.f32 -1.442695, %v4469_v21  ;;  %v4389_v52 = vpack.c.bf16 %v4367_v29, %v4366_v27  ;;  %v4146_v44 = vadd.f32 %v4145_v61, %v9573_v36 }
 0x7cc   : > { %6720 = vpow2.f32 %v5615_v49  ;;  %v4235_v21 = vadd.f32 %v4234_v10, %v4146_v44 }
 0x7cd   : > { %v4318_v50 = vpop.f32.mrf.mxu1 }
 0x7ce   : > { %v4319_v55 = vadd.f32 %v4318_v50, %v4230_v60 }
 0x7cf   : > { %v4470_v9 = vpop.f32.mrf.mxu2 }
 0x7d0   : > { %v4471_v43 = vadd.f32 %v9695_v12, %v4470_v9  ;;  %v4368_v62 = vmax.f32 %v4319_v55, 0.0 }
 0x7d1   : > { %v4147_v28 = vpop.f32.mrf.mxu0 }
 0x7d2   : > { %v6721_v19 = vpop.eup %6720  ;;  %v5616_v46 = vmul.f32 -1.442695, %v4471_v43  ;;  %v4148_v41 = vadd.f32 %v4147_v28, %v4059_v25  ;;  %v4241_v28 = vpop.f32.mrf.mxu3 }
 0x7d3   : > { %v4644_v34 = vadd.f32 1.0, %v6721_v19 }
 0x7d4   : > { %6722 = vpow2.f32 %v5616_v46  ;;  %5608 = vmatmul.msk.bf16.gmra.mxu2 %vm2320_vm13, %v4389_v52  ;;  %v4237_v11 = vadd.f32 %v4236_v15, %v4148_v41 }
 0x7d5   : > { %v4320_v42 = vpop.f32.mrf.mxu1  ;;  %6724 = vrcp.f32 %v4644_v34  ;;  %v4687_v63 = vand.u32 2147483648, %v4644_v34  ;;  %v4685_v24 = vand.u32 2147483647, %v4644_v34  ;;  %vm4681_vm1 = vweird.f32 %v4644_v34 }
 0x7d6   : > { %v4321_v18 = vadd.f32 %v4320_v42, %v4232_v4 }
 0x7d7   : > { %v4473_v59 = vpop.f32.mrf.mxu2  ;;  %v4688_v13 = vor.u32 1.1754944e-38, %v4687_v63  ;;  %vm4686_vm3 = vcmp.eq.f32.partialorder %v4685_v24, 8.507059e+37 }
 0x7d8   : > { %v4369_v31 = vmax.f32 %v4321_v18, 0.0  ;;  %v4474_v20 = vadd.f32 %v9695_v12, %v4473_v59 }
 0x7d9   : > { %v9706_v57 = vpop.f32.mrf.mxu0 }
 0x7da   : > { %v4390_v1 = vpack.c.bf16 %v4369_v31, %v4368_v62  ;;  %v6723_v7 = vpop.eup %6722  ;;  %v5617_v0 = vmul.f32 -1.442695, %v4474_v20  ;;  %v10046_v62 = vld [vmem:[#allocation8_spill] sm:$0xff]  ;;  %v4151_v32 = vadd.f32 %v9706_v57, %v9600_v6  ;;  %v4244_v63 = vpop.f32.mrf.mxu3 }
 0x7db   : > { %v6725_v35 = vpop.eup %6724  ;;  %v9710_v39 = vadd.f32 1.0, %v6723_v7  ;;  %v3975_v31 = vadd.f32 %v9673_v54, %v10046_v62 }
 0x7dc   : > { %6726 = vpow2.f32 %v5617_v0  ;;  %v4677_v16 = vmul.f32 %v6725_v35, %v4644_v34  ;;  %vm4682_vm0 = vweird.f32 %v6725_v35 }
 0x7dd   : > { %v4323_v14 = vpop.f32.mrf.mxu1  ;;  %6728 = vrcp.f32 %v9710_v39  ;;  %vm4683_vm2 = vmor %vm4681_vm1, %vm4682_vm0  ;;  %v4702_v60 = vand.u32 2147483648, %v9710_v39  ;;  %v4700_v46 = vand.u32 2147483647, %v9710_v39  ;;  %vm4696_vm5 = vweird.f32 %v9710_v39 }
 0x7de   : > { %v4678_v53 = vsub.f32 1.0, %v4677_v16  ;;  %v4324_v58 = vadd.f32 %v4323_v14, %v4235_v21 }
 0x7df   : > { %v4475_v33 = vpop.f32.mrf.mxu2  ;;  %v4703_v20 = vor.u32 1.1754944e-38, %v4702_v60  ;;  %vm4701_vm7 = vcmp.eq.f32.partialorder %v4700_v46, 8.507059e+37 }
 0x7e0   : > { %v4476_v17 = vadd.f32 %v9695_v12, %v4475_v33  ;;  %v4679_v47 = vmul.f32 %v6725_v35, %v4678_v53  ;;  %v4370_v9 = vmax.f32 %v4324_v58, 0.0 }
 0x7e1   : > { %v4152_v45 = vpop.f32.mrf.mxu0 }
 0x7e2   : > { %v6727_v22 = vpop.eup %6726  ;;  %v5618_v49 = vmul.f32 -1.442695, %v4476_v17  ;;  %v4680_v3 = vadd.f32 %v6725_v35, %v4679_v47 }
 0x7e3   : > { %v6729_v36 = vpop.eup %6728  ;;  %v9718_v61 = vadd.f32 1.0, %v6727_v22 }
 0x7e4   : > { %6730 = vpow2.f32 %v5618_v49  ;;  %5609 = vmatmul.msk.bf16.gmra.mxu2 %vm2320_vm13, %v4390_v1  ;;  %v4684_v5 = vsel %vm4683_vm2, %v6725_v35, %v4680_v3  ;;  %v4692_v10 = vmul.f32 %v6729_v36, %v9710_v39  ;;  %vm4697_vm4 = vweird.f32 %v6729_v36 }
 0x7e5   : > { %v4325_v50 = vpop.f32.mrf.mxu1  ;;  %6732 = vrcp.f32 %v9718_v61  ;;  %v4689_v29 = vsel %vm4686_vm3, %v4688_v13, %v4684_v5  ;;  %vm4698_vm6 = vmor %vm4696_vm5, %vm4697_vm4  ;;  %v4064_v35 = vadd.f32 %v9610_v26, %v3975_v31  ;;  %v4717_v25 = vand.u32 2147483648, %v9718_v61 }
 0x7e6   : > { %v4326_v38 = vadd.f32 %v4325_v50, %v4237_v11  ;;  %5156 = vxpose.xlu1.b32.start [1/16] (narrow) %v4689_v29, 8  ;;  %v4693_v37 = vsub.f32 1.0, %v4692_v10  ;;  %v4715_v41 = vand.u32 2147483647, %v9718_v61  ;;  %v4240_v26 = vadd.f32 %v9715_v56, %v4151_v32 }
 0x7e7   : > { %v4478_v43 = vpop.f32.mrf.mxu2  ;;  %v4153_v14 = vadd.f32 %v4152_v45, %v4064_v35  ;;  %vm4711_vm9 = vweird.f32 %v9718_v61  ;;  %v4718_v45 = vor.u32 1.1754944e-38, %v4717_v25 }
 0x7e8   : > { %v4371_v27 = vmax.f32 %v4326_v38, 0.0  ;;  %v4479_v19 = vadd.f32 %v9695_v12, %v4478_v43  ;;  %v4694_v52 = vmul.f32 %v6729_v36, %v4693_v37  ;;  %vm4716_vm11 = vcmp.eq.f32.partialorder %v4715_v41, 8.507059e+37 }
 0x7e9   : > { %v9726_v15 = vpop.f32.mrf.mxu0  ;;  %v4242_v21 = vadd.f32 %v4241_v28, %v4153_v14  ;;  %v10047_v28 = vld [vmem:[#allocation9_spill] sm:$0xff] }
 0x7ea   : > { %v4391_v34 = vpack.c.bf16 %v4371_v27, %v4370_v9  ;;  %v6731_v55 = vpop.eup %6730  ;;  %v5619_v4 = vmul.f32 -1.442695, %v4479_v19  ;;  %v4695_v42 = vadd.f32 %v6729_v36, %v4694_v52  ;;  %v3980_v19 = vadd.f32 %v9673_v54, %v10047_v28 }
 0x7eb   : > { %v6733_v18 = vpop.eup %6732  ;;  %v9731_v59 = vadd.f32 1.0, %v6731_v55  ;;  %v4156_v62 = vadd.f32 %v9726_v15, %v9623_v23 }
 0x7ec   : > { %6734 = vpow2.f32 %v5619_v4  ;;  %v4699_v7 = vsel %vm4698_vm6, %v6729_v36, %v4695_v42  ;;  %v4707_v0 = vmul.f32 %v6733_v18, %v9718_v61  ;;  %vm4712_vm8 = vweird.f32 %v6733_v18 }
 0x7ed   : > { %v4328_v1 = vpop.f32.mrf.mxu1  ;;  %6736 = vrcp.f32 %v9731_v59  ;;  %v4704_v30 = vsel %vm4701_vm7, %v4703_v20, %v4699_v7  ;;  %vm4713_vm10 = vmor %vm4711_vm9, %vm4712_vm8  ;;  %v4732_v5 = vand.u32 2147483648, %v9731_v59  ;;  %v4730_v29 = vand.u32 2147483647, %v9731_v59 }
 0x7ee   : > { %5157 = vxpose.xlu1.b32.cont [2/16] (narrow) %v4704_v30, 8  ;;  %v4708_v39 = vsub.f32 1.0, %v4707_v0  ;;  %v4329_v24 = vadd.f32 %v4328_v1, %v4240_v26  ;;  %vm4726_vm14 = vweird.f32 %v9731_v59 }
 0x7ef   : > { %v4480_v16 = vpop.f32.mrf.mxu2  ;;  %v4733_v46 = vor.u32 1.1754944e-38, %v4732_v5  ;;  %vm4731_vm0 = vcmp.eq.f32.partialorder %v4730_v29, 8.507059e+37 }
 0x7f0   : > { %v4481_v44 = vadd.f32 %v9695_v12, %v4480_v16  ;;  %v4709_v53 = vmul.f32 %v6733_v18, %v4708_v39  ;;  %v4372_v11 = vmax.f32 %v4329_v24, 0.0 }
 0x7f1   : > { %v4157_v22 = vpop.f32.mrf.mxu0 }
 0x7f2   : > { %v6735_v33 = vpop.eup %6734  ;;  %v5620_v6 = vmul.f32 -1.442695, %v4481_v44  ;;  %v4710_v57 = vadd.f32 %v6733_v18, %v4709_v53 }
 0x7f3   : > { %v6737_v17 = vpop.eup %6736  ;;  %v9743_v47 = vadd.f32 1.0, %v6735_v33 }
 0x7f4   : > { %6738 = vpow2.f32 %v5620_v6  ;;  %5610 = vmatmul.msk.bf16.gmra.mxu2 %vm2320_vm13, %v4391_v34  ;;  %v4714_v3 = vsel %vm4713_vm10, %v6733_v18, %v4710_v57  ;;  %v4722_v56 = vmul.f32 %v6737_v17, %v9731_v59  ;;  %vm4727_vm12 = vweird.f32 %v6737_v17  ;;  %v4246_v34 = vpop.f32.mrf.mxu3 }
 0x7f5   : > { %v4330_v49 = vpop.f32.mrf.mxu1  ;;  %6740 = vrcp.f32 %v9743_v47  ;;  %v4719_v61 = vsel %vm4716_vm11, %v4718_v45, %v4714_v3  ;;  %vm4728_vm15 = vmor %vm4726_vm14, %vm4727_vm12  ;;  %v4069_v18 = vadd.f32 %v9633_v8, %v3980_v19  ;;  %v4747_v0 = vand.u32 2147483648, %v9743_v47 }
 0x7f6   : > { %v4331_v36 = vadd.f32 %v4330_v49, %v4242_v21  ;;  %5158 = vxpose.xlu1.b32.cont [3/16] (narrow) %v4719_v61, 8  ;;  %v4723_v58 = vsub.f32 1.0, %v4722_v56  ;;  %v4745_v30 = vand.u32 2147483647, %v9743_v47  ;;  %v4245_v8 = vadd.f32 %v4244_v63, %v4156_v62 }
 0x7f7   : > { %v4483_v50 = vpop.f32.mrf.mxu2  ;;  %v4158_v1 = vadd.f32 %v4157_v22, %v4069_v18  ;;  %vm4741_vm2 = vweird.f32 %v9743_v47  ;;  %v4748_v53 = vor.u32 1.1754944e-38, %v4747_v0 }
 0x7f8   : > { %v4373_v13 = vmax.f32 %v4331_v36, 0.0  ;;  %v4484_v10 = vadd.f32 %v9695_v12, %v4483_v50  ;;  %v4724_v38 = vmul.f32 %v6737_v17, %v4723_v58  ;;  %vm4746_vm4 = vcmp.eq.f32.partialorder %v4745_v30, 8.507059e+37  ;;  %v10048_v50 = vld [vmem:[#allocation10_spill] sm:$0xff] }
 0x7f9   : > { %v4160_v59 = vpop.f32.mrf.mxu0  ;;  %v4247_v44 = vadd.f32 %v4246_v34, %v4158_v1  ;;  %v3985_v5 = vadd.f32 %v9673_v54, %v10048_v50 }
 0x7fa   : > { %v4392_v37 = vpack.c.bf16 %v4373_v13, %v4372_v11  ;;  %v6739_v9 = vpop.eup %6738  ;;  %v5621_v27 = vmul.f32 -1.442695, %v4484_v10  ;;  %v4725_v43 = vadd.f32 %v6737_v17, %v4724_v38 }
 0x7fb   : > { %v6741_v60 = vpop.eup %6740  ;;  %v9754_v52 = vadd.f32 1.0, %v6739_v9 }
 0x7fc   : > { %6742 = vpow2.f32 %v5621_v27  ;;  %v4729_v4 = vsel %vm4728_vm15, %v6737_v17, %v4725_v43  ;;  %v4737_v42 = vmul.f32 %v6741_v60, %v9743_v47  ;;  %vm4742_vm1 = vweird.f32 %v6741_v60  ;;  %v4249_v41 = vpop.f32.mrf.mxu3 }
 0x7fd   : > { %v4333_v55 = vpop.f32.mrf.mxu1  ;;  %6744 = vrcp.f32 %v9754_v52  ;;  %v4734_v31 = vsel %vm4731_vm0, %v4733_v46, %v4729_v4  ;;  %vm4743_vm3 = vmor %vm4741_vm2, %vm4742_vm1  ;;  %v4762_v45 = vand.u32 2147483648, %v9754_v52  ;;  %v4760_v56 = vand.u32 2147483647, %v9754_v52 }
 0x7fe   : > { %5159 = vxpose.xlu1.b32.cont [4/16] (narrow) %v4734_v31, 8  ;;  %v4738_v20 = vsub.f32 1.0, %v4737_v42  ;;  %v4334_v25 = vadd.f32 %v4333_v55, %v4245_v8  ;;  %vm4756_vm6 = vweird.f32 %v9754_v52  ;;  %v4074_v27 = vadd.f32 %v9668_v51, %v3985_v5 }
 0x7ff   : > { %v4485_v7 = vpop.f32.mrf.mxu2  ;;  %v4763_v38 = vor.u32 1.1754944e-38, %v4762_v45  ;;  %vm4761_vm8 = vcmp.eq.f32.partialorder %v4760_v56, 8.507059e+37  ;;  %v4161_v43 = vadd.f32 %v4160_v59, %v9646_v40 }
 0x800   : > { %v4486_v35 = vadd.f32 %v9695_v12, %v4485_v7  ;;  %v4739_v32 = vmul.f32 %v6741_v60, %v4738_v20  ;;  %v4374_v47 = vmax.f32 %v4334_v25, 0.0 }
 0x801   : > { %v4162_v22 = vpop.f32.mrf.mxu0  ;;  %v4250_v42 = vadd.f32 %v4249_v41, %v4161_v43 }
 0x802   : > { %v6743_v39 = vpop.eup %6742  ;;  %v5622_v14 = vmul.f32 -1.442695, %v4486_v35  ;;  %v4740_v23 = vadd.f32 %v6741_v60, %v4739_v32  ;;  %v4163_v19 = vadd.f32 %v4162_v22, %v4074_v27 }
 0x803   : > { %v6745_v15 = vpop.eup %6744  ;;  %v9765_v16 = vadd.f32 1.0, %v6743_v39 }
 0x804   : > { %6746 = vpow2.f32 %v5622_v14  ;;  %5611 = vmatmul.msk.bf16.gmra.mxu2 %vm2320_vm13, %v4392_v37  ;;  %v4744_v33 = vsel %vm4743_vm3, %v6741_v60, %v4740_v23  ;;  %v4752_v63 = vmul.f32 %v6745_v15, %v9754_v52  ;;  %vm4757_vm5 = vweird.f32 %v6745_v15  ;;  %v4251_v28 = vpop.f32.mrf.mxu3 }
 0x805   : > { %v4335_v26 = vpop.f32.mrf.mxu1  ;;  %6748 = vrcp.f32 %v9765_v16  ;;  %v4749_v57 = vsel %vm4746_vm4, %v4748_v53, %v4744_v33  ;;  %vm4758_vm7 = vmor %vm4756_vm6, %vm4757_vm5  ;;  %v4777_v46 = vand.u32 2147483648, %v9765_v16  ;;  %v4775_v4 = vand.u32 2147483647, %v9765_v16 }
 0x806   : > { %v4336_v6 = vadd.f32 %v4335_v26, %v4247_v44  ;;  %5160 = vxpose.xlu1.b32.cont [5/16] (narrow) %v4749_v57, 8  ;;  %v4753_v17 = vsub.f32 1.0, %v4752_v63  ;;  %vm4771_vm10 = vweird.f32 %v9765_v16  ;;  %v4252_v1 = vadd.f32 %v4251_v28, %v4163_v19 }
 0x807   : > { %v4488_v21 = vpop.f32.mrf.mxu2  ;;  %v4778_v7 = vor.u32 1.1754944e-38, %v4777_v46  ;;  %vm4776_vm12 = vcmp.eq.f32.partialorder %v4775_v4, 8.507059e+37 }
 0x808   : > { %v4375_v24 = vmax.f32 %v4336_v6, 0.0  ;;  %v4489_v49 = vadd.f32 %v9695_v12, %v4488_v21  ;;  %v4754_v3 = vmul.f32 %v6745_v15, %v4753_v17 }
 0x809   : > { %v4165_v18 = vpop.f32.mrf.mxu0 }
 0x80a   : > { %v4393_v36 = vpack.c.bf16 %v4375_v24, %v4374_v47  ;;  %v6747_v61 = vpop.eup %6746  ;;  %v5623_v58 = vmul.f32 -1.442695, %v4489_v49  ;;  %v4755_v11 = vadd.f32 %v6745_v15, %v4754_v3  ;;  %v4166_v49 = vadd.f32 %v4165_v18, %v9682_v48 }
 0x80b   : > { %v6749_v13 = vpop.eup %6748  ;;  %v9776_v10 = vadd.f32 1.0, %v6747_v61 }
 0x80c   : > { %6750 = vpow2.f32 %v5623_v58  ;;  %v4759_v37 = vsel %vm4758_vm7, %v6745_v15, %v4755_v11  ;;  %v4767_v9 = vmul.f32 %v6749_v13, %v9765_v16  ;;  %vm4772_vm9 = vweird.f32 %v6749_v13  ;;  %v4254_v25 = vpop.f32.mrf.mxu3 }
 0x80d   : > { %v4338_v29 = vpop.f32.mrf.mxu1  ;;  %6752 = vrcp.f32 %v9776_v10  ;;  %v4764_v60 = vsel %vm4761_vm8, %v4763_v38, %v4759_v37  ;;  %vm4773_vm11 = vmor %vm4771_vm10, %vm4772_vm9  ;;  %v4792_v16 = vand.u32 2147483648, %v9776_v10  ;;  %v4790_v41 = vand.u32 2147483647, %v9776_v10 }
 0x80e   : > { %5161 = vxpose.xlu1.b32.cont [6/16] (narrow) %v4764_v60, 8  ;;  %v4768_v54 = vsub.f32 1.0, %v4767_v9  ;;  %v4339_v20 = vadd.f32 %v4338_v29, %v4250_v42  ;;  %vm4786_vm15 = vweird.f32 %v9776_v10  ;;  %v4255_v5 = vadd.f32 %v4254_v25, %v4166_v49 }
 0x80f   : > { %v4490_v52 = vpop.f32.mrf.mxu2  ;;  %v4793_v47 = vor.u32 1.1754944e-38, %v4792_v16  ;;  %vm4791_vm1 = vcmp.eq.f32.partialorder %v4790_v41, 8.507059e+37 }
 0x810   : > { %v4491_v34 = vadd.f32 %v9695_v12, %v4490_v52  ;;  %v4769_v55 = vmul.f32 %v6749_v13, %v4768_v54  ;;  %v4376_v14 = vmax.f32 %v4339_v20, 0.0 }
 0x811   : > { %v4167_v24 = vpop.f32.mrf.mxu0 }
 0x812   : > { %v6751_v51 = vpop.eup %6750  ;;  %v5624_v40 = vmul.f32 -1.442695, %v4491_v34  ;;  %v4770_v62 = vadd.f32 %v6749_v13, %v4769_v55 }
 0x813   : > { %v6753_v31 = vpop.eup %6752  ;;  %v9786_v59 = vadd.f32 1.0, %v6751_v51 }
 0x814   : > { %6754 = vpow2.f32 %v5624_v40  ;;  %5612 = vmatmul.msk.bf16.gmra.mxu2 %vm2320_vm13, %v4393_v36  ;;  %v4774_v35 = vsel %vm4773_vm11, %v6749_v13, %v4770_v62  ;;  %v4782_v32 = vmul.f32 %v6753_v31, %v9776_v10  ;;  %vm4787_vm14 = vweird.f32 %v6753_v31  ;;  %v4256_v38 = vpop.f32.mrf.mxu3 }
 0x815   : > { %v4340_v0 = vpop.f32.mrf.mxu1  ;;  %6756 = vrcp.f32 %v9786_v59  ;;  %v4779_v8 = vsel %vm4776_vm12, %v4778_v7, %v4774_v35  ;;  %vm4788_vm0 = vmor %vm4786_vm15, %vm4787_vm14  ;;  %v4168_v36 = vadd.f32 %v4167_v24, %v9688_v2  ;;  %v4807_v58 = vand.u32 2147483648, %v9786_v59 }
 0x816   : > { %v4341_v30 = vadd.f32 %v4340_v0, %v4252_v1  ;;  %5162 = vxpose.xlu1.b32.cont [7/16] (narrow) %v4779_v8, 8  ;;  %v4783_v39 = vsub.f32 1.0, %v4782_v32  ;;  %v4805_v50 = vand.u32 2147483647, %v9786_v59  ;;  %vm4801_vm3 = vweird.f32 %v9786_v59 }
 0x817   : > { %v4493_v15 = vpop.f32.mrf.mxu2  ;;  %v4257_v2 = vadd.f32 %v4256_v38, %v4168_v36  ;;  %v4808_v43 = vor.u32 1.1754944e-38, %v4807_v58 }
 0x818   : > { %v4377_v23 = vmax.f32 %v4341_v30, 0.0  ;;  %v4494_v44 = vadd.f32 %v9695_v12, %v4493_v15  ;;  %v4784_v53 = vmul.f32 %v6753_v31, %v4783_v39  ;;  %vm4806_vm5 = vcmp.eq.f32.partialorder %v4805_v50, 8.507059e+37 }
 0x81a   : > { %v4394_v26 = vpack.c.bf16 %v4377_v23, %v4376_v14  ;;  %v6755_v33 = vpop.eup %6754  ;;  %v5625_v63 = vmul.f32 -1.442695, %v4494_v44  ;;  %v4785_v6 = vadd.f32 %v6753_v31, %v4784_v53 }
 0x81b   : > { %v6757_v57 = vpop.eup %6756  ;;  %v9795_v17 = vadd.f32 1.0, %v6755_v33 }
 0x81c   : > { %6758 = vpow2.f32 %v5625_v63  ;;  %v4789_v45 = vsel %vm4788_vm0, %v6753_v31, %v4785_v6  ;;  %v4797_v22 = vmul.f32 %v6757_v57, %v9786_v59  ;;  %vm4802_vm2 = vweird.f32 %v6757_v57 }
 0x81d   : > { %v4343_v21 = vpop.f32.mrf.mxu1  ;;  %6760 = vrcp.f32 %v9795_v17  ;;  %v4794_v3 = vsel %vm4791_vm1, %v4793_v47, %v4789_v45  ;;  %vm4803_vm4 = vmor %vm4801_vm3, %vm4802_vm2  ;;  %v4822_v42 = vand.u32 2147483648, %v9795_v17  ;;  %v4820_v40 = vand.u32 2147483647, %v9795_v17 }
 0x81e   : > { %5163 = vxpose.xlu1.b32.cont [8/16] (narrow) %v4794_v3, 8  ;;  %v4798_v56 = vsub.f32 1.0, %v4797_v22  ;;  %v4344_v27 = vadd.f32 %v4343_v21, %v4255_v5  ;;  %vm4816_vm7 = vweird.f32 %v9795_v17 }
 0x81f   : > { %v4495_v61 = vpop.f32.mrf.mxu2  ;;  %v4823_v0 = vor.u32 1.1754944e-38, %v4822_v42  ;;  %vm4821_vm9 = vcmp.eq.f32.partialorder %v4820_v40, 8.507059e+37 }
 0x820   : > { %v4496_v11 = vadd.f32 %v9695_v12, %v4495_v61  ;;  %v4799_v13 = vmul.f32 %v6757_v57, %v4798_v56  ;;  %v4378_v34 = vmax.f32 %v4344_v27, 0.0 }
 0x822   : > { %v6759_v10 = vpop.eup %6758  ;;  %v5626_v48 = vmul.f32 -1.442695, %v4496_v11  ;;  %v4800_v29 = vadd.f32 %v6757_v57, %v4799_v13 }
 0x823   : > { %v6761_v37 = vpop.eup %6760  ;;  %v4654_v9 = vadd.f32 1.0, %v6759_v10 }
 0x824   : > { %6762 = vpow2.f32 %v5626_v48  ;;  %5613 = vmatmul.msk.bf16.gmra.mxu2 %vm2320_vm13, %v4394_v26  ;;  %v4804_v28 = vsel %vm4803_vm4, %v6757_v57, %v4800_v29  ;;  %v4812_v54 = vmul.f32 %v6761_v37, %v9795_v17  ;;  %vm4817_vm6 = vweird.f32 %v6761_v37 }
 0x825   : > { %v4345_v60 = vpop.f32.mrf.mxu1  ;;  %6764 = vrcp.f32 %v4654_v9  ;;  %v4809_v52 = vsel %vm4806_vm5, %v4808_v43, %v4804_v28  ;;  %vm4818_vm8 = vmor %vm4816_vm7, %vm4817_vm6  ;;  %v4837_v14 = vand.u32 2147483648, %v4654_v9  ;;  %v4835_v16 = vand.u32 2147483647, %v4654_v9 }
 0x826   : > { %v4346_v19 = vadd.f32 %v4345_v60, %v4257_v2  ;;  %5164 = vxpose.xlu1.b32.cont [9/16] (narrow) %v4809_v52, 8  ;;  %v4813_v46 = vsub.f32 1.0, %v4812_v54  ;;  %vm4831_vm11 = vweird.f32 %v4654_v9 }
 0x827   : > { %v4498_v4 = vpop.f32.mrf.mxu2  ;;  %v4838_v33 = vor.u32 1.1754944e-38, %v4837_v14  ;;  %vm4836_vm14 = vcmp.eq.f32.partialorder %v4835_v16, 8.507059e+37 }
 0x828   : > { %v4379_v55 = vmax.f32 %v4346_v19, 0.0  ;;  %v4499_v51 = vadd.f32 %v9695_v12, %v4498_v4  ;;  %v4814_v18 = vmul.f32 %v6761_v37, %v4813_v46 }
 0x82a   : > { %v4395_v62 = vpack.c.bf16 %v4379_v55, %v4378_v34  ;;  %v6763_v31 = vpop.eup %6762  ;;  %v5627_v59 = vmul.f32 -1.442695, %v4499_v51  ;;  %v4815_v20 = vadd.f32 %v6761_v37, %v4814_v18 }
 0x82b   : > { %v6765_v1 = vpop.eup %6764  ;;  %v4655_v7 = vadd.f32 1.0, %v6763_v31 }
 0x82c   : > { %6766 = vpow2.f32 %v5627_v59  ;;  %v4819_v35 = vsel %vm4818_vm8, %v6761_v37, %v4815_v20  ;;  %v4827_v32 = vmul.f32 %v6765_v1, %v4654_v9  ;;  %vm4832_vm10 = vweird.f32 %v6765_v1 }
 0x82d   : > { %6768 = vrcp.f32 %v4655_v7  ;;  %v4824_v30 = vsel %vm4821_vm9, %v4823_v0, %v4819_v35  ;;  %vm4833_vm12 = vmor %vm4831_vm11, %vm4832_vm10  ;;  %v4852_v24 = vand.u32 2147483648, %v4655_v7  ;;  %v4850_v22 = vand.u32 2147483647, %v4655_v7 }
 0x82e   : > { %5165 = vxpose.xlu1.b32.cont [10/16] (narrow) %v4824_v30, 8  ;;  %v4828_v8 = vsub.f32 1.0, %v4827_v32  ;;  %vm4846_vm0 = vweird.f32 %v4655_v7 }
 0x82f   : > { %v4500_v39 = vpop.f32.mrf.mxu2  ;;  %v4853_v58 = vor.u32 1.1754944e-38, %v4852_v24  ;;  %vm4851_vm1 = vcmp.eq.f32.partialorder %v4850_v22, 8.507059e+37 }
 0x830   : > { %v4501_v23 = vadd.f32 %v9695_v12, %v4500_v39  ;;  %v4829_v15 = vmul.f32 %v6765_v1, %v4828_v8 }
 0x832   : > { %v6767_v25 = vpop.eup %6766  ;;  %v5628_v44 = vmul.f32 -1.442695, %v4501_v23  ;;  %v4830_v53 = vadd.f32 %v6765_v1, %v4829_v15 }
 0x833   : > { %v6769_v41 = vpop.eup %6768  ;;  %v4656_v26 = vadd.f32 1.0, %v6767_v25 }
 0x834   : > { %6770 = vpow2.f32 %v5628_v44  ;;  %5614 = vmatmul.msk.bf16.gmra.mxu2 %vm2320_vm13, %v4395_v62  ;;  %v4834_v63 = vsel %vm4833_vm12, %v6765_v1, %v4830_v53  ;;  %v4842_v6 = vmul.f32 %v6769_v41, %v4655_v7  ;;  %vm4847_vm15 = vweird.f32 %v6769_v41 }
 0x835   : > { %6772 = vrcp.f32 %v4656_v26  ;;  %v4839_v57 = vsel %vm4836_vm14, %v4838_v33, %v4834_v63  ;;  %vm4848_vm13 = vmor %vm4846_vm0, %vm4847_vm15  ;;  %v4867_v38 = vand.u32 2147483648, %v4656_v26  ;;  %v4865_v37 = vand.u32 2147483647, %v4656_v26 }
 0x836   : > { %5166 = vxpose.xlu1.b32.cont [11/16] (narrow) %v4839_v57, 8  ;;  %v4843_v17 = vsub.f32 1.0, %v4842_v6  ;;  %vm4861_vm3 = vweird.f32 %v4656_v26 }
 0x837   : > { %v4503_v47 = vpop.f32.mrf.mxu2  ;;  %v4868_v28 = vor.u32 1.1754944e-38, %v4867_v38  ;;  %vm4866_vm5 = vcmp.eq.f32.partialorder %v4865_v37, 8.507059e+37 }
 0x838   : > { %v4504_v21 = vadd.f32 %v9695_v12, %v4503_v47  ;;  %v4844_v45 = vmul.f32 %v6769_v41, %v4843_v17 }
 0x83a   : > { %v6771_v49 = vpop.eup %6770  ;;  %v5629_v3 = vmul.f32 -1.442695, %v4504_v21  ;;  %v4845_v56 = vadd.f32 %v6769_v41, %v4844_v45 }
 0x83b   : > { %v6773_v36 = vpop.eup %6772  ;;  %v4657_v61 = vadd.f32 1.0, %v6771_v49 }
 0x83c   : > { %6774 = vpow2.f32 %v5629_v3  ;;  %v4849_v11 = vsel %vm4848_vm13, %v6769_v41, %v4845_v56  ;;  %v4857_v13 = vmul.f32 %v6773_v36, %v4656_v26  ;;  %vm4862_vm2 = vweird.f32 %v6773_v36 }
 0x83d   : > { %6776 = vrcp.f32 %v4657_v61  ;;  %v4854_v50 = vsel %vm4851_vm1, %v4853_v58, %v4849_v11  ;;  %vm4863_vm4 = vmor %vm4861_vm3, %vm4862_vm2  ;;  %v4882_v55 = vand.u32 2147483648, %v4657_v61  ;;  %v4880_v51 = vand.u32 2147483647, %v4657_v61 }
 0x83e   : > { %5167 = vxpose.xlu1.b32.cont [12/16] (narrow) %v4854_v50, 8  ;;  %v4858_v5 = vsub.f32 1.0, %v4857_v13  ;;  %vm4876_vm7 = vweird.f32 %v4657_v61 }
 0x83f   : > { %v4505_v10 = vpop.f32.mrf.mxu2  ;;  %v4883_v20 = vor.u32 1.1754944e-38, %v4882_v55  ;;  %vm4881_vm9 = vcmp.eq.f32.partialorder %v4880_v51, 8.507059e+37 }
 0x840   : > { %v4506_v48 = vadd.f32 %v9695_v12, %v4505_v10  ;;  %v4859_v29 = vmul.f32 %v6773_v36, %v4858_v5 }
 0x842   : > { %v6775_v9 = vpop.eup %6774  ;;  %v5630_v27 = vmul.f32 -1.442695, %v4506_v48  ;;  %v4860_v2 = vadd.f32 %v6773_v36, %v4859_v29 }
 0x843   : > { %v6777_v43 = vpop.eup %6776  ;;  %v4658_v60 = vadd.f32 1.0, %v6775_v9 }
 0x844   : > { %6778 = vpow2.f32 %v5630_v27  ;;  %v4864_v54 = vsel %vm4863_vm4, %v6773_v36, %v4860_v2  ;;  %v4872_v19 = vmul.f32 %v6777_v43, %v4657_v61  ;;  %vm4877_vm6 = vweird.f32 %v6777_v43 }
 0x845   : > { %6780 = vrcp.f32 %v4658_v60  ;;  %v4869_v52 = vsel %vm4866_vm5, %v4868_v28, %v4864_v54  ;;  %vm4878_vm8 = vmor %vm4876_vm7, %vm4877_vm6  ;;  %v4897_v30 = vand.u32 2147483648, %v4658_v60  ;;  %v4895_v14 = vand.u32 2147483647, %v4658_v60 }
 0x846   : > { %5168 = vxpose.xlu1.b32.cont [13/16] (narrow) %v4869_v52, 8  ;;  %v4873_v46 = vsub.f32 1.0, %v4872_v19  ;;  %vm4891_vm11 = vweird.f32 %v4658_v60 }
 0x847   : > { %v4508_v34 = vpop.f32.mrf.mxu2  ;;  %v4898_v53 = vor.u32 1.1754944e-38, %v4897_v30  ;;  %vm4896_vm14 = vcmp.eq.f32.partialorder %v4895_v14, 8.507059e+37 }
 0x848   : > { %v4509_v4 = vadd.f32 %v9695_v12, %v4508_v34  ;;  %v4874_v42 = vmul.f32 %v6777_v43, %v4873_v46 }
 0x84a   : > { %v6779_v18 = vpop.eup %6778  ;;  %v5631_v40 = vmul.f32 -1.442695, %v4509_v4  ;;  %v4875_v62 = vadd.f32 %v6777_v43, %v4874_v42 }
 0x84b   : > { %v6781_v31 = vpop.eup %6780  ;;  %v4659_v59 = vadd.f32 1.0, %v6779_v18 }
 0x84c   : > { %6782 = vpow2.f32 %v5631_v40  ;;  %v4879_v1 = vsel %vm4878_vm8, %v6777_v43, %v4875_v62  ;;  %v4887_v7 = vmul.f32 %v6781_v31, %v4658_v60  ;;  %vm4892_vm10 = vweird.f32 %v6781_v31 }
 0x84d   : > { %6784 = vrcp.f32 %v4659_v59  ;;  %v4884_v0 = vsel %vm4881_vm9, %v4883_v20, %v4879_v1  ;;  %vm4893_vm12 = vmor %vm4891_vm11, %vm4892_vm10  ;;  %v4912_v57 = vand.u32 2147483648, %v4659_v59  ;;  %v4910_v24 = vand.u32 2147483647, %v4659_v59 }
 0x84e   : > { %5169 = vxpose.xlu1.b32.cont [14/16] (narrow) %v4884_v0, 8  ;;  %v4888_v35 = vsub.f32 1.0, %v4887_v7  ;;  %vm4906_vm0 = vweird.f32 %v4659_v59  ;;  %v9823_v0 = vld [vmem:[%s9854_s11] ss:$0 sm:$0xff] }
 0x84f   : > { %v4510_v32 = vpop.f32.mrf.mxu2  ;;  %v4913_v56 = vor.u32 1.1754944e-38, %v4912_v57  ;;  %vm4911_vm1 = vcmp.eq.f32.partialorder %v4910_v24, 8.507059e+37 }
 0x850   : > { %v4511_v8 = vadd.f32 %v9695_v12, %v4510_v32  ;;  %v4889_v39 = vmul.f32 %v6781_v31, %v4888_v35 }
 0x852   : > { %v6783_v23 = vpop.eup %6782  ;;  %v5632_v15 = vmul.f32 -1.442695, %v4511_v8  ;;  %v4890_v16 = vadd.f32 %v6781_v31, %v4889_v39 }
 0x853   : > { %v6785_v25 = vpop.eup %6784  ;;  %v4660_v44 = vadd.f32 1.0, %v6783_v23 }
 0x854   : > { %6786 = vpow2.f32 %v5632_v15  ;;  %v4894_v41 = vsel %vm4893_vm12, %v6781_v31, %v4890_v16  ;;  %v4902_v26 = vmul.f32 %v6785_v25, %v4659_v59  ;;  %vm4907_vm15 = vweird.f32 %v6785_v25 }
 0x855   : > { %6788 = vrcp.f32 %v4660_v44  ;;  %v4899_v33 = vsel %vm4896_vm14, %v4898_v53, %v4894_v41  ;;  %vm4908_vm13 = vmor %vm4906_vm0, %vm4907_vm15  ;;  %v4927_v50 = vand.u32 2147483648, %v4660_v44  ;;  %v4925_v38 = vand.u32 2147483647, %v4660_v44 }
 0x856   : > { %5170 = vxpose.xlu1.b32.cont [15/16] (narrow) %v4899_v33, 8  ;;  %v4903_v63 = vsub.f32 1.0, %v4902_v26  ;;  %vm4921_vm3 = vweird.f32 %v4660_v44 }
 0x857   : > { %v4513_v6 = vpop.f32.mrf.mxu2  ;;  %v4928_v2 = vor.u32 1.1754944e-38, %v4927_v50  ;;  %vm4926_vm5 = vcmp.eq.f32.partialorder %v4925_v38, 8.507059e+37 }
 0x858   : > { %v4514_v17 = vadd.f32 %v9695_v12, %v4513_v6  ;;  %v4904_v47 = vmul.f32 %v6785_v25, %v4903_v63 }
 0x85a   : > { %v6787_v21 = vpop.eup %6786  ;;  %v5633_v45 = vmul.f32 -1.442695, %v4514_v17  ;;  %v4905_v22 = vadd.f32 %v6785_v25, %v4904_v47 }
 0x85b   : > { %v6789_v49 = vpop.eup %6788  ;;  %v4661_v3 = vadd.f32 1.0, %v6787_v21 }
 0x85c   : > { %6790 = vpow2.f32 %v5633_v45  ;;  %v4909_v36 = vsel %vm4908_vm13, %v6785_v25, %v4905_v22  ;;  %v4917_v61 = vmul.f32 %v6789_v49, %v4660_v44  ;;  %vm4922_vm2 = vweird.f32 %v6789_v49 }
 0x85d   : > { %6792 = vrcp.f32 %v4661_v3  ;;  %v4914_v58 = vsel %vm4911_vm1, %v4913_v56, %v4909_v36  ;;  %vm4923_vm4 = vmor %vm4921_vm3, %vm4922_vm2  ;;  %v4942_v52 = vand.u32 2147483648, %v4661_v3  ;;  %v4940_v55 = vand.u32 2147483647, %v4661_v3 }
 0x85e   : > { %5171 = vxpose.xlu1.b32.end [16/16] (narrow) %v4914_v58, 8  ;;  %v4918_v11 = vsub.f32 1.0, %v4917_v61  ;;  %vm4936_vm7 = vweird.f32 %v4661_v3 }
 0x85f   : > { %v4515_v13 = vpop.f32.mrf.mxu2  ;;  %v4943_v62 = vor.u32 1.1754944e-38, %v4942_v52  ;;  %vm4941_vm9 = vcmp.eq.f32.partialorder %v4940_v55, 8.507059e+37 }
 0x860   : > { %v4516_v5 = vadd.f32 %v9695_v12, %v4515_v13  ;;  %v4919_v10 = vmul.f32 %v6789_v49, %v4918_v11 }
 0x862   : > { %v6791_v48 = vpop.eup %6790  ;;  %v5634_v29 = vmul.f32 -1.442695, %v4516_v5  ;;  %v4920_v37 = vadd.f32 %v6789_v49, %v4919_v10 }
 0x863   : > { %v6793_v9 = vpop.eup %6792  ;;  %v4662_v27 = vadd.f32 1.0, %v6791_v48 }
 0x864   : > { %6794 = vpow2.f32 %v5634_v29  ;;  %v4924_v43 = vsel %vm4923_vm4, %v6789_v49, %v4920_v37  ;;  %v4932_v60 = vmul.f32 %v6793_v9, %v4661_v3  ;;  %vm4937_vm6 = vweird.f32 %v6793_v9 }
 0x865   : > { %6796 = vrcp.f32 %v4662_v27  ;;  %v4929_v28 = vsel %vm4926_vm5, %v4928_v2, %v4924_v43  ;;  %vm4938_vm8 = vmor %vm4936_vm7, %vm4937_vm6  ;;  %v4957_v7 = vand.u32 2147483648, %v4662_v27  ;;  %v4955_v30 = vand.u32 2147483647, %v4662_v27 }
 0x866   : > { %5188 = vxpose.xlu2.b32.start [1/16] (narrow) %v4929_v28, 8  ;;  %v4933_v54 = vsub.f32 1.0, %v4932_v60  ;;  %vm4951_vm11 = vweird.f32 %v4662_v27 }
 0x867   : > { %v4518_v19 = vpop.f32.mrf.mxu2  ;;  %v4958_v16 = vor.u32 1.1754944e-38, %v4957_v7  ;;  %vm4956_vm14 = vcmp.eq.f32.partialorder %v4955_v30, 8.507059e+37 }
 0x868   : > { %v4519_v46 = vadd.f32 %v9695_v12, %v4518_v19  ;;  %v4934_v34 = vmul.f32 %v6793_v9, %v4933_v54 }
 0x86a   : > { %v6795_v4 = vpop.eup %6794  ;;  %v5635_v42 = vmul.f32 -1.442695, %v4519_v46  ;;  %v4935_v51 = vadd.f32 %v6793_v9, %v4934_v34 }
 0x86b   : > { %v6797_v18 = vpop.eup %6796  ;;  %v4663_v40 = vadd.f32 1.0, %v6795_v4 }
 0x86c   : > { %6798 = vpow2.f32 %v5635_v42  ;;  %v4939_v31 = vsel %vm4938_vm8, %v6793_v9, %v4935_v51  ;;  %v4947_v59 = vmul.f32 %v6797_v18, %v4662_v27  ;;  %vm4952_vm10 = vweird.f32 %v6797_v18 }
 0x86d   : > { %6800 = vrcp.f32 %v4663_v40  ;;  %v4944_v20 = vsel %vm4941_vm9, %v4943_v62, %v4939_v31  ;;  %vm4953_vm12 = vmor %vm4951_vm11, %vm4952_vm10  ;;  %v4972_v33 = vand.u32 2147483648, %v4663_v40  ;;  %v4970_v57 = vand.u32 2147483647, %v4663_v40 }
 0x86e   : > { %5189 = vxpose.xlu2.b32.cont [2/16] (narrow) %v4944_v20, 8  ;;  %v4948_v1 = vsub.f32 1.0, %v4947_v59  ;;  %vm4966_vm0 = vweird.f32 %v4663_v40 }
 0x86f   : > { %v4520_v12 = vpop.f32.mrf.mxu2  ;;  %v4973_v22 = vor.u32 1.1754944e-38, %v4972_v33  ;;  %vm4971_vm1 = vcmp.eq.f32.partialorder %v4970_v57, 8.507059e+37 }
 0x870   : > { %v4521_v35 = vadd.f32 %v9823_v0, %v4520_v12  ;;  %v4949_v32 = vmul.f32 %v6797_v18, %v4948_v1 }
 0x872   : > { %v6799_v8 = vpop.eup %6798  ;;  %v5636_v39 = vmul.f32 -1.442695, %v4521_v35  ;;  %v4950_v14 = vadd.f32 %v6797_v18, %v4949_v32 }
 0x873   : > { %v6801_v23 = vpop.eup %6800  ;;  %v4664_v15 = vadd.f32 1.0, %v6799_v8 }
 0x874   : > { %6802 = vpow2.f32 %v5636_v39  ;;  %v4954_v25 = vsel %vm4953_vm12, %v6797_v18, %v4950_v14  ;;  %v4962_v44 = vmul.f32 %v6801_v23, %v4663_v40  ;;  %vm4967_vm15 = vweird.f32 %v6801_v23 }
 0x875   : > { %6804 = vrcp.f32 %v4664_v15  ;;  %v4959_v53 = vsel %vm4956_vm14, %v4958_v16, %v4954_v25  ;;  %vm4968_vm13 = vmor %vm4966_vm0, %vm4967_vm15  ;;  %v4987_v58 = vand.u32 2147483648, %v4664_v15  ;;  %v4985_v50 = vand.u32 2147483647, %v4664_v15 }
 0x876   : > { %5190 = vxpose.xlu2.b32.cont [3/16] (narrow) %v4959_v53, 8  ;;  %v4963_v41 = vsub.f32 1.0, %v4962_v44  ;;  %vm4981_vm3 = vweird.f32 %v4664_v15 }
 0x877   : > { %v4523_v26 = vpop.f32.mrf.mxu2  ;;  %v4988_v37 = vor.u32 1.1754944e-38, %v4987_v58  ;;  %vm4986_vm5 = vcmp.eq.f32.partialorder %v4985_v50, 8.507059e+37 }
 0x878   : > { %v4524_v63 = vadd.f32 %v9823_v0, %v4523_v26  ;;  %v4964_v6 = vmul.f32 %v6801_v23, %v4963_v41 }
 0x87a   : > { %v6803_v17 = vpop.eup %6802  ;;  %v5637_v47 = vmul.f32 -1.442695, %v4524_v63  ;;  %v4965_v24 = vadd.f32 %v6801_v23, %v4964_v6 }
 0x87b   : > { %v6805_v21 = vpop.eup %6804  ;;  %v4665_v45 = vadd.f32 1.0, %v6803_v17 }
 0x87c   : > { %6806 = vpow2.f32 %v5637_v47  ;;  %v4969_v49 = vsel %vm4968_vm13, %v6801_v23, %v4965_v24  ;;  %v4977_v3 = vmul.f32 %v6805_v21, %v4664_v15  ;;  %vm4982_vm2 = vweird.f32 %v6805_v21 }
 0x87d   : > { %6808 = vrcp.f32 %v4665_v45  ;;  %v4974_v56 = vsel %vm4971_vm1, %v4973_v22, %v4969_v49  ;;  %vm4983_vm4 = vmor %vm4981_vm3, %vm4982_vm2  ;;  %v5002_v28 = vand.u32 2147483648, %v4665_v45  ;;  %v5000_v52 = vand.u32 2147483647, %v4665_v45 }
 0x87e   : > { %5191 = vxpose.xlu2.b32.cont [4/16] (narrow) %v4974_v56, 8  ;;  %v4978_v36 = vsub.f32 1.0, %v4977_v3  ;;  %vm4996_vm7 = vweird.f32 %v4665_v45 }
 0x87f   : > { %v4525_v61 = vpop.f32.mrf.mxu2  ;;  %v5003_v51 = vor.u32 1.1754944e-38, %v5002_v28  ;;  %vm5001_vm9 = vcmp.eq.f32.partialorder %v5000_v52, 8.507059e+37 }
 0x880   : > { %v4526_v11 = vadd.f32 %v9823_v0, %v4525_v61  ;;  %v4979_v13 = vmul.f32 %v6805_v21, %v4978_v36 }
 0x882   : > { %v6807_v5 = vpop.eup %6806  ;;  %v5638_v10 = vmul.f32 -1.442695, %v4526_v11  ;;  %v4980_v38 = vadd.f32 %v6805_v21, %v4979_v13 }
 0x883   : > { %v6809_v48 = vpop.eup %6808  ;;  %v4666_v29 = vadd.f32 1.0, %v6807_v5 }
 0x884   : > { %6810 = vpow2.f32 %v5638_v10  ;;  %v4984_v9 = vsel %vm4983_vm4, %v6805_v21, %v4980_v38  ;;  %v4992_v27 = vmul.f32 %v6809_v48, %v4665_v45  ;;  %vm4997_vm6 = vweird.f32 %v6809_v48 }
 0x885   : > { %6812 = vrcp.f32 %v4666_v29  ;;  %v4989_v2 = vsel %vm4986_vm5, %v4988_v37, %v4984_v9  ;;  %vm4998_vm8 = vmor %vm4996_vm7, %vm4997_vm6  ;;  %v5017_v20 = vand.u32 2147483648, %v4666_v29  ;;  %v5015_v7 = vand.u32 2147483647, %v4666_v29 }
 0x886   : > { %5192 = vxpose.xlu2.b32.cont [5/16] (narrow) %v4989_v2, 8  ;;  %v4993_v43 = vsub.f32 1.0, %v4992_v27  ;;  %vm5011_vm11 = vweird.f32 %v4666_v29 }
 0x887   : > { %v4528_v60 = vpop.f32.mrf.mxu2  ;;  %v5018_v14 = vor.u32 1.1754944e-38, %v5017_v20  ;;  %vm5016_vm14 = vcmp.eq.f32.partialorder %v5015_v7, 8.507059e+37 }
 0x888   : > { %v4529_v54 = vadd.f32 %v9823_v0, %v4528_v60  ;;  %v4994_v19 = vmul.f32 %v6809_v48, %v4993_v43 }
 0x88a   : > { %v6811_v46 = vpop.eup %6810  ;;  %v5639_v34 = vmul.f32 -1.442695, %v4529_v54  ;;  %v4995_v55 = vadd.f32 %v6809_v48, %v4994_v19 }
 0x88b   : > { %v6813_v4 = vpop.eup %6812  ;;  %v4667_v42 = vadd.f32 1.0, %v6811_v46 }
 0x88c   : > { %6814 = vpow2.f32 %v5639_v34  ;;  %v4999_v18 = vsel %vm4998_vm8, %v6809_v48, %v4995_v55  ;;  %v5007_v40 = vmul.f32 %v6813_v4, %v4666_v29  ;;  %vm5012_vm10 = vweird.f32 %v6813_v4 }
 0x88d   : > { %6816 = vrcp.f32 %v4667_v42  ;;  %v5004_v62 = vsel %vm5001_vm9, %v5003_v51, %v4999_v18  ;;  %vm5013_vm12 = vmor %vm5011_vm11, %vm5012_vm10  ;;  %v5032_v53 = vand.u32 2147483648, %v4667_v42  ;;  %v5030_v33 = vand.u32 2147483647, %v4667_v42 }
 0x88e   : > { %5193 = vxpose.xlu2.b32.cont [6/16] (narrow) %v5004_v62, 8  ;;  %v5008_v31 = vsub.f32 1.0, %v5007_v40  ;;  %vm5026_vm0 = vweird.f32 %v4667_v42 }
 0x88f   : > { %v4530_v59 = vpop.f32.mrf.mxu2  ;;  %v5033_v24 = vor.u32 1.1754944e-38, %v5032_v53  ;;  %vm5031_vm1 = vcmp.eq.f32.partialorder %v5030_v33, 8.507059e+37 }
 0x890   : > { %v4531_v1 = vadd.f32 %v9823_v0, %v4530_v59  ;;  %v5009_v12 = vmul.f32 %v6813_v4, %v5008_v31 }
 0x892   : > { %v6815_v35 = vpop.eup %6814  ;;  %v5640_v32 = vmul.f32 -1.442695, %v4531_v1  ;;  %v5010_v30 = vadd.f32 %v6813_v4, %v5009_v12 }
 0x893   : > { %v6817_v8 = vpop.eup %6816  ;;  %v4668_v39 = vadd.f32 1.0, %v6815_v35 }
 0x894   : > { %6818 = vpow2.f32 %v5640_v32  ;;  %v5014_v23 = vsel %vm5013_vm12, %v6813_v4, %v5010_v30  ;;  %v5022_v15 = vmul.f32 %v6817_v8, %v4667_v42  ;;  %vm5027_vm15 = vweird.f32 %v6817_v8 }
 0x895   : > { %6820 = vrcp.f32 %v4668_v39  ;;  %v5019_v16 = vsel %vm5016_vm14, %v5018_v14, %v5014_v23  ;;  %vm5028_vm13 = vmor %vm5026_vm0, %vm5027_vm15  ;;  %v5047_v56 = vand.u32 2147483648, %v4668_v39  ;;  %v5045_v58 = vand.u32 2147483647, %v4668_v39 }
 0x896   : > { %5194 = vxpose.xlu2.b32.cont [7/16] (narrow) %v5019_v16, 8  ;;  %v5023_v25 = vsub.f32 1.0, %v5022_v15  ;;  %vm5041_vm3 = vweird.f32 %v4668_v39 }
 0x897   : > { %v4533_v44 = vpop.f32.mrf.mxu2  ;;  %v5048_v38 = vor.u32 1.1754944e-38, %v5047_v56  ;;  %vm5046_vm5 = vcmp.eq.f32.partialorder %v5045_v58, 8.507059e+37 }
 0x898   : > { %v4534_v41 = vadd.f32 %v9823_v0, %v4533_v44  ;;  %v5024_v26 = vmul.f32 %v6817_v8, %v5023_v25 }
 0x89a   : > { %v6819_v63 = vpop.eup %6818  ;;  %v5641_v6 = vmul.f32 -1.442695, %v4534_v41  ;;  %v5025_v57 = vadd.f32 %v6817_v8, %v5024_v26 }
 0x89b   : > { %v6821_v17 = vpop.eup %6820  ;;  %v4669_v47 = vadd.f32 1.0, %v6819_v63 }
 0x89c   : > { %6822 = vpow2.f32 %v5641_v6  ;;  %v5029_v21 = vsel %vm5028_vm13, %v6817_v8, %v5025_v57  ;;  %v5037_v45 = vmul.f32 %v6821_v17, %v4668_v39  ;;  %vm5042_vm2 = vweird.f32 %v6821_v17 }
 0x89d   : > { %6824 = vrcp.f32 %v4669_v47  ;;  %v5034_v22 = vsel %vm5031_vm1, %v5033_v24, %v5029_v21  ;;  %vm5043_vm4 = vmor %vm5041_vm3, %vm5042_vm2  ;;  %v5062_v2 = vand.u32 2147483648, %v4669_v47  ;;  %v5060_v28 = vand.u32 2147483647, %v4669_v47 }
 0x89e   : > { %5195 = vxpose.xlu2.b32.cont [8/16] (narrow) %v5034_v22, 8  ;;  %v5038_v49 = vsub.f32 1.0, %v5037_v45  ;;  %vm5056_vm7 = vweird.f32 %v4669_v47 }
 0x89f   : > { %v4535_v3 = vpop.f32.mrf.mxu2  ;;  %v5063_v55 = vor.u32 1.1754944e-38, %v5062_v2  ;;  %vm5061_vm9 = vcmp.eq.f32.partialorder %v5060_v28, 8.507059e+37 }
 0x8a0   : > { %v4536_v36 = vadd.f32 %v9823_v0, %v4535_v3  ;;  %v5039_v61 = vmul.f32 %v6821_v17, %v5038_v49 }
 0x8a2   : > { %v6823_v11 = vpop.eup %6822  ;;  %v5642_v13 = vmul.f32 -1.442695, %v4536_v36  ;;  %v5040_v50 = vadd.f32 %v6821_v17, %v5039_v61 }
 0x8a3   : > { %v6825_v5 = vpop.eup %6824  ;;  %v4670_v10 = vadd.f32 1.0, %v6823_v11 }
 0x8a4   : > { %6826 = vpow2.f32 %v5642_v13  ;;  %v5044_v48 = vsel %vm5043_vm4, %v6821_v17, %v5040_v50  ;;  %v5052_v29 = vmul.f32 %v6825_v5, %v4669_v47  ;;  %vm5057_vm6 = vweird.f32 %v6825_v5 }
 0x8a5   : > { %6828 = vrcp.f32 %v4670_v10  ;;  %v5049_v37 = vsel %vm5046_vm5, %v5048_v38, %v5044_v48  ;;  %vm5058_vm8 = vmor %vm5056_vm7, %vm5057_vm6  ;;  %v5077_v62 = vand.u32 2147483648, %v4670_v10  ;;  %v5075_v20 = vand.u32 2147483647, %v4670_v10 }
 0x8a6   : > { %5196 = vxpose.xlu2.b32.cont [9/16] (narrow) %v5049_v37, 8  ;;  %v5053_v9 = vsub.f32 1.0, %v5052_v29  ;;  %vm5071_vm11 = vweird.f32 %v4670_v10 }
 0x8a7   : > { %v4538_v27 = vpop.f32.mrf.mxu2  ;;  %v5078_v30 = vor.u32 1.1754944e-38, %v5077_v62  ;;  %vm5076_vm14 = vcmp.eq.f32.partialorder %v5075_v20, 8.507059e+37 }
 0x8a8   : > { %v4539_v43 = vadd.f32 %v9823_v0, %v4538_v27  ;;  %v5054_v60 = vmul.f32 %v6825_v5, %v5053_v9 }
 0x8aa   : > { %v6827_v54 = vpop.eup %6826  ;;  %v5643_v19 = vmul.f32 -1.442695, %v4539_v43  ;;  %v5055_v52 = vadd.f32 %v6825_v5, %v5054_v60 }
 0x8ab   : > { %v6829_v46 = vpop.eup %6828  ;;  %v4671_v34 = vadd.f32 1.0, %v6827_v54 }
 0x8ac   : > { %6830 = vpow2.f32 %v5643_v19  ;;  %v5059_v4 = vsel %vm5058_vm8, %v6825_v5, %v5055_v52  ;;  %v5067_v42 = vmul.f32 %v6829_v46, %v4670_v10  ;;  %vm5072_vm10 = vweird.f32 %v6829_v46 }
 0x8ad   : > { %6832 = vrcp.f32 %v4671_v34  ;;  %v5064_v51 = vsel %vm5061_vm9, %v5063_v55, %v5059_v4  ;;  %vm5073_vm12 = vmor %vm5071_vm11, %vm5072_vm10  ;;  %v5092_v16 = vand.u32 2147483648, %v4671_v34  ;;  %v5090_v53 = vand.u32 2147483647, %v4671_v34 }
 0x8ae   : > { %5197 = vxpose.xlu2.b32.cont [10/16] (narrow) %v5064_v51, 8  ;;  %v5068_v18 = vsub.f32 1.0, %v5067_v42  ;;  %vm5086_vm0 = vweird.f32 %v4671_v34 }
 0x8af   : > { %v4540_v40 = vpop.f32.mrf.mxu2  ;;  %v5093_v57 = vor.u32 1.1754944e-38, %v5092_v16  ;;  %vm5091_vm1 = vcmp.eq.f32.partialorder %v5090_v53, 8.507059e+37 }
 0x8b0   : > { %v4541_v31 = vadd.f32 %v9823_v0, %v4540_v40  ;;  %v5069_v59 = vmul.f32 %v6829_v46, %v5068_v18 }
 0x8b2   : > { %v6831_v1 = vpop.eup %6830  ;;  %v5644_v12 = vmul.f32 -1.442695, %v4541_v31  ;;  %v5070_v7 = vadd.f32 %v6829_v46, %v5069_v59 }
 0x8b3   : > { %v6833_v35 = vpop.eup %6832  ;;  %v4672_v32 = vadd.f32 1.0, %v6831_v1 }
 0x8b4   : > { %6834 = vpow2.f32 %v5644_v12  ;;  %v5074_v8 = vsel %vm5073_vm12, %v6829_v46, %v5070_v7  ;;  %v5082_v39 = vmul.f32 %v6833_v35, %v4671_v34  ;;  %vm5087_vm15 = vweird.f32 %v6833_v35 }
 0x8b5   : > { %6836 = vrcp.f32 %v4672_v32  ;;  %v5079_v14 = vsel %vm5076_vm14, %v5078_v30, %v5074_v8  ;;  %vm5088_vm13 = vmor %vm5086_vm0, %vm5087_vm15  ;;  %v5107_v22 = vand.u32 2147483648, %v4672_v32  ;;  %v5105_v56 = vand.u32 2147483647, %v4672_v32  ;;  %v5172_v8 = vpop.trf.xlu1 }
 0x8b6   : > { %5198 = vxpose.xlu2.b32.cont [11/16] (narrow) %v5079_v14, 8  ;;  %v5083_v23 = vsub.f32 1.0, %v5082_v39  ;;  %vm5101_vm3 = vweird.f32 %v4672_v32 }
 0x8b7   : > { %v4543_v15 = vpop.f32.mrf.mxu2  ;;  %v5108_v50 = vor.u32 1.1754944e-38, %v5107_v22  ;;  %vm5106_vm5 = vcmp.eq.f32.partialorder %v5105_v56, 8.507059e+37 }
 0x8b8   : > { %v4544_v25 = vadd.f32 %v9823_v0, %v4543_v15  ;;  %v5084_v44 = vmul.f32 %v6833_v35, %v5083_v23 }
 0x8ba   : > { %v6835_v41 = vpop.eup %6834  ;;  %v5645_v26 = vmul.f32 -1.442695, %v4544_v25  ;;  %v5085_v33 = vadd.f32 %v6833_v35, %v5084_v44 }
 0x8bb   : > { %v6837_v63 = vpop.eup %6836  ;;  %v4673_v6 = vadd.f32 1.0, %v6835_v41 }
 0x8bc   : > { %6838 = vpow2.f32 %v5645_v26  ;;  %v5089_v17 = vsel %vm5088_vm13, %v6833_v35, %v5085_v33  ;;  %v5097_v47 = vmul.f32 %v6837_v63, %v4672_v32  ;;  %vm5102_vm2 = vweird.f32 %v6837_v63 }
 0x8bd   : > { %6840 = vrcp.f32 %v4673_v6  ;;  %v5094_v24 = vsel %vm5091_vm1, %v5093_v57, %v5089_v17  ;;  %vm5103_vm4 = vmor %vm5101_vm3, %vm5102_vm2  ;;  %v5120_v37 = vand.u32 2147483647, %v4673_v6  ;;  %vm5116_vm7 = vweird.f32 %v4673_v6 }
 0x8be   : > { %5199 = vxpose.xlu2.b32.cont [12/16] (narrow) %v5094_v24, 8  ;;  %v5098_v21 = vsub.f32 1.0, %v5097_v47  ;;  %vm5223_vm2 = vcmask 1041408  }
 0x8bf   : > { %v4545_v45 = vpop.f32.mrf.mxu2  ;;  %vm5121_vm9 = vcmp.eq.f32.partialorder %v5120_v37, 8.507059e+37 }
 0x8c0   : > { %v4546_v49 = vadd.f32 %v9823_v0, %v4545_v45  ;;  %v5099_v3 = vmul.f32 %v6837_v63, %v5098_v21  ;;  %v5122_v0 = vand.u32 2147483648, %v4673_v6 }
 0x8c2   : > { %v6839_v36 = vpop.eup %6838  ;;  %v5646_v61 = vmul.f32 -1.442695, %v4546_v49  ;;  %v5100_v58 = vadd.f32 %v6837_v63, %v5099_v3  ;;  %v5123_v60 = vor.u32 1.1754944e-38, %v5122_v0 }
 0x8c3   : > { %v6841_v11 = vpop.eup %6840  ;;  %v4674_v13 = vadd.f32 1.0, %v6839_v36 }
 0x8c4   : > { %6842 = vpow2.f32 %v5646_v61  ;;  %v5104_v5 = vsel %vm5103_vm4, %v6837_v63, %v5100_v58  ;;  %v5112_v10 = vmul.f32 %v6841_v11, %v4673_v6  ;;  %vm5117_vm6 = vweird.f32 %v6841_v11 }
 0x8c5   : > { %6844 = vrcp.f32 %v4674_v13  ;;  %v5109_v38 = vsel %vm5106_vm5, %v5108_v50, %v5104_v5  ;;  %vm5118_vm8 = vmor %vm5116_vm7, %vm5117_vm6  ;;  %v5137_v46 = vand.u32 2147483648, %v4674_v13  ;;  %v5135_v55 = vand.u32 2147483647, %v4674_v13 }
 0x8c6   : > { %5200 = vxpose.xlu2.b32.cont [13/16] (narrow) %v5109_v38, 8  ;;  %v5113_v48 = vsub.f32 1.0, %v5112_v10  ;;  %vm5131_vm11 = vweird.f32 %v4674_v13 }
 0x8c7   : > { %v5138_v51 = vor.u32 1.1754944e-38, %v5137_v46  ;;  %vm5136_vm14 = vcmp.eq.f32.partialorder %v5135_v55, 8.507059e+37 }
 0x8c8   : > { %v5114_v29 = vmul.f32 %v6841_v11, %v5113_v48 }
 0x8ca   : > { %v6843_v9 = vpop.eup %6842  ;;  %v5115_v27 = vadd.f32 %v6841_v11, %v5114_v29 }
 0x8cb   : > { %v6845_v2 = vpop.eup %6844  ;;  %v4675_v43 = vadd.f32 1.0, %v6843_v9 }
 0x8cc   : > { %v5119_v28 = vsel %vm5118_vm8, %v6841_v11, %v5115_v27  ;;  %v5127_v54 = vmul.f32 %v6845_v2, %v4674_v13  ;;  %vm5132_vm10 = vweird.f32 %v6845_v2 }
 0x8cd   : > { %6846 = vrcp.f32 %v4675_v43  ;;  %v5124_v19 = vsel %vm5121_vm9, %v5123_v60, %v5119_v28  ;;  %vm5133_vm12 = vmor %vm5131_vm11, %vm5132_vm10  ;;  %v5152_v59 = vand.u32 2147483648, %v4675_v43  ;;  %v5150_v1 = vand.u32 2147483647, %v4675_v43 }
 0x8ce   : > { %5201 = vxpose.xlu2.b32.cont [14/16] (narrow) %v5124_v19, 8  ;;  %v5128_v52 = vsub.f32 1.0, %v5127_v54  ;;  %vm5146_vm0 = vweird.f32 %v4675_v43 }
 0x8cf   : > { %v5153_v7 = vor.u32 1.1754944e-38, %v5152_v59  ;;  %vm5151_vm1 = vcmp.eq.f32.partialorder %v5150_v1, 8.507059e+37 }
 0x8d0   : > { %v5129_v34 = vmul.f32 %v6845_v2, %v5128_v52 }
 0x8d2   : > { %v5130_v4 = vadd.f32 %v6845_v2, %v5129_v34 }
 0x8d3   : > { %v6847_v42 = vpop.eup %6846 }
 0x8d4   : > { %v5134_v18 = vsel %vm5133_vm12, %v6845_v2, %v5130_v4  ;;  %v5142_v40 = vmul.f32 %v6847_v42, %v4675_v43  ;;  %vm5147_vm15 = vweird.f32 %v6847_v42 }
 0x8d5   : > { %v5139_v62 = vsel %vm5136_vm14, %v5138_v51, %v5134_v18  ;;  %vm5148_vm13 = vmor %vm5146_vm0, %vm5147_vm15 }
 0x8d6   : > { %5202 = vxpose.xlu2.b32.cont [15/16] (narrow) %v5139_v62, 8  ;;  %v5143_v31 = vsub.f32 1.0, %v5142_v40 }
 0x8d8   : > { %v5144_v20 = vmul.f32 %v6847_v42, %v5143_v31 }
 0x8da   : > { %v5145_v12 = vadd.f32 %v6847_v42, %v5144_v20 }
 0x8dc   : > { %v5149_v35 = vsel %vm5148_vm13, %v6847_v42, %v5145_v12 }
 0x8dd   : > { %v5154_v32 = vsel %vm5151_vm1, %v5153_v7, %v5149_v35 }
 0x8de   : > { %5203 = vxpose.xlu2.b32.end [16/16] (narrow) %v5154_v32, 8 }
 0x8ff   : > { %v5204_v30 = vpop.trf.xlu2 }
 0x900   : > { %v5222_v39 = vrot.slane %v5204_v30, 6 }
 0x902   : > { %v5224_v14 = vsel %vm5223_vm2, %v5172_v8, %v5222_v39 }
 0x903   : > { %5226 = vst [vmem:[%s413_s23] sm:$0xf] %v5224_v14 }
 0x904 PF: > { %s22_s21 = sadd.s32 1, %s6856_s21  }
 0x905   : > { %p19_p4 = scmp.ge.s32.totalorder %s22_s21, 4  }
 0x907   :  { %21 = sbr.rel (!%p19_p4) target bundleno = 1 (0x1), region = 98 }

</bundles_post_ra>
